<compile_context>
chip_gen: v6e
topology: v6e:2x2x1
jax: 0.10.0
libtpu: 0.0.40
codegen_flags: <defaults>
</compile_context>

<pallas_src>
import jax
import jax.numpy as jnp
import numpy as np
from jax.experimental import pallas as pl
from jax.experimental.pallas import tpu as pltpu

LANE = 128


def _bottleneck_kernel(x_ref, w1_ref, b1_ref, w2_ref, b2_ref, w3_ref, b3_ref,
                       o_ref, y1pad_ref, col_ref):
    # x_ref block: (Nb, H, W, Cp); weights are BN-scale-folded, bf16, lane-padded.
    Nb, H, W, Cp = x_ref.shape
    Wp = w1_ref.shape[1]
    M = Nb * H * W

    # ---- conv1 (1x1) + bn1 bias + relu ----
    x_bf = x_ref[...].reshape(M, Cp).astype(jnp.bfloat16)
    y1 = jnp.dot(x_bf, w1_ref[...], preferred_element_type=jnp.float32)
    y1 = jnp.maximum(y1 + b1_ref[...], 0.0)

    # ---- stage y1 once into a zero-padded VMEM scratch (bf16 for the MXU) ----
    y1pad_ref[...] = jnp.zeros_like(y1pad_ref)
    y1pad_ref[:, 1:H + 1, 1:W + 1, :] = (
        y1.reshape(Nb, H, W, Wp).astype(jnp.bfloat16))

    # ---- conv2 (3x3, stride=1, pad=1) as a single im2col matmul ----
    # im2col columns ordered (dy, dx, cin) to match w2 reshape (3,3,Wp,Wp)->(9*Wp,Wp).
    for t in range(9):
        dy, dx = t // 3, t % 3
        patch = y1pad_ref[:, dy:dy + H, dx:dx + W, :]
        col_ref[:, t * Wp:(t + 1) * Wp] = patch.reshape(M, Wp)
    y2 = jnp.dot(col_ref[...], w2_ref[...], preferred_element_type=jnp.float32)
    y2 = jnp.maximum(y2 + b2_ref[...], 0.0)

    # ---- conv3 (1x1) + bn3 bias ----
    y3 = jnp.dot(y2.astype(jnp.bfloat16), w3_ref[...],
                 preferred_element_type=jnp.float32)
    y3 = y3 + b3_ref[...]

    # ---- residual add (re-read x block, f32) + relu ----
    out = jnp.maximum(y3 + x_ref[...].reshape(M, Cp), 0.0)
    o_ref[...] = out.reshape(Nb, H, W, Cp).astype(o_ref.dtype)


def _round_up(n, m):
    return (n + m - 1) // m * m


def _pad_to(a, axis, target):
    pad = target - a.shape[axis]
    if pad == 0:
        return a
    widths = [(0, 0)] * a.ndim
    widths[axis] = (0, pad)
    return jnp.pad(a, widths)


def _fold_bn(gamma, beta, mean, var, eps=1e-5):
    scale = gamma / jnp.sqrt(var + eps)
    bias = beta - mean * scale
    return scale, bias


def _pick_batch_block(N, H, W, Cp, Wp, budget_bytes=24 * 1024 * 1024):
    """Largest divisor of N whose per-step VMEM footprint fits the budget."""
    best = 1
    for nb in range(1, N + 1):
        if N % nb:
            continue
        m = nb * H * W
        est = (2 * 2 * m * Cp * 4                       # x & out blocks, dbl-buffered f32
               + nb * (H + 2) * (W + 2) * Wp * 2        # padded y1 scratch (bf16)
               + m * 9 * Wp * 2                         # im2col scratch (bf16)
               + 4 * m * max(Cp, Wp) * 4)               # f32 intermediates headroom
        if est <= budget_bytes:
            best = nb
    return best


@jax.jit
def bottleneck_forward(x_nhwc, alpha, params):
    """x_nhwc: (N, H, W, Cin) float32.  Returns (out_nhwc, alpha)."""
    N, H, W, Cin = x_nhwc.shape
    w1, bn1, w2, bn2, w3, bn3 = (params["w1"], params["bn1"], params["w2"],
                                 params["bn2"], params["w3"], params["bn3"])
    width = w1.shape[1]
    Cout = w3.shape[1]
    assert Cout == Cin, "downsample is None -> identity must match out channels"

    Cp = _round_up(Cin, LANE)
    Wp = _round_up(width, LANE)

    s1, b1 = _fold_bn(*bn1)
    s2, b2 = _fold_bn(*bn2)
    s3, b3 = _fold_bn(*bn3)

    # Fold BN scales into conv weights; pad channels to lane multiples; cast bf16.
    w1f = _pad_to(_pad_to(w1 * s1[None, :], 0, Cp), 1, Wp).astype(jnp.bfloat16)
    w2f = _pad_to(_pad_to(w2 * s2[None, None, None, :], 2, Wp), 3, Wp)
    w2f = w2f.reshape(9 * Wp, Wp).astype(jnp.bfloat16)      # rows ordered (dy, dx, cin)
    w3f = _pad_to(_pad_to(w3 * s3[None, :], 0, Wp), 1, Cp).astype(jnp.bfloat16)
    b1p = _pad_to(b1[None, :], 1, Wp).astype(jnp.float32)
    b2p = _pad_to(b2[None, :], 1, Wp).astype(jnp.float32)
    b3p = _pad_to(b3[None, :], 1, Cp).astype(jnp.float32)

    xp = _pad_to(x_nhwc, 3, Cp)

    Nb = _pick_batch_block(N, H, W, Cp, Wp)
    grid = (N // Nb,)

    def full(shape):
        zeros = (0,) * len(shape)
        return pl.BlockSpec(shape, lambda n, _z=zeros: _z)

    out_p = pl.pallas_call(
        _bottleneck_kernel,
        out_shape=jax.ShapeDtypeStruct((N, H, W, Cp), x_nhwc.dtype),
        grid_spec=pltpu.PrefetchScalarGridSpec(
            num_scalar_prefetch=0,
            grid=grid,
            in_specs=[
                pl.BlockSpec((Nb, H, W, Cp), lambda n: (n, 0, 0, 0)),  # x
                full((Cp, Wp)),            # w1 (scale-folded, bf16)
                full((1, Wp)),             # bn1 bias
                full((9 * Wp, Wp)),        # w2 im2col weight (bf16)
                full((1, Wp)),             # bn2 bias
                full((Wp, Cp)),            # w3 (bf16)
                full((1, Cp)),             # bn3 bias
            ],
            out_specs=pl.BlockSpec((Nb, H, W, Cp), lambda n: (n, 0, 0, 0)),
            scratch_shapes=[
                pltpu.VMEM((Nb, H + 2, W + 2, Wp), jnp.bfloat16),   # padded y1
                pltpu.VMEM((Nb * H * W, 9 * Wp), jnp.bfloat16),     # im2col buffer
            ],
        ),
        compiler_params=pltpu.CompilerParams(
            dimension_semantics=("parallel",),
            vmem_limit_bytes=32 * 1024 * 1024,
        ),
    )(xp, w1f, b1p, w2f, b2p, w3f, b3p)

    return out_p[..., :Cout], alpha


def _reference_forward(x_nhwc, params):
    """Pure-JAX f32 reference (NHWC / HWIO) for a sanity check."""
    def bn(y, p):
        g, b, m, v = p
        return (y - m) / jnp.sqrt(v + 1e-5) * g + b

    dn = ("NHWC", "HWIO", "NHWC")
    y = jax.lax.conv_general_dilated(x_nhwc, params["w1"][None, None],
                                     (1, 1), "VALID", dimension_numbers=dn)
    y = jax.nn.relu(bn(y, params["bn1"]))
    y = jax.lax.conv_general_dilated(y, params["w2"],
                                     (1, 1), "SAME", dimension_numbers=dn)
    y = jax.nn.relu(bn(y, params["bn2"]))
    y = jax.lax.conv_general_dilated(y, params["w3"][None, None],
                                     (1, 1), "VALID", dimension_numbers=dn)
    y = bn(y, params["bn3"])
    return jax.nn.relu(y + x_nhwc)


def make_params(key, inplanes, planes, base_width=64, groups=1, expansion=4):
    width = int(planes * (base_width / 64.0)) * groups
    out_ch = planes * expansion
    ks = jax.random.split(key, 16)

    def bn_params(k, c):
        k1, k2, k3, k4 = jax.random.split(k, 4)
        gamma = 1.0 + 0.1 * jax.random.normal(k1, (c,), jnp.float32)
        beta = 0.1 * jax.random.normal(k2, (c,), jnp.float32)
        mean = 0.1 * jax.random.normal(k3, (c,), jnp.float32)
        var = jax.random.uniform(k4, (c,), jnp.float32, 0.5, 1.5)
        return (gamma, beta, mean, var)

    return {
        "w1": 0.1 * jax.random.normal(ks[0], (inplanes, width), jnp.float32),
        "bn1": bn_params(ks[1], width),
        "w2": 0.1 * jax.random.normal(ks[2], (3, 3, width, width), jnp.float32),
        "bn2": bn_params(ks[3], width),
        "w3": 0.1 * jax.random.normal(ks[4], (width, out_ch), jnp.float32),
        "bn3": bn_params(ks[5], out_ch),
    }


if __name__ == "__main__":
    key = jax.random.PRNGKey(0)
    k_x, k_p = jax.random.split(key)

    # Small shapes: batch=2, planes=8 -> width=8, inplanes = planes*4 = 32,
    # spatial 8x8 (downsample=None requires inplanes == planes*expansion).
    N, H, W = 2, 8, 8
    planes = 8
    inplanes = planes * 4

    params = make_params(k_p, inplanes, planes)
    x_nchw = jax.random.normal(k_x, (N, inplanes, H, W), jnp.float32)
    x_nhwc = jnp.transpose(x_nchw, (0, 2, 3, 1))     # NCHW -> NHWC
    alpha = jnp.zeros((N,), jnp.float32)             # passed through unchanged

    out, alpha_out = bottleneck_forward(x_nhwc, alpha, params)
    out = jax.block_until_ready(out)

    ref = _reference_forward(x_nhwc, params)
    # bf16 MXU inputs (f32 accumulation) -> loosened tolerance vs f32 reference.
    np.testing.assert_allclose(np.asarray(out), np.asarray(ref),
                               rtol=2e-2, atol=2e-2)
    assert out.shape == (N, H, W, inplanes)
    assert jnp.all(alpha_out == alpha)
    print("KERNEL_OK")
</pallas_src>

<mosaic_0001>
module attributes {stable_mosaic.version = 11 : i64} {
  func.func @_bottleneck_kernel(%arg0: i32, %arg1: memref<2x8x8x128xf32, #tpu.memory_space<vmem>>, %arg2: memref<128x128xbf16, #tpu.memory_space<vmem>>, %arg3: memref<1x128xf32, #tpu.memory_space<vmem>>, %arg4: memref<1152x128xbf16, #tpu.memory_space<vmem>>, %arg5: memref<1x128xf32, #tpu.memory_space<vmem>>, %arg6: memref<128x128xbf16, #tpu.memory_space<vmem>>, %arg7: memref<1x128xf32, #tpu.memory_space<vmem>>, %arg8: memref<2x8x8x128xf32, #tpu.memory_space<vmem>>, %arg9: memref<2x10x10x128xbf16, #tpu.memory_space<vmem>>, %arg10: memref<128x1152xbf16, #tpu.memory_space<vmem>>) attributes {dimension_semantics = [#tpu.dimension_semantics<parallel>], iteration_bounds = array<i64: 1>, scalar_prefetch = 0 : i64, scratch_operands = 2 : i64, tpu.core_type = #tpu.core_type<tc>, window_params = [{transform_indices = @transform_0, window_bounds = array<i64: 2, 8, 8, 128>}, {pipeline_mode = #tpu.pipeline_mode<synchronous>, transform_indices = @transform_1, window_bounds = array<i64: 128, 128>}, {pipeline_mode = #tpu.pipeline_mode<synchronous>, transform_indices = @transform_2, window_bounds = array<i64: 1, 128>}, {pipeline_mode = #tpu.pipeline_mode<synchronous>, transform_indices = @transform_3, window_bounds = array<i64: 1152, 128>}, {pipeline_mode = #tpu.pipeline_mode<synchronous>, transform_indices = @transform_4, window_bounds = array<i64: 1, 128>}, {pipeline_mode = #tpu.pipeline_mode<synchronous>, transform_indices = @transform_5, window_bounds = array<i64: 128, 128>}, {pipeline_mode = #tpu.pipeline_mode<synchronous>, transform_indices = @transform_6, window_bounds = array<i64: 1, 128>}, {transform_indices = @transform_7, window_bounds = array<i64: 2, 8, 8, 128>}]} {
    %c0 = arith.constant 0 : index
    %c0_0 = arith.constant 0 : index
    %c0_1 = arith.constant 0 : index
    %c0_2 = arith.constant 0 : index
    %0 = vector.load %arg1[%c0, %c0_0, %c0_1, %c0_2] : memref<2x8x8x128xf32, #tpu.memory_space<vmem>>, vector<2x8x8x128xf32>
    %1 = vector.shape_cast %0 : vector<2x8x8x128xf32> to vector<128x128xf32>
    %2 = arith.truncf %1 : vector<128x128xf32> to vector<128x128xbf16>
    %c0_3 = arith.constant 0 : index
    %c0_4 = arith.constant 0 : index
    %3 = vector.load %arg2[%c0_3, %c0_4] : memref<128x128xbf16, #tpu.memory_space<vmem>>, vector<128x128xbf16>
    %cst = arith.constant dense<0.000000e+00> : vector<128x128xf32>
    %4 = tpu.matmul %2, %3, %cst {dimension_numbers = #tpu.dot_dimension_numbers<[1], [0], [0], [1], [0, 0, 1, 1], [], []>} : vector<128x128xbf16>, vector<128x128xbf16>, vector<128x128xf32> -> vector<128x128xf32>
    %c0_5 = arith.constant 0 : index
    %c0_6 = arith.constant 0 : index
    %5 = vector.load %arg3[%c0_5, %c0_6] : memref<1x128xf32, #tpu.memory_space<vmem>>, vector<1x128xf32>
    %6 = vector.broadcast %5 : vector<1x128xf32> to vector<128x128xf32>
    %7 = arith.addf %4, %6 : vector<128x128xf32>
    %cst_7 = arith.constant 0.000000e+00 : f32
    %8 = vector.broadcast %cst_7 : f32 to vector<128x128xf32>
    %9 = arith.maximumf %7, %8 : vector<128x128xf32>
    %cst_8 = arith.constant 0.000000e+00 : bf16
    %10 = vector.broadcast %cst_8 : bf16 to vector<2x10x10x128xbf16>
    %c0_9 = arith.constant 0 : index
    %c0_10 = arith.constant 0 : index
    %c0_11 = arith.constant 0 : index
    %c0_12 = arith.constant 0 : index
    %11 = vector.load %arg9[%c0_9, %c0_10, %c0_11, %c0_12] : memref<2x10x10x128xbf16, #tpu.memory_space<vmem>>, vector<2x10x10x128xbf16>
    tpu.vector_store %arg9[%c0_9, %c0_10, %c0_11, %c0_12], %10 {strides = array<i32>} : memref<2x10x10x128xbf16, #tpu.memory_space<vmem>>, vector<2x10x10x128xbf16>,
    %12 = vector.shape_cast %9 : vector<128x128xf32> to vector<2x8x8x128xf32>
    %13 = arith.truncf %12 : vector<2x8x8x128xf32> to vector<2x8x8x128xbf16>
    %c0_13 = arith.constant 0 : index
    %c1 = arith.constant 1 : index
    %c1_14 = arith.constant 1 : index
    %c0_15 = arith.constant 0 : index
    %14 = vector.load %arg9[%c0_13, %c1, %c1_14, %c0_15] : memref<2x10x10x128xbf16, #tpu.memory_space<vmem>>, vector<2x8x8x128xbf16>
    tpu.vector_store %arg9[%c0_13, %c1, %c1_14, %c0_15], %13 {strides = array<i32>} : memref<2x10x10x128xbf16, #tpu.memory_space<vmem>>, vector<2x8x8x128xbf16>,
    %c0_16 = arith.constant 0 : index
    %c0_17 = arith.constant 0 : index
    %c0_18 = arith.constant 0 : index
    %c0_19 = arith.constant 0 : index
    %15 = vector.load %arg9[%c0_16, %c0_17, %c0_18, %c0_19] : memref<2x10x10x128xbf16, #tpu.memory_space<vmem>>, vector<2x8x8x128xbf16>
    %16 = vector.shape_cast %15 : vector<2x8x8x128xbf16> to vector<128x128xbf16>
    %c0_20 = arith.constant 0 : index
    %c0_21 = arith.constant 0 : index
    %17 = vector.load %arg10[%c0_20, %c0_21] : memref<128x1152xbf16, #tpu.memory_space<vmem>>, vector<128x128xbf16>
    tpu.vector_store %arg10[%c0_20, %c0_21], %16 {strides = array<i32>} : memref<128x1152xbf16, #tpu.memory_space<vmem>>, vector<128x128xbf16>,
    %c0_22 = arith.constant 0 : index
    %c0_23 = arith.constant 0 : index
    %c1_24 = arith.constant 1 : index
    %c0_25 = arith.constant 0 : index
    %18 = vector.load %arg9[%c0_22, %c0_23, %c1_24, %c0_25] : memref<2x10x10x128xbf16, #tpu.memory_space<vmem>>, vector<2x8x8x128xbf16>
    %19 = vector.shape_cast %18 : vector<2x8x8x128xbf16> to vector<128x128xbf16>
    %c0_26 = arith.constant 0 : index
    %c128 = arith.constant 128 : index
    %20 = vector.load %arg10[%c0_26, %c128] : memref<128x1152xbf16, #tpu.memory_space<vmem>>, vector<128x128xbf16>
    tpu.vector_store %arg10[%c0_26, %c128], %19 {strides = array<i32>} : memref<128x1152xbf16, #tpu.memory_space<vmem>>, vector<128x128xbf16>,
    %c0_27 = arith.constant 0 : index
    %c0_28 = arith.constant 0 : index
    %c2 = arith.constant 2 : index
    %c0_29 = arith.constant 0 : index
    %21 = vector.load %arg9[%c0_27, %c0_28, %c2, %c0_29] : memref<2x10x10x128xbf16, #tpu.memory_space<vmem>>, vector<2x8x8x128xbf16>
    %22 = vector.shape_cast %21 : vector<2x8x8x128xbf16> to vector<128x128xbf16>
    %c0_30 = arith.constant 0 : index
    %c256 = arith.constant 256 : index
    %23 = vector.load %arg10[%c0_30, %c256] : memref<128x1152xbf16, #tpu.memory_space<vmem>>, vector<128x128xbf16>
    tpu.vector_store %arg10[%c0_30, %c256], %22 {strides = array<i32>} : memref<128x1152xbf16, #tpu.memory_space<vmem>>, vector<128x128xbf16>,
    %c0_31 = arith.constant 0 : index
    %c1_32 = arith.constant 1 : index
    %c0_33 = arith.constant 0 : index
    %c0_34 = arith.constant 0 : index
    %24 = vector.load %arg9[%c0_31, %c1_32, %c0_33, %c0_34] : memref<2x10x10x128xbf16, #tpu.memory_space<vmem>>, vector<2x8x8x128xbf16>
    %25 = vector.shape_cast %24 : vector<2x8x8x128xbf16> to vector<128x128xbf16>
    %c0_35 = arith.constant 0 : index
    %c384 = arith.constant 384 : index
    %26 = vector.load %arg10[%c0_35, %c384] : memref<128x1152xbf16, #tpu.memory_space<vmem>>, vector<128x128xbf16>
    tpu.vector_store %arg10[%c0_35, %c384], %25 {strides = array<i32>} : memref<128x1152xbf16, #tpu.memory_space<vmem>>, vector<128x128xbf16>,
    %c0_36 = arith.constant 0 : index
    %c1_37 = arith.constant 1 : index
    %c1_38 = arith.constant 1 : index
    %c0_39 = arith.constant 0 : index
    %27 = vector.load %arg9[%c0_36, %c1_37, %c1_38, %c0_39] : memref<2x10x10x128xbf16, #tpu.memory_space<vmem>>, vector<2x8x8x128xbf16>
    %28 = vector.shape_cast %27 : vector<2x8x8x128xbf16> to vector<128x128xbf16>
    %c0_40 = arith.constant 0 : index
    %c512 = arith.constant 512 : index
    %29 = vector.load %arg10[%c0_40, %c512] : memref<128x1152xbf16, #tpu.memory_space<vmem>>, vector<128x128xbf16>
    tpu.vector_store %arg10[%c0_40, %c512], %28 {strides = array<i32>} : memref<128x1152xbf16, #tpu.memory_space<vmem>>, vector<128x128xbf16>,
    %c0_41 = arith.constant 0 : index
    %c1_42 = arith.constant 1 : index
    %c2_43 = arith.constant 2 : index
    %c0_44 = arith.constant 0 : index
    %30 = vector.load %arg9[%c0_41, %c1_42, %c2_43, %c0_44] : memref<2x10x10x128xbf16, #tpu.memory_space<vmem>>, vector<2x8x8x128xbf16>
    %31 = vector.shape_cast %30 : vector<2x8x8x128xbf16> to vector<128x128xbf16>
    %c0_45 = arith.constant 0 : index
    %c640 = arith.constant 640 : index
    %32 = vector.load %arg10[%c0_45, %c640] : memref<128x1152xbf16, #tpu.memory_space<vmem>>, vector<128x128xbf16>
    tpu.vector_store %arg10[%c0_45, %c640], %31 {strides = array<i32>} : memref<128x1152xbf16, #tpu.memory_space<vmem>>, vector<128x128xbf16>,
    %c0_46 = arith.constant 0 : index
    %c2_47 = arith.constant 2 : index
    %c0_48 = arith.constant 0 : index
    %c0_49 = arith.constant 0 : index
    %33 = vector.load %arg9[%c0_46, %c2_47, %c0_48, %c0_49] : memref<2x10x10x128xbf16, #tpu.memory_space<vmem>>, vector<2x8x8x128xbf16>
    %34 = vector.shape_cast %33 : vector<2x8x8x128xbf16> to vector<128x128xbf16>
    %c0_50 = arith.constant 0 : index
    %c768 = arith.constant 768 : index
    %35 = vector.load %arg10[%c0_50, %c768] : memref<128x1152xbf16, #tpu.memory_space<vmem>>, vector<128x128xbf16>
    tpu.vector_store %arg10[%c0_50, %c768], %34 {strides = array<i32>} : memref<128x1152xbf16, #tpu.memory_space<vmem>>, vector<128x128xbf16>,
    %c0_51 = arith.constant 0 : index
    %c2_52 = arith.constant 2 : index
    %c1_53 = arith.constant 1 : index
    %c0_54 = arith.constant 0 : index
    %36 = vector.load %arg9[%c0_51, %c2_52, %c1_53, %c0_54] : memref<2x10x10x128xbf16, #tpu.memory_space<vmem>>, vector<2x8x8x128xbf16>
    %37 = vector.shape_cast %36 : vector<2x8x8x128xbf16> to vector<128x128xbf16>
    %c0_55 = arith.constant 0 : index
    %c896 = arith.constant 896 : index
    %38 = vector.load %arg10[%c0_55, %c896] : memref<128x1152xbf16, #tpu.memory_space<vmem>>, vector<128x128xbf16>
    tpu.vector_store %arg10[%c0_55, %c896], %37 {strides = array<i32>} : memref<128x1152xbf16, #tpu.memory_space<vmem>>, vector<128x128xbf16>,
    %c0_56 = arith.constant 0 : index
    %c2_57 = arith.constant 2 : index
    %c2_58 = arith.constant 2 : index
    %c0_59 = arith.constant 0 : index
    %39 = vector.load %arg9[%c0_56, %c2_57, %c2_58, %c0_59] : memref<2x10x10x128xbf16, #tpu.memory_space<vmem>>, vector<2x8x8x128xbf16>
    %40 = vector.shape_cast %39 : vector<2x8x8x128xbf16> to vector<128x128xbf16>
    %c0_60 = arith.constant 0 : index
    %c1024 = arith.constant 1024 : index
    %41 = vector.load %arg10[%c0_60, %c1024] : memref<128x1152xbf16, #tpu.memory_space<vmem>>, vector<128x128xbf16>
    tpu.vector_store %arg10[%c0_60, %c1024], %40 {strides = array<i32>} : memref<128x1152xbf16, #tpu.memory_space<vmem>>, vector<128x128xbf16>,
    %c0_61 = arith.constant 0 : index
    %c0_62 = arith.constant 0 : index
    %42 = vector.load %arg10[%c0_61, %c0_62] : memref<128x1152xbf16, #tpu.memory_space<vmem>>, vector<128x1152xbf16>
    %c0_63 = arith.constant 0 : index
    %c0_64 = arith.constant 0 : index
    %43 = vector.load %arg4[%c0_63, %c0_64] : memref<1152x128xbf16, #tpu.memory_space<vmem>>, vector<1152x128xbf16>
    %cst_65 = arith.constant dense<0.000000e+00> : vector<128x128xf32>
    %44 = tpu.matmul %42, %43, %cst_65 {dimension_numbers = #tpu.dot_dimension_numbers<[1], [0], [0], [1], [0, 0, 1, 1], [], []>} : vector<128x1152xbf16>, vector<1152x128xbf16>, vector<128x128xf32> -> vector<128x128xf32>
    %c0_66 = arith.constant 0 : index
    %c0_67 = arith.constant 0 : index
    %45 = vector.load %arg5[%c0_66, %c0_67] : memref<1x128xf32, #tpu.memory_space<vmem>>, vector<1x128xf32>
    %46 = vector.broadcast %45 : vector<1x128xf32> to vector<128x128xf32>
    %47 = arith.addf %44, %46 : vector<128x128xf32>
    %cst_68 = arith.constant 0.000000e+00 : f32
    %48 = vector.broadcast %cst_68 : f32 to vector<128x128xf32>
    %49 = arith.maximumf %47, %48 : vector<128x128xf32>
    %50 = arith.truncf %49 : vector<128x128xf32> to vector<128x128xbf16>
    %c0_69 = arith.constant 0 : index
    %c0_70 = arith.constant 0 : index
    %51 = vector.load %arg6[%c0_69, %c0_70] : memref<128x128xbf16, #tpu.memory_space<vmem>>, vector<128x128xbf16>
    %cst_71 = arith.constant dense<0.000000e+00> : vector<128x128xf32>
    %52 = tpu.matmul %50, %51, %cst_71 {dimension_numbers = #tpu.dot_dimension_numbers<[1], [0], [0], [1], [0, 0, 1, 1], [], []>} : vector<128x128xbf16>, vector<128x128xbf16>, vector<128x128xf32> -> vector<128x128xf32>
    %c0_72 = arith.constant 0 : index
    %c0_73 = arith.constant 0 : index
    %53 = vector.load %arg7[%c0_72, %c0_73] : memref<1x128xf32, #tpu.memory_space<vmem>>, vector<1x128xf32>
    %54 = vector.broadcast %53 : vector<1x128xf32> to vector<128x128xf32>
    %55 = arith.addf %52, %54 : vector<128x128xf32>
    %c0_74 = arith.constant 0 : index
    %c0_75 = arith.constant 0 : index
    %c0_76 = arith.constant 0 : index
    %c0_77 = arith.constant 0 : index
    %56 = vector.load %arg1[%c0_74, %c0_75, %c0_76, %c0_77] : memref<2x8x8x128xf32, #tpu.memory_space<vmem>>, vector<2x8x8x128xf32>
    %57 = vector.shape_cast %56 : vector<2x8x8x128xf32> to vector<128x128xf32>
    %58 = arith.addf %55, %57 : vector<128x128xf32>
    %cst_78 = arith.constant 0.000000e+00 : f32
    %59 = vector.broadcast %cst_78 : f32 to vector<128x128xf32>
    %60 = arith.maximumf %58, %59 : vector<128x128xf32>
    %61 = vector.shape_cast %60 : vector<128x128xf32> to vector<2x8x8x128xf32>
    %c0_79 = arith.constant 0 : index
    %c0_80 = arith.constant 0 : index
    %c0_81 = arith.constant 0 : index
    %c0_82 = arith.constant 0 : index
    %62 = vector.load %arg8[%c0_79, %c0_80, %c0_81, %c0_82] : memref<2x8x8x128xf32, #tpu.memory_space<vmem>>, vector<2x8x8x128xf32>
    tpu.vector_store %arg8[%c0_79, %c0_80, %c0_81, %c0_82], %61 {strides = array<i32>} : memref<2x8x8x128xf32, #tpu.memory_space<vmem>>, vector<2x8x8x128xf32>,
    return
  }
  func.func @transform_0(%arg0: i32) -> (i32, i32, i32, i32) {
    %c0_i32 = arith.constant 0 : i32
    %c0_i32_0 = arith.constant 0 : i32
    %c0_i32_1 = arith.constant 0 : i32
    %c0_i32_2 = arith.constant 0 : i32
    return %arg0, %c0_i32, %c0_i32_0, %c0_i32_1 : i32, i32, i32, i32
  }
  func.func @transform_1(%arg0: i32) -> (i32, i32) {
    %c0_i32 = arith.constant 0 : i32
    %c0_i32_0 = arith.constant 0 : i32
    %c0_i32_1 = arith.constant 0 : i32
    return %c0_i32, %c0_i32_0 : i32, i32
  }
  func.func @transform_2(%arg0: i32) -> (i32, i32) {
    %c0_i32 = arith.constant 0 : i32
    %c0_i32_0 = arith.constant 0 : i32
    %c0_i32_1 = arith.constant 0 : i32
    return %c0_i32, %c0_i32_0 : i32, i32
  }
  func.func @transform_3(%arg0: i32) -> (i32, i32) {
    %c0_i32 = arith.constant 0 : i32
    %c0_i32_0 = arith.constant 0 : i32
    %c0_i32_1 = arith.constant 0 : i32
    return %c0_i32, %c0_i32_0 : i32, i32
  }
  func.func @transform_4(%arg0: i32) -> (i32, i32) {
    %c0_i32 = arith.constant 0 : i32
    %c0_i32_0 = arith.constant 0 : i32
    %c0_i32_1 = arith.constant 0 : i32
    return %c0_i32, %c0_i32_0 : i32, i32
  }
  func.func @transform_5(%arg0: i32) -> (i32, i32) {
    %c0_i32 = arith.constant 0 : i32
    %c0_i32_0 = arith.constant 0 : i32
    %c0_i32_1 = arith.constant 0 : i32
    return %c0_i32, %c0_i32_0 : i32, i32
  }
  func.func @transform_6(%arg0: i32) -> (i32, i32) {
    %c0_i32 = arith.constant 0 : i32
    %c0_i32_0 = arith.constant 0 : i32
    %c0_i32_1 = arith.constant 0 : i32
    return %c0_i32, %c0_i32_0 : i32, i32
  }
  func.func @transform_7(%arg0: i32) -> (i32, i32, i32, i32) {
    %c0_i32 = arith.constant 0 : i32
    %c0_i32_0 = arith.constant 0 : i32
    %c0_i32_1 = arith.constant 0 : i32
    %c0_i32_2 = arith.constant 0 : i32
    return %arg0, %c0_i32, %c0_i32_0, %c0_i32_1 : i32, i32, i32, i32
  }
}

</mosaic_0001>

<bundles_post_ra>
// kernel: bottleneck_forward.1
= control target key start
LH: loop header
LB: loop body
LE: loop exit
PB: predicated region body
PF: predicated region fallthrough
CT: control target
= control target key end

     0   :  { %s5696_s0 = inlined_call_operand.vmem [shape: f32[2,8,8,128], index: 0, kind: input, shape index: {}]   ;;  %s5697_s1 = inlined_call_operand.vmem [shape: bf16[128,128], index: 1, kind: input, shape index: {}]   ;;  %s5698_s2 = inlined_call_operand.vmem [shape: f32[1,128], index: 2, kind: input, shape index: {}]   ;;  %s5699_s3 = inlined_call_operand.vmem [shape: bf16[1152,128], index: 3, kind: input, shape index: {}]   ;;  %s5700_s4 = inlined_call_operand.vmem [shape: f32[1,128], index: 4, kind: input, shape index: {}]   ;;  %s5701_s5 = inlined_call_operand.vmem [shape: bf16[128,128], index: 5, kind: input, shape index: {}]   ;;  %s5702_s6 = inlined_call_operand.vmem [shape: f32[1,128], index: 6, kind: input, shape index: {}]   ;;  %s5703_s7 = inlined_call_operand.hbm [shape: f32[2,8,8,128], index: 7, kind: output, shape index: {}]  }
   0x1   :  { %v4501_v0 = vld [vmem:[%s5697_s1 + $0x38] sm:$0xff]   ;;  %v4502_v1 = vld [vmem:[%s5697_s1 + $0x30] sm:$0xff]   ;;  %v4503_v2 = vld [vmem:[%s5697_s1 + $0x28] sm:$0xff]  }
   0x2   :  { %4385 = vmatprep.subr.bf16.mxu0 %v4501_v0  ;;  %v4504_v3 = vld [vmem:[%s5697_s1 + $0x20] sm:$0xff]   ;;  %v29_v5 = vld [vmem:[%s5696_s0 + $0x8] sm:$0xff]  ;;  %v4505_v7 = vld [vmem:[%s5697_s1 + $0x18] sm:$0xff]  }
   0x3   :  { %4386 = vmatpush3.bf16.msra.mxu0 %v4501_v0  ;;  %v28_v4 = vld [vmem:[%s5696_s0] sm:$0xff]  ;;  %v4506_v8 = vld [vmem:[%s5697_s1 + $0x10] sm:$0xff]   ;;  %v4507_v9 = vld [vmem:[%s5697_s1 + $0x8] sm:$0xff]  }
   0x4   :  { %4387 = vmatprep.subr.bf16.mxu0 %v4502_v1  ;;  %v44_v6 = vpack.c.bf16 %v29_v5, %v28_v4  ;;  %v4508_v10 = vld [vmem:[%s5697_s1] sm:$0xff]   ;;  %v30_v11 = vld [vmem:[%s5696_s0 + $0x10] sm:$0xff]  ;;  %v31_v12 = vld [vmem:[%s5696_s0 + $0x18] sm:$0xff] }
   0x5   :  { %v32_v13 = vld [vmem:[%s5696_s0 + $0x20] sm:$0xff]  ;;  %v33_v14 = vld [vmem:[%s5696_s0 + $0x28] sm:$0xff]  ;;  %v45_v15 = vpack.c.bf16 %v31_v12, %v30_v11  ;;  %v34_v17 = vld [vmem:[%s5696_s0 + $0x30] sm:$0xff] }
   0x6   :  { %4401 = vmatprep.mubr.bf16.mxu0 %v44_v6  ;;  %v46_v16 = vpack.c.bf16 %v33_v14, %v32_v13  ;;  %v35_v18 = vld [vmem:[%s5696_s0 + $0x38] sm:$0xff]  ;;  %v36_v19 = vld [vmem:[%s5696_s0 + $0x40] sm:$0xff]  ;;  %v37_v20 = vld [vmem:[%s5696_s0 + $0x48] sm:$0xff] }
   0x7   :  { %4388 = vmatpush3.bf16.msra.mxu0 %v4502_v1  ;;  %v47_v21 = vpack.c.bf16 %v35_v18, %v34_v17  ;;  %v48_v22 = vpack.c.bf16 %v37_v20, %v36_v19  ;;  %v38_v23 = vld [vmem:[%s5696_s0 + $0x50] sm:$0xff]  ;;  %v39_v24 = vld [vmem:[%s5696_s0 + $0x58] sm:$0xff]  ;;  %v40_v25 = vld [vmem:[%s5696_s0 + $0x60] sm:$0xff] }
   0x8   :  { %4389 = vmatprep.subr.bf16.mxu0 %v4503_v2  ;;  %v41_v26 = vld [vmem:[%s5696_s0 + $0x68] sm:$0xff]  ;;  %v49_v27 = vpack.c.bf16 %v39_v24, %v38_v23  ;;  %v42_v29 = vld [vmem:[%s5696_s0 + $0x70] sm:$0xff]  ;;  %v43_v30 = vld [vmem:[%s5696_s0 + $0x78] sm:$0xff] }
   0x9   :  { %v50_v28 = vpack.c.bf16 %v41_v26, %v40_v25  ;;  %v51_v31 = vpack.c.bf16 %v43_v30, %v42_v29 }
   0xb   :  { %4390 = vmatpush3.bf16.msra.mxu0 %v4503_v2 }
   0xc   :  { %4391 = vmatprep.subr.bf16.mxu0 %v4504_v3 }
   0xf   :  { %4392 = vmatpush3.bf16.msra.mxu0 %v4504_v3 }
  0x10   :  { %4393 = vmatprep.subr.bf16.mxu0 %v4505_v7 }
  0x13   :  { %4394 = vmatpush3.bf16.msra.mxu0 %v4505_v7 }
  0x14   :  { %4395 = vmatprep.subr.bf16.mxu0 %v4506_v8 }
  0x17   :  { %4396 = vmatpush3.bf16.msra.mxu0 %v4506_v8 }
  0x18   :  { %4397 = vmatprep.subr.bf16.mxu0 %v4507_v9 }
  0x1b   :  { %4398 = vmatpush3.bf16.msra.mxu0 %v4507_v9 }
  0x1c   :  { %4399 = vmatprep.subr.bf16.mxu0 %v4508_v10 }
  0x1f   :  { %4400 = vmatpush3.bf16.msra.mxu0 %v4508_v10 }
  0x22   :  { %4402 = vmatmul.mubr.bf16.vlgmr.msra.gmra.mxu0 %v45_v15 }
  0x23   :  { %4405 = vmatprep.mubr.bf16.mxu0 %v46_v16 }
  0x2a   :  { %4406 = vmatmul.mubr.bf16.gmra.mxu0 %v47_v21 }
  0x2b   :  { %4409 = vmatprep.mubr.bf16.mxu0 %v48_v22 }
  0x32   :  { %4410 = vmatmul.mubr.bf16.gmra.mxu0 %v49_v27 }
  0x33   :  { %4413 = vmatprep.mubr.bf16.mxu0 %v50_v28 }
  0x3a   :  { %4414 = vmatmul.mubr.bf16.gmra.mxu0 %v51_v31 }
  0x3b   :  { %12 = vsyncpa [#allocation5], 0  ;;  %v4701_v32 = vmov 0   ;;  %v4509_v33 = vld [vmem:[%s5699_s3 + $0xf8] sm:$0xff]   ;;  %v4512_v36 = vld [vmem:[%s5699_s3 + $0xf0] sm:$0xff]   ;;  %vm990_vm0 = vcmask 1042432  }
  0x3c   :  { %242 = vst [vmem:[#allocation2 + $0x18] sm:$0xf] %v4701_v32  ;;  %243 = vst [vmem:[#allocation2 + $0x1c] sm:$0x1] %v4701_v32  ;;  %v4510_v34 = vld [vmem:[%s5699_s3 + $0xb8] sm:$0xff]   ;;  %4161 = vmatprep.subr.bf16.mxu0 %v4509_v33  ;;  %v4514_v38 = vld [vmem:[%s5699_s3 + $0xb0] sm:$0xff]  }
  0x3d   :  { %236 = vst [vmem:[#allocation2] sm:$0xf] %v4701_v32  ;;  %237 = vst [vmem:[#allocation2 + $0x4] sm:$0x1] %v4701_v32  ;;  %4162 = vmatpush3.bf16.msra.mxu0 %v4510_v34  ;;  %v4511_v35 = vld [vmem:[%s5699_s3 + $0x78] sm:$0xff]   ;;  %v4516_v39 = vld [vmem:[%s5699_s3 + $0xe8] sm:$0xff]  }
  0x3e   :  { %238 = vst [vmem:[#allocation2 + $0x8] sm:$0xf] %v4701_v32  ;;  %239 = vst [vmem:[#allocation2 + $0xc] sm:$0x1] %v4701_v32  ;;  %v4513_v37 = vld [vmem:[%s5699_s3 + $0x38] sm:$0xff]   ;;  %4097 = vmatprep.subr.bf16.mxu1 %v4511_v35  ;;  %4163 = vmatprep.subr.bf16.mxu0 %v4512_v36  ;;  %v4515_v40 = vld [vmem:[%s5699_s3 + $0x70] sm:$0xff]  }
  0x3f   :  { %240 = vst [vmem:[#allocation2 + $0x10] sm:$0xf] %v4701_v32  ;;  %241 = vst [vmem:[#allocation2 + $0x14] sm:$0x1] %v4701_v32  ;;  %4098 = vmatpush3.bf16.msra.mxu1 %v4513_v37  ;;  %v4517_v41 = vld [vmem:[%s5699_s3 + $0x30] sm:$0xff]   ;;  %v4518_v42 = vld [vmem:[%s5699_s3 + $0xa8] sm:$0xff]  }
  0x40   :  { %244 = vst [vmem:[#allocation2 + $0x20] sm:$0xf] %v4701_v32  ;;  %245 = vst [vmem:[#allocation2 + $0x24] sm:$0x1] %v4701_v32  ;;  %4099 = vmatprep.subr.bf16.mxu1 %v4515_v40  ;;  %v4520_v43 = vld [vmem:[%s5699_s3 + $0xe0] sm:$0xff]   ;;  %v4519_v44 = vld [vmem:[%s5699_s3 + $0x68] sm:$0xff]  }
  0x41   :  { %246 = vst [vmem:[#allocation2 + $0x28] sm:$0xf] %v4701_v32  ;;  %247 = vst [vmem:[#allocation2 + $0x2c] sm:$0x1] %v4701_v32  ;;  %4164 = vmatpush3.bf16.msra.mxu0 %v4514_v38  ;;  %v4522_v45 = vld [vmem:[%s5699_s3 + $0xa0] sm:$0xff]   ;;  %v4521_v46 = vld [vmem:[%s5699_s3 + $0x28] sm:$0xff]  }
  0x42   :  { %248 = vst [vmem:[#allocation2 + $0x30] sm:$0xf] %v4701_v32  ;;  %249 = vst [vmem:[#allocation2 + $0x34] sm:$0x1] %v4701_v32  ;;  %4165 = vmatprep.subr.bf16.mxu0 %v4516_v39  ;;  %v4523_v47 = vld [vmem:[%s5699_s3 + $0x60] sm:$0xff]   ;;  %v4524_v48 = vld [vmem:[%s5699_s3 + $0xd8] sm:$0xff]  }
  0x43   :  { %250 = vst [vmem:[#allocation2 + $0x38] sm:$0xf] %v4701_v32  ;;  %251 = vst [vmem:[#allocation2 + $0x3c] sm:$0x1] %v4701_v32  ;;  %4100 = vmatpush3.bf16.msra.mxu1 %v4517_v41  ;;  %v4526_v49 = vld [vmem:[%s5699_s3 + $0x98] sm:$0xff]   ;;  %vm991_vm1 = vcmask 1046532  }
  0x44   :  { %252 = vst [vmem:[#allocation2 + $0x40] sm:$0xf] %v4701_v32  ;;  %253 = vst [vmem:[#allocation2 + $0x44] sm:$0x1] %v4701_v32  ;;  %4101 = vmatprep.subr.bf16.mxu1 %v4519_v44  ;;  %v4525_v50 = vld [vmem:[%s5699_s3 + $0x20] sm:$0xff]   ;;  %v4528_v56 = vld [vmem:[%s5699_s3 + $0xd0] sm:$0xff]  }
  0x45   :  { %254 = vst [vmem:[#allocation2 + $0x48] sm:$0xf] %v4701_v32  ;;  %255 = vst [vmem:[#allocation2 + $0x4c] sm:$0x1] %v4701_v32  ;;  %4166 = vmatpush3.bf16.msra.mxu0 %v4518_v42  ;;  %v926_v51 = vld [vmem:[#allocation2] sm:$0xe] }
  0x46   :  { %256 = vst [vmem:[#allocation2 + $0x50] sm:$0xf] %v4701_v32  ;;  %257 = vst [vmem:[#allocation2 + $0x54] sm:$0x1] %v4701_v32  ;;  %4167 = vmatprep.subr.bf16.mxu0 %v4520_v43  ;;  %v927_v52 = vld [vmem:[#allocation2 + $0x4] sm:$0x1] }
  0x47   :  { %258 = vst [vmem:[#allocation2 + $0x58] sm:$0xf] %v4701_v32  ;;  %259 = vst [vmem:[#allocation2 + $0x5c] sm:$0x1] %v4701_v32  ;;  %4102 = vmatpush3.bf16.msra.mxu1 %v4521_v46  ;;  %v3863_v54 = vrot.slane %v926_v51, 9  ;;  %v995_v55 = vrot.slane %v927_v52, 5 }
  0x48   :  { %260 = vst [vmem:[#allocation2 + $0x60] sm:$0xf] %v4701_v32  ;;  %261 = vst [vmem:[#allocation2 + $0x64] sm:$0x1] %v4701_v32  ;;  %4103 = vmatprep.subr.bf16.mxu1 %v4523_v47  ;;  %v4527_v57 = vld [vmem:[%s5699_s3 + $0x58] sm:$0xff]   ;;  %v4530_v58 = vld [vmem:[%s5699_s3 + $0x90] sm:$0xff]  }
  0x49   :  { %262 = vst [vmem:[#allocation2 + $0x68] sm:$0xf] %v4701_v32  ;;  %263 = vst [vmem:[#allocation2 + $0x6c] sm:$0x1] %v4701_v32  ;;  %4168 = vmatpush3.bf16.msra.mxu0 %v4522_v45  ;;  %v4529_v60 = vld [vmem:[%s5699_s3 + $0x18] sm:$0xff]   ;;  %v4532_v61 = vld [vmem:[%s5699_s3 + $0xc8] sm:$0xff]  }
  0x4a   :  { %264 = vst [vmem:[#allocation2 + $0x70] sm:$0xf] %v4701_v32  ;;  %265 = vst [vmem:[#allocation2 + $0x74] sm:$0x1] %v4701_v32  ;;  %4169 = vmatprep.subr.bf16.mxu0 %v4524_v48  ;;  %v4531_v62 = vld [vmem:[%s5699_s3 + $0x50] sm:$0xff]   ;;  %v4534_v63 = vld [vmem:[%s5699_s3 + $0x88] sm:$0xff]  }
  0x4b   :  { %266 = vst [vmem:[#allocation2 + $0x78] sm:$0xf] %v4701_v32  ;;  %267 = vst [vmem:[#allocation2 + $0x7c] sm:$0x1] %v4701_v32  ;;  %4104 = vmatpush3.bf16.msra.mxu1 %v4525_v50  ;;  %v4533_v0 = vld [vmem:[%s5699_s3 + $0x10] sm:$0xff]   ;;  %v4536_v1 = vld [vmem:[%s5699_s3 + $0xc0] sm:$0xff]  }
  0x4c   :  { %268 = vst [vmem:[#allocation2 + $0x80] sm:$0xf] %v4701_v32  ;;  %269 = vst [vmem:[#allocation2 + $0x84] sm:$0x1] %v4701_v32  ;;  %4105 = vmatprep.subr.bf16.mxu1 %v4527_v57  ;;  %v4535_v2 = vld [vmem:[%s5699_s3 + $0x48] sm:$0xff]   ;;  %v4538_v3 = vld [vmem:[%s5699_s3 + $0x80] sm:$0xff]  }
  0x4d   :  { %270 = vst [vmem:[#allocation2 + $0x88] sm:$0xf] %v4701_v32  ;;  %271 = vst [vmem:[#allocation2 + $0x8c] sm:$0x1] %v4701_v32  ;;  %4170 = vmatpush3.bf16.msra.mxu0 %v4526_v49  ;;  %v4537_v4 = vld [vmem:[%s5699_s3 + $0x8] sm:$0xff]   ;;  %v4542_v14 = vld [vmem:[%s5699_s3 + $0x40] sm:$0xff]  }
  0x4e   :  { %272 = vst [vmem:[#allocation2 + $0x90] sm:$0xf] %v4701_v32  ;;  %273 = vst [vmem:[#allocation2 + $0x94] sm:$0x1] %v4701_v32  ;;  %4171 = vmatprep.subr.bf16.mxu0 %v4528_v56  ;;  %v635_v5 = vld [vmem:[#allocation2] sm:$0xf] }
  0x4f   :  { %274 = vst [vmem:[#allocation2 + $0x98] sm:$0xf] %v4701_v32  ;;  %275 = vst [vmem:[#allocation2 + $0x9c] sm:$0x1] %v4701_v32  ;;  %4106 = vmatpush3.bf16.msra.mxu1 %v4529_v60  ;;  %v671_v6 = vshrl.u32 %v635_v5, 16  ;;  %v674_v7 = vshll.u32 %v635_v5, 16 }
  0x50   :  { %vm4871_vm2 = vmor %vm990_vm0, %vm991_vm1  ;;  %4107 = vmatprep.subr.bf16.mxu1 %v4531_v62  ;;  %v636_v10 = vld [vmem:[#allocation2 + $0x4] sm:$0x1]  ;;  %vm667_vm3 = vsmask.f32 3328  ;;  %vm668_vm4 = vsmask.f32 7440 }
  0x51   :  { %v996_v59 = vsel %vm4871_vm2, %v3863_v54, %v995_v55  ;;  %4172 = vmatpush3.bf16.msra.mxu0 %v4530_v58  ;;  %v673_v8 = vrot.slane %v671_v6, 4  ;;  %v676_v9 = vrot.slane %v674_v7, 5  ;;  %v680_v12 = vshll.u32 %v636_v10, 16  ;;  %v4543_v16 = vld [vmem:[%s5699_s3] sm:$0xff]   ;;  %vm4919_vm5 = vmor %vm667_vm3, %vm668_vm4  ;;  %v4549_v20 = vld [vmem:[%s5699_s3 + $0x178] sm:$0xff]   ;;  %s4702_s19 = smov [#allocation4]  }
  0x52   :  { %1073 = vst [vmem:[#allocation3 + $0x8] sm:$0xf] %v996_v59  ;;  %4173 = vmatprep.subr.bf16.mxu0 %v4532_v61  ;;  %v603_v17 = vld [vmem:[#allocation2] sm:$0xf]  ;;  %v651_v21 = vld [vmem:[#allocation2 + $0x50] sm:$0xf] }
  0x53   :  { %4108 = vmatpush3.bf16.msra.mxu1 %v4533_v0  ;;  %v677_v11 = vor.u32 %v676_v9, %v673_v8  ;;  %v682_v15 = vrot.slane %v680_v12, 5  ;;  %619 = vst [vmem:[#allocation3] sm:$0xf] %v603_v17  ;;  %v783_v22 = vshrl.u32 %v651_v21, 16  ;;  %v786_v23 = vshll.u32 %v651_v21, 16  ;;  %v4574_v38 = vld [vmem:[%s5699_s3 + $0x1f8] sm:$0xff]  }
  0x54   :  { %4109 = vmatprep.subr.bf16.mxu1 %v4535_v2  ;;  %v652_v26 = vld [vmem:[#allocation2 + $0x54] sm:$0x1]  ;;  %v942_v29 = vld [vmem:[#allocation2 + $0x50] sm:$0xe]  ;;  %v4938_v39 = vld [vmem:[%s5698_s2] ss:$0 sm:$0xff] }
  0x55   :  { %4174 = vmatpush3.bf16.msra.mxu0 %v4534_v63  ;;  %v678_v13 = vrot.slane %v677_v11, 4  ;;  %v785_v24 = vrot.slane %v783_v22, 4  ;;  %v788_v25 = vrot.slane %v786_v23, 5  ;;  %v792_v28 = vshll.u32 %v652_v26, 16  ;;  %v943_v30 = vld [vmem:[#allocation2 + $0x54] sm:$0x1] }
  0x56   :  { %4175 = vmatprep.subr.bf16.mxu0 %v4536_v1  ;;  %v3871_v31 = vrot.slane %v942_v29, 9  ;;  %v1027_v32 = vrot.slane %v943_v30, 5  ;;  %v611_v36 = vld [vmem:[#allocation2 + $0x50] sm:$0xf]  ;;  %vm501_vm6 = vcmask 1043456   ;;  %vm507_vm8 = vcmask 1040384  }
  0x57   :  { %4110 = vmatpush3.bf16.msra.mxu1 %v4537_v4  ;;  %v683_v19 = vsel %vm4919_vm5, %v678_v13, %v682_v15  ;;  %v789_v27 = vor.u32 %v788_v25, %v785_v24  ;;  %v794_v34 = vrot.slane %v792_v28, 5  ;;  %627 = vst [vmem:[#allocation3 + $0x120] sm:$0xf] %v611_v36  ;;  %vm502_vm7 = vsmask.f32 7938  ;;  %s3827_s20 = sshll.u32 %s4702_s19, 4  ;;  %s3828_s20 = int_to_ptr.vmem [resolvable:$true] %s3827_s20 }
  0x58   :  { %4111 = vmatprep.subr.bf16.mxu1 %v4542_v14  ;;  %910 = vst [vmem:[#allocation3 + $0x4] sm:$0xf] %v683_v19  ;;  %v1028_v35 = vsel %vm4871_vm2, %v3871_v31, %v1027_v32  ;;  %vm508_vm9 = vsmask.f32 256  ;;  %vm4944_vm10 = vmand %vm501_vm6, %vm502_vm7  ;;  %v519_v62 = vld [vmem:[#allocation2 + $0x18] sm:$0xf]  ;;  %p4684_p1 = scmp.lt.s32.totalorder %s3828_s20, %s3828_s20 }
  0x59   :  { %4176 = vmatpush3.bf16.msra.mxu0 %v4538_v3  ;;  %v790_v33 = vrot.slane %v789_v27, 4  ;;  %1081 = vst [vmem:[#allocation3 + $0x128] sm:$0xf] %v1028_v35  ;;  %vm4948_vm11 = vmand %vm507_vm8, %vm508_vm9  ;;  %v522_v63 = vld [vmem:[#allocation2 + $0x1c] sm:$0x1]  ;;  %s4679_s21 = scalar_lea.vmem %s3828_s20, 2048 }
  0x5a   :  { %4289 = vmatprep.subr.bf16.mxu0 %v4574_v38  ;;  %v504_v8 = vld [vmem:[#allocation2 + $0x8] sm:$0xf]  ;;  %v510_v9 = vld [vmem:[#allocation2 + $0xc] sm:$0x1]  ;;  %v525_v27 = vld [vmem:[#allocation2 + $0x20] sm:$0xf]  ;;  %p4680_p0 = scmp.ne.s32.totalorder %s3828_s20, %s4679_s21  ;;  %p4685_p2 = scmp.lt.s32.totalorder %s4679_s21, %s4679_s21 }
  0x5b   :  { %4112 = vmatpush3.bf16.msra.mxu1 %v4543_v16  ;;  %v795_v37 = vsel %vm4919_vm5, %v790_v33, %v794_v34  ;;  %v528_v28 = vld [vmem:[#allocation2 + $0x24] sm:$0x1]  ;;  %v513_v36 = vld [vmem:[#allocation2 + $0x10] sm:$0xf] }
  0x5c   :  { %4225 = vmatprep.subr.bf16.mxu1 %v4549_v20  ;;  %918 = vst [vmem:[#allocation3 + $0x124] sm:$0xf] %v795_v37  ;;  %v516_v37 = vld [vmem:[#allocation2 + $0x14] sm:$0x1]  ;;  %p4686_p3 = por %p4685_p2, %p4684_p1 }
  0x5e   :  { %p4687_p4 = pnand %p4686_p3, %p4680_p0 }
  0xe2   :  { %v4403_v40 = vpop.f32.mrf.mxu0 }
  0xe3   :  { %v166_v41 = vadd.f32 %v4403_v40, %v4938_v39 }
  0xe4   :  { %v157_v42 = vpop.f32.mrf.mxu0 }
  0xe5   :  { %v222_v43 = vmax.f32 %v166_v41, 0.0  ;;  %v158_v44 = vadd.f32 %v4938_v39, %v157_v42 }
  0xe6   :  { %v4404_v45 = vpop.f32.mrf.mxu0 }
  0xe7   :  { %v4067_v46 = vpack.c.bf16 %v222_v43, %v222_v43  ;;  %v220_v47 = vmax.f32 %v158_v44, 0.0  ;;  %v169_v48 = vadd.f32 %v4404_v45, %v4938_v39 }
  0xe8   :  { %v160_v49 = vpop.f32.mrf.mxu0 }
  0xe9   :  { %v357_v50 = vshrl.u32 %v4067_v46, 16  ;;  %v4065_v51 = vpack.c.bf16 %v220_v47, %v220_v47  ;;  %v223_v52 = vmax.f32 %v169_v48, 0.0  ;;  %v161_v54 = vadd.f32 %v4938_v39, %v160_v49 }
  0xea   :  { %v4407_v55 = vpop.f32.mrf.mxu0  ;;  %v360_v57 = vshll.u32 %v4067_v46, 16 }
  0xeb   :  { %v359_v56 = vrot.slane %v357_v50, 7  ;;  %v341_v59 = vshrl.u32 %v4065_v51, 16  ;;  %v4068_v60 = vpack.c.bf16 %v223_v52, %v223_v52  ;;  %v344_v0 = vshll.u32 %v4065_v51, 16  ;;  %v1577_v52 = vld [vmem:[#allocation2 + $0x48] sm:$0xf] }
  0xec   :  { %v221_v1 = vmax.f32 %v161_v54, 0.0  ;;  %v182_v2 = vadd.f32 %v4407_v55, %v4938_v39  ;;  %v173_v3 = vpop.f32.mrf.mxu0  ;;  %1593 = vst [vmem:[#allocation3 + $0x114] sm:$0xf] %v1577_v52 }
  0xed   :  { %v362_v4 = vor.u32 %v360_v57, %v359_v56  ;;  %v363_v5 = vrot.slane %v359_v56, 4  ;;  %v343_v6 = vrot.slane %v341_v59, 7  ;;  %v365_v7 = vshrl.u32 %v4068_v60, 16  ;;  %v543_v56 = vld [vmem:[#allocation2 + $0x38] sm:$0xf] }
  0xee   :  { %v368_v10 = vshll.u32 %v4068_v60, 16  ;;  %v4066_v11 = vpack.c.bf16 %v221_v1, %v221_v1  ;;  %v226_v12 = vmax.f32 %v182_v2, 0.0  ;;  %v174_v13 = vadd.f32 %v4938_v39, %v173_v3  ;;  %v4408_v14 = vpop.f32.mrf.mxu0 }
  0xef   :  { %v520_v15 = vsel %vm4944_vm10, %v362_v4, %v519_v62  ;;  %v523_v16 = vsel %vm4948_vm11, %v363_v5, %v522_v63  ;;  %v346_v17 = vor.u32 %v344_v0, %v343_v6  ;;  %v347_v19 = vrot.slane %v343_v6, 4  ;;  %v546_v63 = vld [vmem:[#allocation2 + $0x3c] sm:$0x1] }
  0xf0   :  { %521 = vst [vmem:[#allocation2 + $0x18] sm:$0xf] %v520_v15  ;;  %524 = vst [vmem:[#allocation2 + $0x1c] sm:$0x1] %v523_v16  ;;  %v367_v20 = vrot.slane %v365_v7, 7  ;;  %v349_v21 = vshrl.u32 %v4066_v11, 16  ;;  %v4071_v23 = vpack.c.bf16 %v226_v12, %v226_v12  ;;  %v176_v24 = vpop.f32.mrf.mxu0  ;;  %v185_v30 = vadd.f32 %v4408_v14, %v4938_v39 }
  0xf1   :  { %v352_v22 = vshll.u32 %v4066_v11, 16  ;;  %v505_v25 = vsel %vm4944_vm10, %v346_v17, %v504_v8  ;;  %v511_v26 = vsel %vm4948_vm11, %v347_v19, %v510_v9  ;;  %v224_v29 = vmax.f32 %v174_v13, 0.0  ;;  %v531_v7 = vld [vmem:[#allocation2 + $0x28] sm:$0xf]  ;;  %v534_v8 = vld [vmem:[#allocation2 + $0x2c] sm:$0x1] }
  0xf2   :  { %506 = vst [vmem:[#allocation2 + $0x8] sm:$0xf] %v505_v25  ;;  %512 = vst [vmem:[#allocation2 + $0xc] sm:$0x1] %v511_v26  ;;  %v370_v31 = vor.u32 %v368_v10, %v367_v20  ;;  %v371_v32 = vrot.slane %v367_v20, 4  ;;  %v351_v33 = vrot.slane %v349_v21, 7  ;;  %v4411_v35 = vpop.f32.mrf.mxu0  ;;  %v177_v42 = vadd.f32 %v4938_v39, %v176_v24 }
  0xf3   :  { %v389_v34 = vshrl.u32 %v4071_v23, 16  ;;  %v392_v38 = vshll.u32 %v4071_v23, 16  ;;  %v4069_v40 = vpack.c.bf16 %v224_v29, %v224_v29  ;;  %v227_v41 = vmax.f32 %v185_v30, 0.0  ;;  %v549_v19 = vld [vmem:[#allocation2 + $0x40] sm:$0xf] }
  0xf4   :  { %v526_v43 = vsel %vm4944_vm10, %v370_v31, %v525_v27  ;;  %v529_v44 = vsel %vm4948_vm11, %v371_v32, %v528_v28  ;;  %v354_v45 = vor.u32 %v352_v22, %v351_v33  ;;  %v355_v46 = vrot.slane %v351_v33, 4  ;;  %v189_v47 = vpop.f32.mrf.mxu0  ;;  %v552_v28 = vld [vmem:[#allocation2 + $0x44] sm:$0x1] }
  0xf5   :  { %527 = vst [vmem:[#allocation2 + $0x20] sm:$0xf] %v526_v43  ;;  %530 = vst [vmem:[#allocation2 + $0x24] sm:$0x1] %v529_v44  ;;  %v391_v48 = vrot.slane %v389_v34, 7  ;;  %v373_v49 = vshrl.u32 %v4069_v40, 16  ;;  %v4072_v51 = vpack.c.bf16 %v227_v41, %v227_v41  ;;  %v198_v59 = vadd.f32 %v4411_v35, %v4938_v39 }
  0xf6   :  { %v376_v50 = vshll.u32 %v4069_v40, 16  ;;  %v514_v54 = vsel %vm4944_vm10, %v354_v45, %v513_v36  ;;  %v517_v55 = vsel %vm4948_vm11, %v355_v46, %v516_v37  ;;  %v225_v57 = vmax.f32 %v177_v42, 0.0  ;;  %v4412_v60 = vpop.f32.mrf.mxu0  ;;  %v537_v34 = vld [vmem:[#allocation2 + $0x30] sm:$0xf]  ;;  %v540_v35 = vld [vmem:[#allocation2 + $0x34] sm:$0x1] }
  0xf7   :  { %515 = vst [vmem:[#allocation2 + $0x10] sm:$0xf] %v514_v54  ;;  %518 = vst [vmem:[#allocation2 + $0x14] sm:$0x1] %v517_v55  ;;  %v394_v62 = vor.u32 %v392_v38, %v391_v48  ;;  %v190_v0 = vadd.f32 %v4938_v39, %v189_v47  ;;  %v395_v1 = vrot.slane %v391_v48, 4  ;;  %v375_v2 = vrot.slane %v373_v49, 7 }
  0xf8   :  { %v397_v3 = vshrl.u32 %v4072_v51, 16  ;;  %v400_v4 = vshll.u32 %v4072_v51, 16  ;;  %v192_v5 = vpop.f32.mrf.mxu0  ;;  %v4070_v9 = vpack.c.bf16 %v225_v57, %v225_v57  ;;  %v230_v10 = vmax.f32 %v198_v59, 0.0  ;;  %v1091_v24 = vld [vmem:[#allocation2 + $0x18] sm:$0xf] }
  0xf9   :  { %v544_v6 = vsel %vm4944_vm10, %v394_v62, %v543_v56  ;;  %v228_v11 = vmax.f32 %v190_v0, 0.0  ;;  %v547_v12 = vsel %vm4948_vm11, %v395_v1, %v546_v63  ;;  %v378_v13 = vor.u32 %v376_v50, %v375_v2  ;;  %v1089_v17 = vld [vmem:[#allocation2 + $0x8] sm:$0xf]  ;;  %1107 = vst [vmem:[#allocation3 + $0x54] sm:$0xf] %v1091_v24 }
  0xfa   :  { %545 = vst [vmem:[#allocation2 + $0x38] sm:$0xf] %v544_v6  ;;  %v379_v14 = vrot.slane %v375_v2, 4  ;;  %v399_v15 = vrot.slane %v397_v3, 7  ;;  %v4415_v16 = vpop.f32.mrf.mxu0  ;;  %548 = vst [vmem:[#allocation2 + $0x3c] sm:$0x1] %v547_v12  ;;  %v4075_v22 = vpack.c.bf16 %v230_v10, %v230_v10  ;;  %v201_v23 = vadd.f32 %v4412_v60, %v4938_v39 }
  0xfb   :  { %v381_v20 = vshrl.u32 %v4070_v9, 16  ;;  %v384_v21 = vshll.u32 %v4070_v9, 16  ;;  %1105 = vst [vmem:[#allocation3 + $0xc] sm:$0xf] %v1089_v17  ;;  %v532_v25 = vsel %vm4944_vm10, %v378_v13, %v531_v7  ;;  %v4073_v29 = vpack.c.bf16 %v228_v11, %v228_v11  ;;  %v567_v57 = vld [vmem:[#allocation2 + $0x68] sm:$0xf] }
  0xfc   :  { %v535_v26 = vsel %vm4948_vm11, %v379_v14, %v534_v8  ;;  %v402_v27 = vor.u32 %v400_v4, %v399_v15  ;;  %v205_v30 = vpop.f32.mrf.mxu0  ;;  %533 = vst [vmem:[#allocation2 + $0x28] sm:$0xf] %v532_v25  ;;  %v403_v31 = vrot.slane %v399_v15, 4  ;;  %v193_v36 = vadd.f32 %v4938_v39, %v192_v5  ;;  %v555_v62 = vld [vmem:[#allocation2 + $0x58] sm:$0xf] }
  0xfd   :  { %536 = vst [vmem:[#allocation2 + $0x2c] sm:$0x1] %v535_v26  ;;  %v383_v32 = vrot.slane %v381_v20, 7  ;;  %v214_v37 = vadd.f32 %v4415_v16, %v4938_v39  ;;  %v206_v38 = vadd.f32 %v4938_v39, %v205_v30  ;;  %v421_v44 = vshrl.u32 %v4075_v22, 16  ;;  %v1092_v2 = vld [vmem:[#allocation2 + $0x20] sm:$0xf] }
  0xfe   :  { %v550_v33 = vsel %vm4944_vm10, %v402_v27, %v549_v19  ;;  %v4416_v40 = vpop.f32.mrf.mxu0  ;;  %v553_v41 = vsel %vm4948_vm11, %v403_v31, %v552_v28  ;;  %v1090_v45 = vld [vmem:[#allocation2 + $0x10] sm:$0xf]  ;;  %v424_v46 = vshll.u32 %v4075_v22, 16  ;;  %v405_v47 = vshrl.u32 %v4073_v29, 16  ;;  %v570_v4 = vld [vmem:[#allocation2 + $0x6c] sm:$0x1] }
  0xff   :  { %551 = vst [vmem:[#allocation2 + $0x40] sm:$0xf] %v550_v33  ;;  %v386_v42 = vor.u32 %v384_v21, %v383_v32  ;;  %v387_v43 = vrot.slane %v383_v32, 4  ;;  %554 = vst [vmem:[#allocation2 + $0x44] sm:$0x1] %v553_v41  ;;  %v408_v48 = vshll.u32 %v4073_v29, 16  ;;  %v217_v54 = vadd.f32 %v4416_v40, %v4938_v39 }
 0x100   :  { %v231_v49 = vmax.f32 %v201_v23, 0.0  ;;  %v208_v50 = vpop.f32.mrf.mxu0  ;;  %1106 = vst [vmem:[#allocation3 + $0x30] sm:$0xf] %v1090_v45  ;;  %v423_v56 = vrot.slane %v421_v44, 7  ;;  %v407_v59 = vrot.slane %v405_v47, 7  ;;  %v229_v60 = vmax.f32 %v193_v36, 0.0 }
 0x101   :  { %v538_v51 = vsel %vm4944_vm10, %v386_v42, %v537_v34  ;;  %v541_v52 = vsel %vm4948_vm11, %v387_v43, %v540_v35  ;;  %v209_v55 = vadd.f32 %v4938_v39, %v208_v50  ;;  %v234_v0 = vmax.f32 %v214_v37, 0.0  ;;  %v558_v6 = vld [vmem:[#allocation2 + $0x5c] sm:$0x1]  ;;  %1108 = vst [vmem:[#allocation3 + $0x78] sm:$0xf] %v1092_v2 }
 0x102   :  { %539 = vst [vmem:[#allocation2 + $0x30] sm:$0xf] %v538_v51  ;;  %542 = vst [vmem:[#allocation2 + $0x34] sm:$0x1] %v541_v52  ;;  %v4076_v63 = vpack.c.bf16 %v231_v49, %v231_v49  ;;  %v232_v1 = vmax.f32 %v206_v38, 0.0  ;;  %v426_v3 = vor.u32 %v424_v46, %v423_v56  ;;  %v410_v5 = vor.u32 %v408_v48, %v407_v59 }
 0x103   :  { %v4074_v7 = vpack.c.bf16 %v229_v60, %v229_v60  ;;  %v235_v8 = vmax.f32 %v217_v54, 0.0  ;;  %v427_v9 = vrot.slane %v423_v56, 4  ;;  %v411_v39 = vrot.slane %v407_v59, 4  ;;  %v604_v19 = vld [vmem:[#allocation2 + $0x8] sm:$0xf] }
 0x104   :  { %v4079_v10 = vpack.c.bf16 %v234_v0, %v234_v0  ;;  %v233_v11 = vmax.f32 %v209_v55, 0.0  ;;  %v568_v12 = vsel %vm4944_vm10, %v426_v3, %v567_v57  ;;  %v556_v13 = vsel %vm4944_vm10, %v410_v5, %v555_v62  ;;  %620 = vst [vmem:[#allocation3 + $0x24] sm:$0xf] %v604_v19  ;;  %v573_v24 = vld [vmem:[#allocation2 + $0x70] sm:$0xf] }
 0x105   :  { %v4077_v14 = vpack.c.bf16 %v232_v1, %v232_v1  ;;  %569 = vst [vmem:[#allocation2 + $0x68] sm:$0xf] %v568_v12  ;;  %v571_v15 = vsel %vm4948_vm11, %v427_v9, %v570_v4  ;;  %557 = vst [vmem:[#allocation2 + $0x58] sm:$0xf] %v556_v13  ;;  %v559_v16 = vsel %vm4948_vm11, %v411_v39, %v558_v6  ;;  %v429_v17 = vshrl.u32 %v4076_v63, 16 }
 0x106   :  { %572 = vst [vmem:[#allocation2 + $0x6c] sm:$0x1] %v571_v15  ;;  %560 = vst [vmem:[#allocation2 + $0x5c] sm:$0x1] %v559_v16  ;;  %v432_v20 = vshll.u32 %v4076_v63, 16  ;;  %v413_v21 = vshrl.u32 %v4074_v7, 16  ;;  %v4080_v29 = vpack.c.bf16 %v235_v8, %v235_v8  ;;  %v5004_v30 = vpack.c.bf16 %v233_v11, %v233_v11 }
 0x107   :  { %v416_v22 = vshll.u32 %v4074_v7, 16  ;;  %v453_v23 = vshrl.u32 %v4079_v10, 16  ;;  %v576_v25 = vld [vmem:[#allocation2 + $0x74] sm:$0x1]  ;;  %v561_v26 = vld [vmem:[#allocation2 + $0x60] sm:$0xf] }
 0x108   :  { %v564_v27 = vld [vmem:[#allocation2 + $0x64] sm:$0x1]  ;;  %v456_v28 = vshll.u32 %v4079_v10, 16  ;;  %v431_v31 = vrot.slane %v429_v17, 7  ;;  %v415_v32 = vrot.slane %v413_v21, 7  ;;  %v437_v34 = vshrl.u32 %v4077_v14, 16 }
 0x109   :  { %v455_v33 = vrot.slane %v453_v23, 7  ;;  %v605_v35 = vld [vmem:[#allocation2 + $0x10] sm:$0xf]  ;;  %v440_v36 = vshll.u32 %v4077_v14, 16  ;;  %v461_v37 = vshrl.u32 %v4080_v29, 16  ;;  %v464_v38 = vshll.u32 %v4080_v29, 16 }
 0x10a   :  { %v445_v40 = vshrl.u32 %v5004_v30, 16  ;;  %v606_v41 = vld [vmem:[#allocation2 + $0x18] sm:$0xf]  ;;  %621 = vst [vmem:[#allocation3 + $0x48] sm:$0xf] %v605_v35  ;;  %v434_v42 = vor.u32 %v432_v20, %v431_v31  ;;  %v435_v43 = vrot.slane %v431_v31, 4  ;;  %v418_v44 = vor.u32 %v416_v22, %v415_v32 }
 0x10b   :  { %v419_v45 = vrot.slane %v415_v32, 4  ;;  %v591_v46 = vld [vmem:[#allocation2 + $0x88] sm:$0xf]  ;;  %v594_v47 = vld [vmem:[#allocation2 + $0x8c] sm:$0x1]  ;;  %v458_v50 = vor.u32 %v456_v28, %v455_v33  ;;  %v459_v51 = vrot.slane %v455_v33, 4 }
 0x10c   :  { %v579_v48 = vld [vmem:[#allocation2 + $0x78] sm:$0xf]  ;;  %v582_v49 = vld [vmem:[#allocation2 + $0x7c] sm:$0x1]  ;;  %622 = vst [vmem:[#allocation3 + $0x6c] sm:$0xf] %v606_v41  ;;  %v574_v56 = vsel %vm4944_vm10, %v434_v42, %v573_v24  ;;  %v577_v57 = vsel %vm4948_vm11, %v435_v43, %v576_v25  ;;  %v562_v59 = vsel %vm4944_vm10, %v418_v44, %v561_v26 }
 0x10d   :  { %v439_v52 = vrot.slane %v437_v34, 7  ;;  %v463_v54 = vrot.slane %v461_v37, 7  ;;  %v597_v55 = vld [vmem:[#allocation2 + $0x90] sm:$0xf]  ;;  %v565_v60 = vsel %vm4948_vm11, %v419_v45, %v564_v27  ;;  %v600_v62 = vld [vmem:[#allocation2 + $0x94] sm:$0x1]  ;;  %v592_v1 = vsel %vm4944_vm10, %v458_v50, %v591_v46 }
 0x10e   :  { %v928_v63 = vld [vmem:[#allocation2 + $0x8] sm:$0xe]  ;;  %v929_v0 = vld [vmem:[#allocation2 + $0xc] sm:$0x1]  ;;  %575 = vst [vmem:[#allocation2 + $0x70] sm:$0xf] %v574_v56  ;;  %v595_v2 = vsel %vm4948_vm11, %v459_v51, %v594_v47 }
 0x10f   :  { %578 = vst [vmem:[#allocation2 + $0x74] sm:$0x1] %v577_v57  ;;  %563 = vst [vmem:[#allocation2 + $0x60] sm:$0xf] %v562_v59  ;;  %v442_v3 = vor.u32 %v440_v36, %v439_v52  ;;  %v443_v4 = vrot.slane %v439_v52, 4  ;;  %v466_v9 = vor.u32 %v464_v38, %v463_v54  ;;  %v467_v39 = vrot.slane %v463_v54, 4 }
 0x110   :  { %566 = vst [vmem:[#allocation2 + $0x64] sm:$0x1] %v565_v60  ;;  %v585_v5 = vld [vmem:[#allocation2 + $0x80] sm:$0xf]  ;;  %v588_v6 = vld [vmem:[#allocation2 + $0x84] sm:$0x1] }
 0x111   :  { %v930_v7 = vld [vmem:[#allocation2 + $0x10] sm:$0xe]  ;;  %v932_v8 = vld [vmem:[#allocation2 + $0x18] sm:$0xe]  ;;  %593 = vst [vmem:[#allocation2 + $0x88] sm:$0xf] %v592_v1  ;;  %v580_v13 = vsel %vm4944_vm10, %v442_v3, %v579_v48  ;;  %v583_v14 = vsel %vm4948_vm11, %v443_v4, %v582_v49  ;;  %v598_v20 = vsel %vm4944_vm10, %v466_v9, %v597_v55  ;;  %v601_v21 = vsel %vm4948_vm11, %v467_v39, %v600_v62 }
 0x112   :  { %596 = vst [vmem:[#allocation2 + $0x8c] sm:$0x1] %v595_v2  ;;  %v447_v10 = vrot.slane %v445_v40, 7  ;;  %v448_v11 = vshll.u32 %v5004_v30, 16  ;;  %v931_v12 = vld [vmem:[#allocation2 + $0x14] sm:$0x1] }
 0x113   :  { %v3864_v15 = vrot.slane %v928_v63, 9  ;;  %v999_v16 = vrot.slane %v929_v0, 5  ;;  %v933_v17 = vld [vmem:[#allocation2 + $0x1c] sm:$0x1]  ;;  %v637_v19 = vld [vmem:[#allocation2 + $0x8] sm:$0xf] }
 0x114   :  { %581 = vst [vmem:[#allocation2 + $0x78] sm:$0xf] %v580_v13  ;;  %584 = vst [vmem:[#allocation2 + $0x7c] sm:$0x1] %v583_v14  ;;  %v450_v22 = vor.u32 %v448_v11, %v447_v10  ;;  %v451_v23 = vrot.slane %v447_v10, 4  ;;  %v3865_v27 = vrot.slane %v930_v7, 9 }
 0x115   :  { %v1093_v24 = vld [vmem:[#allocation2 + $0x28] sm:$0xf]  ;;  %v1094_v25 = vld [vmem:[#allocation2 + $0x30] sm:$0xf]  ;;  %599 = vst [vmem:[#allocation2 + $0x90] sm:$0xf] %v598_v20  ;;  %v1000_v26 = vsel %vm4871_vm2, %v3864_v15, %v999_v16 }
 0x116   :  { %602 = vst [vmem:[#allocation2 + $0x94] sm:$0x1] %v601_v21  ;;  %v1003_v28 = vrot.slane %v931_v12, 5  ;;  %v3866_v29 = vrot.slane %v932_v8, 9  ;;  %1109 = vst [vmem:[#allocation3 + $0x9c] sm:$0xf] %v1093_v24  ;;  %v586_v31 = vsel %vm4944_vm10, %v450_v22, %v585_v5  ;;  %v589_v32 = vsel %vm4948_vm11, %v451_v23, %v588_v6 }
 0x117   :  { %1110 = vst [vmem:[#allocation3 + $0xc0] sm:$0xf] %v1094_v25  ;;  %v607_v30 = vld [vmem:[#allocation2 + $0x20] sm:$0xf]  ;;  %1074 = vst [vmem:[#allocation3 + $0x2c] sm:$0xf] %v1000_v26 }
 0x118   :  { %v1007_v33 = vrot.slane %v933_v17, 5  ;;  %v608_v34 = vld [vmem:[#allocation2 + $0x28] sm:$0xf]  ;;  %623 = vst [vmem:[#allocation3 + $0x90] sm:$0xf] %v607_v30  ;;  %v1004_v35 = vsel %vm4871_vm2, %v3865_v27, %v1003_v28  ;;  %v685_v61 = vshrl.u32 %v637_v19, 16 }
 0x119   :  { %587 = vst [vmem:[#allocation2 + $0x80] sm:$0xf] %v586_v31  ;;  %590 = vst [vmem:[#allocation2 + $0x84] sm:$0x1] %v589_v32  ;;  %v638_v36 = vld [vmem:[#allocation2 + $0xc] sm:$0x1] }
 0x11a   :  { %624 = vst [vmem:[#allocation3 + $0xb4] sm:$0xf] %v608_v34  ;;  %v5036_v37 = vld [vmem:[#allocation2 + $0x20] sm:$0xe]  ;;  %v639_v38 = vld [vmem:[#allocation2 + $0x10] sm:$0xf]  ;;  %v1008_v58 = vsel %vm4871_vm2, %v3866_v29, %v1007_v33 }
 0x11b   :  { %1075 = vst [vmem:[#allocation3 + $0x50] sm:$0xf] %v1004_v35  ;;  %v688_v40 = vshll.u32 %v637_v19, 16  ;;  %1076 = vst [vmem:[#allocation3 + $0x74] sm:$0xf] %v1008_v58  ;;  %v694_v42 = vshll.u32 %v638_v36, 16 }
 0x11c   :  { %v5040_v41 = vld [vmem:[#allocation2 + $0x24] sm:$0x1]  ;;  %v641_v43 = vld [vmem:[#allocation2 + $0x18] sm:$0xf]  ;;  %v3897_v44 = vrot.slane %v5036_v37, 9  ;;  %v699_v46 = vshrl.u32 %v639_v38, 16 }
 0x11d   :  { %v5043_v45 = vld [vmem:[#allocation2 + $0x28] sm:$0xe]  ;;  %v4577_v47 = vld [vmem:[%s5699_s3 + $0x1b8] sm:$0xff]   ;;  %v687_v48 = vrot.slane %v685_v61, 4  ;;  %v690_v49 = vrot.slane %v688_v40, 5  ;;  %v4579_v52 = vld [vmem:[%s5699_s3 + $0x1f0] sm:$0xff]  }
 0x11e   :  { %v640_v50 = vld [vmem:[#allocation2 + $0x14] sm:$0x1]  ;;  %v642_v51 = vld [vmem:[#allocation2 + $0x1c] sm:$0x1]  ;;  %v1964_v54 = vrot.slane %v5040_v41, 5  ;;  %v3898_v59 = vrot.slane %v5043_v45, 9 }
 0x11f   :  { %v4539_v55 = vld [vmem:[#allocation3 + $0x8] ss:$36 sps:$4 sm:$0xff]   ;;  %v934_v57 = vld [vmem:[#allocation2 + $0x20] sm:$0xe]  ;;  %v691_v60 = vor.u32 %v690_v49, %v687_v48  ;;  %v696_v62 = vrot.slane %v694_v42, 5  ;;  %v701_v4 = vrot.slane %v699_v46, 4 }
 0x120   :  { %v4541_v56 = vld [vmem:[#allocation3 + $0xc] ss:$36 sps:$4 sm:$0xff]   ;;  %v935_v63 = vld [vmem:[#allocation2 + $0x24] sm:$0x1]  ;;  %v936_v0 = vld [vmem:[#allocation2 + $0x28] sm:$0xe] }
 0x121   :  { %v937_v1 = vld [vmem:[#allocation2 + $0x2c] sm:$0x1]  ;;  %v643_v2 = vld [vmem:[#allocation2 + $0x20] sm:$0xf]  ;;  %3210 = vmatprep.mubr.bf16.mxu0 %v4541_v56  ;;  %v702_v5 = vshll.u32 %v639_v38, 16  ;;  %v708_v6 = vshll.u32 %v640_v50, 16 }
 0x122   :  { %v5053_v3 = vld [vmem:[#allocation3 + $0x50] sm:$0xff]  ;;  %v713_v7 = vshrl.u32 %v641_v43, 16  ;;  %v5055_v8 = vld [vmem:[#allocation2 + $0x28] sm:$0xf]  ;;  %3211 = vmatmul.mubr.bf16.vlgmr.msra.gmra.mxu0 %v4539_v55  ;;  %v692_v10 = vrot.slane %v691_v60, 4  ;;  %v716_v11 = vshll.u32 %v641_v43, 16 }
 0x123   :  { %v5057_v9 = vld [vmem:[#allocation3 + $0x74] sm:$0xff]  ;;  %v722_v12 = vshll.u32 %v642_v51, 16  ;;  %v704_v13 = vrot.slane %v702_v5, 5  ;;  %v710_v14 = vrot.slane %v708_v6, 5  ;;  %v644_v17 = vld [vmem:[#allocation2 + $0x24] sm:$0x1]  ;;  %4290 = vmatpush3.bf16.msra.mxu0 %v4577_v47 }
 0x124   :  { %v4544_v39 = vld [vmem:[#allocation3 + $0x54] ss:$36 sps:$4 sm:$0xff]   ;;  %v715_v15 = vrot.slane %v713_v7, 4  ;;  %v3923_v16 = vcombine.low %v5053_v3, %v5057_v9  ;;  %v697_v20 = vsel %vm4919_vm5, %v692_v10, %v696_v62  ;;  %v718_v21 = vrot.slane %v716_v11, 5  ;;  %v646_v24 = vld [vmem:[#allocation2 + $0x2c] sm:$0x1]  ;;  %4291 = vmatprep.subr.bf16.mxu0 %v4579_v52 }
 0x125   :  { %v4582_v19 = vld [vmem:[%s5699_s3 + $0x1b0] sm:$0xff]   ;;  %3218 = vmatprep.mubr.bf16.mxu0 %v4544_v39  ;;  %v724_v22 = vrot.slane %v722_v12, 5  ;;  %v3867_v23 = vrot.slane %v934_v57, 9  ;;  %v4585_v25 = vld [vmem:[%s5699_s3 + $0x1e8] sm:$0xff]   ;;  %911 = vst [vmem:[#allocation3 + $0x28] sm:$0xf] %v697_v20  ;;  %v705_v26 = vor.u32 %v704_v13, %v701_v4 }
 0x126   :  { %v1011_v27 = vrot.slane %v935_v63, 5  ;;  %v3868_v28 = vrot.slane %v936_v0, 9  ;;  %v1015_v29 = vrot.slane %v937_v1, 5  ;;  %v938_v30 = vld [vmem:[#allocation2 + $0x30] sm:$0xe]  ;;  %v4588_v32 = vld [vmem:[%s5699_s3 + $0x1a8] sm:$0xff]   ;;  %v719_v33 = vor.u32 %v718_v21, %v715_v15 }
 0x127   :  { %v939_v31 = vld [vmem:[#allocation2 + $0x34] sm:$0x1]  ;;  %v727_v34 = vshrl.u32 %v643_v2, 16  ;;  %v730_v35 = vshll.u32 %v643_v2, 16  ;;  %v736_v36 = vshll.u32 %v644_v17, 16  ;;  %v4590_v61 = vld [vmem:[%s5699_s3 + $0x1e0] sm:$0xff]   ;;  %4292 = vmatpush3.bf16.msra.mxu0 %v4582_v19 }
 0x128   :  { %v940_v38 = vld [vmem:[#allocation2 + $0x38] sm:$0xe]  ;;  %v941_v58 = vld [vmem:[#allocation2 + $0x3c] sm:$0x1]  ;;  %v706_v40 = vrot.slane %v705_v26, 4  ;;  %v1012_v42 = vsel %vm4871_vm2, %v3867_v23, %v1011_v27  ;;  %v1016_v43 = vsel %vm4871_vm2, %v3868_v28, %v1015_v29  ;;  %v741_v46 = vshrl.u32 %v5055_v8, 16  ;;  %4293 = vmatprep.subr.bf16.mxu0 %v4585_v25 }
 0x129   :  { %v1095_v47 = vld [vmem:[#allocation2 + $0x38] sm:$0xf]  ;;  %v1096_v48 = vld [vmem:[#allocation2 + $0x40] sm:$0xf]  ;;  %v720_v49 = vrot.slane %v719_v33, 4  ;;  %v729_v50 = vrot.slane %v727_v34, 4 }
 0x12a   :  { %1077 = vst [vmem:[#allocation3 + $0x98] sm:$0xf] %v1012_v42  ;;  %1078 = vst [vmem:[#allocation3 + $0xbc] sm:$0xf] %v1016_v43  ;;  %v732_v51 = vrot.slane %v730_v35, 5  ;;  %v738_v52 = vrot.slane %v736_v36, 5  ;;  %v711_v56 = vsel %vm4919_vm5, %v706_v40, %v710_v14  ;;  %3219 = vmatmul.mubr.bf16.gmra.mxu0 %v3923_v16 }
 0x12b   :  { %1111 = vst [vmem:[#allocation3 + $0xe4] sm:$0xf] %v1095_v47  ;;  %1112 = vst [vmem:[#allocation3 + $0x108] sm:$0xf] %v1096_v48  ;;  %v609_v55 = vld [vmem:[#allocation2 + $0x30] sm:$0xf]  ;;  %v725_v4 = vsel %vm4919_vm5, %v720_v49, %v724_v22  ;;  %4294 = vmatpush3.bf16.msra.mxu0 %v4588_v32 }
 0x12c   :  { %v743_v57 = vrot.slane %v741_v46, 4  ;;  %v744_v60 = vshll.u32 %v5055_v8, 16  ;;  %v750_v62 = vshll.u32 %v646_v24, 16  ;;  %v610_v63 = vld [vmem:[#allocation2 + $0x38] sm:$0xf]  ;;  %v4593_v0 = vld [vmem:[%s5699_s3 + $0x1a0] sm:$0xff]   ;;  %v733_v5 = vor.u32 %v732_v51, %v729_v50  ;;  %4295 = vmatprep.subr.bf16.mxu0 %v4590_v61 }
 0x12d   :  { %625 = vst [vmem:[#allocation3 + $0xd8] sm:$0xf] %v609_v55  ;;  %v5086_v1 = vld [vmem:[#allocation2 + $0x38] sm:$0xf]  ;;  %v647_v2 = vld [vmem:[#allocation2 + $0x30] sm:$0xf] }
 0x12e   :  { %v4550_v3 = vld [vmem:[%s5699_s3 + $0x138] sm:$0xff]   ;;  %912 = vst [vmem:[#allocation3 + $0x4c] sm:$0xf] %v711_v56  ;;  %v3869_v6 = vrot.slane %v938_v30, 9  ;;  %v1019_v7 = vrot.slane %v939_v31, 5  ;;  %v4555_v9 = vld [vmem:[%s5699_s3 + $0x170] sm:$0xff]  }
 0x12f   :  { %626 = vst [vmem:[#allocation3 + $0xfc] sm:$0xf] %v610_v63  ;;  %v4596_v8 = vld [vmem:[%s5699_s3 + $0x1d8] sm:$0xff]   ;;  %913 = vst [vmem:[#allocation3 + $0x70] sm:$0xf] %v725_v4  ;;  %v746_v39 = vrot.slane %v744_v60, 5  ;;  %4296 = vmatpush3.bf16.msra.mxu0 %v4593_v0 }
 0x130   :  { %v752_v10 = vrot.slane %v750_v62, 5  ;;  %v3870_v11 = vrot.slane %v940_v38, 9  ;;  %v1023_v12 = vrot.slane %v941_v58, 5  ;;  %v648_v13 = vld [vmem:[#allocation2 + $0x34] sm:$0x1]  ;;  %v734_v16 = vrot.slane %v733_v5, 4  ;;  %4297 = vmatprep.subr.bf16.mxu0 %v4596_v8 }
 0x131   :  { %v4546_v14 = vld [vmem:[#allocation3] ss:$36 sps:$4 sm:$0xff]   ;;  %v1020_v17 = vsel %vm4871_vm2, %v3869_v6, %v1019_v7  ;;  %v650_v19 = vld [vmem:[#allocation2 + $0x3c] sm:$0x1]  ;;  %v5101_v20 = vld [vmem:[#allocation2 + $0x58] sm:$0xe]  ;;  %v747_v22 = vor.u32 %v746_v39, %v743_v57 }
 0x132   :  { %v4548_v15 = vld [vmem:[#allocation3 + $0x4] ss:$36 sps:$4 sm:$0xff]   ;;  %v5103_v21 = vld [vmem:[#allocation2 + $0x2c] sm:$0x1]  ;;  %v1024_v23 = vsel %vm4871_vm2, %v3870_v11, %v1023_v12  ;;  %1079 = vst [vmem:[#allocation3 + $0xe0] sm:$0xf] %v1020_v17  ;;  %v739_v29 = vsel %vm4919_vm5, %v734_v16, %v738_v52 }
 0x133   :  { %v755_v24 = vshrl.u32 %v647_v2, 16  ;;  %v758_v25 = vshll.u32 %v647_v2, 16  ;;  %v945_v26 = vld [vmem:[#allocation2 + $0x5c] sm:$0x1]  ;;  %v1097_v27 = vld [vmem:[#allocation2 + $0x58] sm:$0xf]  ;;  %3113 = vmatprep.mubr.bf16.mxu1 %v4548_v15 }
 0x134   :  { %v4557_v28 = vld [vmem:[%s5699_s3 + $0x130] sm:$0xff]   ;;  %1080 = vst [vmem:[#allocation3 + $0x104] sm:$0xf] %v1024_v23  ;;  %v764_v30 = vshll.u32 %v648_v13, 16  ;;  %v769_v31 = vshrl.u32 %v5086_v1, 16  ;;  %v772_v32 = vshll.u32 %v5086_v1, 16  ;;  %3114 = vmatmul.mubr.bf16.vlgmr.msra.gmra.mxu1 %v4546_v14 }
 0x135   :  { %v1098_v33 = vld [vmem:[#allocation2 + $0x60] sm:$0xf]  ;;  %1113 = vst [vmem:[#allocation3 + $0x12c] sm:$0xf] %v1097_v27  ;;  %v4599_v34 = vld [vmem:[%s5699_s3 + $0x198] sm:$0xff]   ;;  %v748_v58 = vrot.slane %v747_v22, 4  ;;  %4226 = vmatpush3.bf16.msra.mxu1 %v4550_v3  ;;  %v1965_v22 = vsel %vm4871_vm2, %v3897_v44, %v1964_v54 }
 0x136   :  { %v2071_v35 = vld [vmem:[#allocation3 + $0x98] sm:$0xff]  ;;  %914 = vst [vmem:[#allocation3 + $0x94] sm:$0xf] %v739_v29  ;;  %v4562_v61 = vld [vmem:[%s5699_s3 + $0x168] sm:$0xff]   ;;  %v757_v40 = vrot.slane %v755_v24, 4  ;;  %v4601_v42 = vld [vmem:[%s5699_s3 + $0x1d0] sm:$0xff]   ;;  %4227 = vmatprep.subr.bf16.mxu1 %v4555_v9  ;;  %4298 = vmatpush3.bf16.msra.mxu0 %v4599_v34 }
 0x137   :  { %v2076_v36 = vld [vmem:[#allocation3 + $0xbc] sm:$0xff]  ;;  %1114 = vst [vmem:[#allocation3 + $0x150] sm:$0xf] %v1098_v33  ;;  %v653_v43 = vld [vmem:[#allocation2 + $0x58] sm:$0xf]  ;;  %v760_v47 = vrot.slane %v758_v25, 5  ;;  %v753_v50 = vsel %vm4919_vm5, %v748_v58, %v752_v10  ;;  %4299 = vmatprep.subr.bf16.mxu0 %v4601_v42 }
 0x138   :  { %v4553_v38 = vld [vmem:[#allocation3 + $0x9c] ss:$36 sps:$4 sm:$0xff]   ;;  %v3932_v46 = vcombine.low %v2071_v35, %v2076_v36  ;;  %v771_v48 = vrot.slane %v769_v31, 4  ;;  %v612_v49 = vld [vmem:[#allocation2 + $0x58] sm:$0xf]  ;;  %v774_v51 = vrot.slane %v772_v32, 5 }
 0x139   :  { %3226 = vmatprep.mubr.bf16.mxu0 %v4553_v38  ;;  %v778_v52 = vshll.u32 %v650_v19, 16  ;;  %v3872_v55 = vrot.slane %v5101_v20, 9  ;;  %628 = vst [vmem:[#allocation3 + $0x144] sm:$0xf] %v612_v49  ;;  %v654_v56 = vld [vmem:[#allocation2 + $0x5c] sm:$0x1]  ;;  %v761_v63 = vor.u32 %v760_v47, %v757_v40  ;;  %4228 = vmatpush3.bf16.msra.mxu1 %v4557_v28 }
 0x13a   :  { %v1968_v57 = vrot.slane %v5103_v21, 5  ;;  %v4551_v60 = vld [vmem:[#allocation3 + $0x4c] ss:$36 sps:$4 sm:$0xff]   ;;  %915 = vst [vmem:[#allocation3 + $0xb8] sm:$0xf] %v753_v50  ;;  %3227 = vmatmul.mubr.bf16.gmra.mxu0 %v3932_v46  ;;  %v766_v0 = vrot.slane %v764_v30, 5  ;;  %v775_v4 = vor.u32 %v774_v51, %v771_v48  ;;  %4229 = vmatprep.subr.bf16.mxu1 %v4562_v61 }
 0x13b   :  { %v4564_v62 = vld [vmem:[%s5699_s3 + $0x128] sm:$0xff]   ;;  %v1031_v1 = vrot.slane %v945_v26, 5  ;;  %v4604_v2 = vld [vmem:[%s5699_s3 + $0x190] sm:$0xff]   ;;  %v5133_v3 = vld [vmem:[#allocation2 + $0x60] sm:$0xf]  ;;  %v780_v5 = vrot.slane %v778_v52, 5  ;;  %3121 = vmatprep.mubr.bf16.mxu1 %v4551_v60 }
 0x13c   :  { %v4569_v6 = vld [vmem:[%s5699_s3 + $0x160] sm:$0xff]   ;;  %v797_v7 = vshrl.u32 %v653_v43, 16  ;;  %v800_v8 = vshll.u32 %v653_v43, 16  ;;  %v4607_v39 = vld [vmem:[%s5699_s3 + $0x1c8] sm:$0xff]   ;;  %v762_v11 = vrot.slane %v761_v63, 4  ;;  %v806_v13 = vshll.u32 %v654_v56, 16  ;;  %4300 = vmatpush3.bf16.msra.mxu0 %v4604_v2 }
 0x13d   :  { %v946_v9 = vld [vmem:[#allocation2 + $0x60] sm:$0xe]  ;;  %v4556_v10 = vld [vmem:[#allocation3 + $0x48] ss:$36 sps:$4 sm:$0xff]   ;;  %v1032_v12 = vsel %vm4871_vm2, %v3872_v55, %v1031_v1  ;;  %v947_v14 = vld [vmem:[#allocation2 + $0x64] sm:$0x1]  ;;  %4230 = vmatpush3.bf16.msra.mxu1 %v4564_v62  ;;  %4301 = vmatprep.subr.bf16.mxu0 %v4607_v39  ;;  %v1969_v46 = vsel %vm4871_vm2, %v3898_v59, %v1968_v57 }
 0x13e   :  { %v2081_v15 = vld [vmem:[#allocation3 + $0xe0] sm:$0xff]  ;;  %v776_v17 = vrot.slane %v775_v4, 4  ;;  %1082 = vst [vmem:[#allocation3 + $0x14c] sm:$0xf] %v1032_v12  ;;  %v799_v19 = vrot.slane %v797_v7, 4  ;;  %v3873_v20 = vrot.slane %v946_v9, 9  ;;  %v767_v25 = vsel %vm4919_vm5, %v762_v11, %v766_v0  ;;  %3122 = vmatmul.mubr.bf16.gmra.mxu1 %v4556_v10  ;;  %4231 = vmatprep.subr.bf16.mxu1 %v4569_v6 }
 0x13f   :  { %v4560_v16 = vld [vmem:[#allocation3 + $0xe4] ss:$36 sps:$4 sm:$0xff]   ;;  %v802_v27 = vrot.slane %v800_v8, 5  ;;  %v808_v28 = vrot.slane %v806_v13, 5  ;;  %2036 = vst [vmem:[#allocation3 + $0x68] sm:$0xf] %v1965_v22 }
 0x140   :  { %v5149_v23 = vld [vmem:[#allocation2 + $0x68] sm:$0xf]  ;;  %v4571_v26 = vld [vmem:[%s5699_s3 + $0x120] sm:$0xff]   ;;  %3234 = vmatprep.mubr.bf16.mxu0 %v4560_v16  ;;  %v781_v41 = vsel %vm4919_vm5, %v776_v17, %v780_v5  ;;  %916 = vst [vmem:[#allocation3 + $0xdc] sm:$0xf] %v767_v25  ;;  %v1035_v54 = vrot.slane %v947_v14, 5 }
 0x141   :  { %v2086_v24 = vld [vmem:[#allocation3 + $0x104] sm:$0xff]  ;;  %v949_v44 = vld [vmem:[#allocation2 + $0x6c] sm:$0x1]  ;;  %v4578_v32 = vld [vmem:[%s5699_s3 + $0x158] sm:$0xff]   ;;  %917 = vst [vmem:[#allocation3 + $0x100] sm:$0xf] %v781_v41  ;;  %v803_v34 = vor.u32 %v802_v27, %v799_v19  ;;  %4232 = vmatpush3.bf16.msra.mxu1 %v4571_v26 }
 0x142   :  { %v948_v29 = vld [vmem:[#allocation2 + $0x68] sm:$0xe]  ;;  %v3941_v33 = vcombine.low %v2081_v15, %v2086_v24  ;;  %v1039_v35 = vrot.slane %v949_v44, 5  ;;  %v1100_v36 = vld [vmem:[#allocation2 + $0x70] sm:$0xf]  ;;  %v811_v58 = vshrl.u32 %v5133_v3, 16  ;;  %v1036_v40 = vsel %vm4871_vm2, %v3873_v20, %v1035_v54  ;;  %4233 = vmatprep.subr.bf16.mxu1 %v4578_v32 }
 0x143   :  { %v4608_v37 = vld [vmem:[%s5699_s3 + $0x188] sm:$0xff]   ;;  %v3874_v30 = vrot.slane %v948_v29, 9  ;;  %v613_v38 = vld [vmem:[#allocation2 + $0x60] sm:$0xf]  ;;  %v4558_v61 = vld [vmem:[#allocation3 + $0x94] ss:$36 sps:$4 sm:$0xff]  }
 0x144   :  { %v1099_v31 = vld [vmem:[#allocation2 + $0x68] sm:$0xf]  ;;  %1116 = vst [vmem:[#allocation3 + $0x198] sm:$0xf] %v1100_v36  ;;  %629 = vst [vmem:[#allocation3 + $0x168] sm:$0xf] %v613_v38  ;;  %3235 = vmatmul.mubr.bf16.gmra.mxu0 %v3941_v33  ;;  %3129 = vmatprep.mubr.bf16.mxu1 %v4558_v61 }
 0x145   :  { %1115 = vst [vmem:[#allocation3 + $0x174] sm:$0xf] %v1099_v31  ;;  %v814_v42 = vshll.u32 %v5133_v3, 16  ;;  %v4613_v43 = vld [vmem:[%s5699_s3 + $0x1c0] sm:$0xff]   ;;  %v5177_v47 = vld [vmem:[#allocation3 + $0x128] sm:$0xff]  ;;  %v804_v48 = vrot.slane %v803_v34, 4  ;;  %v1040_v49 = vsel %vm4871_vm2, %v3874_v30, %v1039_v35  ;;  %4302 = vmatpush3.bf16.msra.mxu0 %v4608_v37 }
 0x146   :  { %1083 = vst [vmem:[#allocation3 + $0x170] sm:$0xf] %v1036_v40  ;;  %v4581_v50 = vld [vmem:[%s5699_s3 + $0x118] sm:$0xff]   ;;  %v614_v51 = vld [vmem:[#allocation2 + $0x68] sm:$0xf]  ;;  %v813_v21 = vrot.slane %v811_v58, 4  ;;  %4303 = vmatprep.subr.bf16.mxu0 %v4613_v43 }
 0x147   :  { %v656_v52 = vld [vmem:[#allocation2 + $0x64] sm:$0x1]  ;;  %2037 = vst [vmem:[#allocation3 + $0x8c] sm:$0xf] %v1969_v46  ;;  %v4563_v59 = vld [vmem:[#allocation3 + $0x90] ss:$36 sps:$4 sm:$0xff]   ;;  %v809_v3 = vsel %vm4919_vm5, %v804_v48, %v808_v28  ;;  %4234 = vmatpush3.bf16.msra.mxu1 %v4581_v50 }
 0x148   :  { %v4616_v45 = vld [vmem:[%s5699_s3 + $0x180] sm:$0xff]   ;;  %1084 = vst [vmem:[#allocation3 + $0x194] sm:$0xf] %v1040_v49  ;;  %630 = vst [vmem:[#allocation3 + $0x18c] sm:$0xf] %v614_v51  ;;  %v816_v56 = vrot.slane %v814_v42, 5  ;;  %3130 = vmatmul.mubr.bf16.gmra.mxu1 %v4563_v59 }
 0x149   :  { %v658_v55 = vld [vmem:[#allocation2 + $0x6c] sm:$0x1]  ;;  %v820_v57 = vshll.u32 %v656_v52, 16  ;;  %v825_v60 = vshrl.u32 %v5149_v23, 16  ;;  %v828_v62 = vshll.u32 %v5149_v23, 16  ;;  %v4589_v63 = vld [vmem:[%s5699_s3 + $0x150] sm:$0xff]   ;;  %4304 = vmatpush3.bf16.msra.mxu0 %v4616_v45 }
 0x14a   :  { %v5192_v0 = vld [vmem:[#allocation2 + $0x70] sm:$0xf]  ;;  %v834_v4 = vshll.u32 %v658_v55, 16  ;;  %919 = vst [vmem:[#allocation3 + $0x148] sm:$0xf] %v809_v3  ;;  %v817_v6 = vor.u32 %v816_v56, %v813_v21  ;;  %v4600_v26 = vld [vmem:[%s5699_s3 + $0x148] sm:$0xff]   ;;  %4235 = vmatprep.subr.bf16.mxu1 %v4589_v63 }
 0x14b   :  { %v2096_v1 = vld [vmem:[#allocation3 + $0x14c] sm:$0xff]  ;;  %v822_v7 = vrot.slane %v820_v57, 5  ;;  %v827_v8 = vrot.slane %v825_v60, 4  ;;  %v951_v9 = vld [vmem:[#allocation2 + $0x74] sm:$0x1]  ;;  %v830_v10 = vrot.slane %v828_v62, 5 }
 0x14c   :  { %v4567_v2 = vld [vmem:[#allocation3 + $0x12c] ss:$36 sps:$4 sm:$0xff]   ;;  %v952_v39 = vld [vmem:[#allocation2 + $0x78] sm:$0xe]  ;;  %v953_v11 = vld [vmem:[#allocation2 + $0x7c] sm:$0x1]  ;;  %v3950_v14 = vcombine.low %v5177_v47, %v2096_v1 }
 0x14d   :  { %v950_v5 = vld [vmem:[#allocation2 + $0x70] sm:$0xe]  ;;  %3242 = vmatprep.mubr.bf16.mxu0 %v4567_v2  ;;  %v4565_v13 = vld [vmem:[#allocation3 + $0xdc] ss:$36 sps:$4 sm:$0xff]   ;;  %v818_v15 = vrot.slane %v817_v6, 4  ;;  %v836_v16 = vrot.slane %v834_v4, 5  ;;  %v831_v20 = vor.u32 %v830_v10, %v827_v8 }
 0x14e   :  { %v3875_v12 = vrot.slane %v950_v5, 9  ;;  %v4592_v17 = vld [vmem:[%s5699_s3 + $0x110] sm:$0xff]   ;;  %v661_v19 = vld [vmem:[#allocation2 + $0x78] sm:$0xf]  ;;  %v1043_v22 = vrot.slane %v951_v9, 5  ;;  %v3876_v23 = vrot.slane %v952_v39, 9  ;;  %3137 = vmatprep.mubr.bf16.mxu1 %v4565_v13  ;;  %3243 = vmatmul.mubr.bf16.gmra.mxu0 %v3950_v14 }
 0x14f   :  { %v1047_v24 = vrot.slane %v953_v11, 5  ;;  %v1101_v25 = vld [vmem:[#allocation2 + $0x78] sm:$0xf]  ;;  %v5203_v27 = vld [vmem:[#allocation3 + $0x170] sm:$0xff]  ;;  %v823_v28 = vsel %vm4919_vm5, %v818_v15, %v822_v7  ;;  %v1102_v29 = vld [vmem:[#allocation2 + $0x80] sm:$0xf]  ;;  %4236 = vmatpush3.bf16.msra.mxu1 %v4592_v17 }
 0x150   :  { %1117 = vst [vmem:[#allocation3 + $0x1bc] sm:$0xf] %v1101_v25  ;;  %v615_v37 = vld [vmem:[#allocation2 + $0x70] sm:$0xf]  ;;  %v839_v41 = vshrl.u32 %v5192_v0, 16  ;;  %v2106_v44 = vld [vmem:[#allocation3 + $0x194] sm:$0xff]  ;;  %v1044_v31 = vsel %vm4871_vm2, %v3875_v12, %v1043_v22  ;;  %4237 = vmatprep.subr.bf16.mxu1 %v4600_v26 }
 0x151   :  { %v4575_v54 = vld [vmem:[#allocation3 + $0x174] ss:$36 sps:$4 sm:$0xff]   ;;  %v832_v30 = vrot.slane %v831_v20, 4  ;;  %920 = vst [vmem:[#allocation3 + $0x16c] sm:$0xf] %v823_v28  ;;  %v1048_v32 = vsel %vm4871_vm2, %v3876_v23, %v1047_v24  ;;  %v4603_v34 = vld [vmem:[%s5699_s3 + $0x108] sm:$0xff]   ;;  %v3959_v45 = vcombine.low %v5203_v27, %v2106_v44 }
 0x152   :  { %1118 = vst [vmem:[#allocation3 + $0x1e0] sm:$0xf] %v1102_v29  ;;  %v616_v33 = vld [vmem:[#allocation2 + $0x78] sm:$0xf]  ;;  %631 = vst [vmem:[#allocation3 + $0x1b0] sm:$0xf] %v615_v37  ;;  %3250 = vmatprep.mubr.bf16.mxu0 %v4575_v54 }
 0x153   :  { %v5215_v35 = vld [vmem:[#allocation2 + $0x80] sm:$0xf]  ;;  %1085 = vst [vmem:[#allocation3 + $0x1b8] sm:$0xf] %v1044_v31  ;;  %1086 = vst [vmem:[#allocation3 + $0x1dc] sm:$0xf] %v1048_v32  ;;  %v837_v46 = vsel %vm4919_vm5, %v832_v30, %v836_v16  ;;  %4238 = vmatpush3.bf16.msra.mxu1 %v4603_v34 }
 0x154   :  { %632 = vst [vmem:[#allocation3 + $0x1d4] sm:$0xf] %v616_v33  ;;  %v660_v36 = vld [vmem:[#allocation2 + $0x74] sm:$0x1]  ;;  %v662_v38 = vld [vmem:[#allocation2 + $0x7c] sm:$0x1] }
 0x155   :  { %v841_v58 = vrot.slane %v839_v41, 4  ;;  %v842_v61 = vshll.u32 %v5192_v0, 16  ;;  %v4612_v40 = vld [vmem:[%s5699_s3 + $0x140] sm:$0xff]   ;;  %v4570_v42 = vld [vmem:[#allocation3 + $0xd8] ss:$36 sps:$4 sm:$0xff]   ;;  %v848_v47 = vshll.u32 %v660_v36, 16 }
 0x156   :  { %v4572_v43 = vld [vmem:[#allocation3 + $0x124] ss:$36 sps:$4 sm:$0xff]   ;;  %921 = vst [vmem:[#allocation3 + $0x190] sm:$0xf] %v837_v46  ;;  %v853_v49 = vshrl.u32 %v661_v19, 16  ;;  %v856_v50 = vshll.u32 %v661_v19, 16  ;;  %3138 = vmatmul.mubr.bf16.gmra.mxu1 %v4570_v42  ;;  %4239 = vmatprep.subr.bf16.mxu1 %v4612_v40 }
 0x157   :  { %v844_v48 = vrot.slane %v842_v61, 5  ;;  %v862_v51 = vshll.u32 %v662_v38, 16  ;;  %v954_v52 = vld [vmem:[#allocation2 + $0x80] sm:$0xe]  ;;  %v5223_v21 = vld [vmem:[#allocation2 + $0x88] sm:$0xf]  ;;  %3145 = vmatprep.mubr.bf16.mxu1 %v4572_v43  ;;  %3251 = vmatmul.mubr.bf16.gmra.mxu0 %v3959_v45 }
 0x158   :  { %v850_v59 = vrot.slane %v848_v47, 5  ;;  %v955_v55 = vld [vmem:[#allocation2 + $0x84] sm:$0x1]  ;;  %v956_v56 = vld [vmem:[#allocation2 + $0x88] sm:$0xe]  ;;  %v3877_v57 = vrot.slane %v954_v52, 9 }
 0x159   :  { %v4615_v60 = vld [vmem:[%s5699_s3 + $0x100] sm:$0xff]   ;;  %v845_v62 = vor.u32 %v844_v48, %v841_v58  ;;  %v855_v63 = vrot.slane %v853_v49, 4  ;;  %v858_v0 = vrot.slane %v856_v50, 5  ;;  %v864_v1 = vrot.slane %v862_v51, 5  ;;  %v957_v2 = vld [vmem:[#allocation2 + $0x8c] sm:$0x1] }
 0x15a   :  { %v5232_v3 = vld [vmem:[%s5699_s3 + $0x238] sm:$0xff]   ;;  %v1051_v4 = vrot.slane %v955_v55, 5  ;;  %v3878_v5 = vrot.slane %v956_v56, 9  ;;  %v1055_v6 = vrot.slane %v957_v2, 5  ;;  %v1103_v7 = vld [vmem:[#allocation2 + $0x88] sm:$0xf]  ;;  %4240 = vmatpush3.bf16.msra.mxu1 %v4615_v60 }
 0x15b   :  { %v867_v8 = vshrl.u32 %v5215_v35, 16  ;;  %v5235_v9 = vld [vmem:[#allocation2 + $0x10] sm:$0xf]  ;;  %v846_v39 = vrot.slane %v845_v62, 4  ;;  %v859_v10 = vor.u32 %v858_v0, %v855_v63  ;;  %1119 = vst [vmem:[#allocation3 + $0x204] sm:$0xf] %v1103_v7  ;;  %4417 = vmatprep.subr.bf16.mxu1 %v5232_v3 }
 0x15c   :  { %v1104_v11 = vld [vmem:[#allocation2 + $0x90] sm:$0xf]  ;;  %v617_v12 = vld [vmem:[#allocation2 + $0x80] sm:$0xf]  ;;  %v2111_v13 = vld [vmem:[#allocation3 + $0x1b8] sm:$0xff]  ;;  %v1052_v15 = vsel %vm4871_vm2, %v3877_v57, %v1051_v4  ;;  %v1056_v16 = vsel %vm4871_vm2, %v3878_v5, %v1055_v6  ;;  %v870_v19 = vshll.u32 %v5215_v35, 16 }
 0x15d   :  { %v4586_v14 = vld [vmem:[#allocation3 + $0x1bc] ss:$36 sps:$4 sm:$0xff]   ;;  %1120 = vst [vmem:[#allocation3 + $0x228] sm:$0xf] %v1104_v11  ;;  %633 = vst [vmem:[#allocation3 + $0x1f8] sm:$0xf] %v617_v12  ;;  %v851_v22 = vsel %vm4919_vm5, %v846_v39, %v850_v59 }
 0x15e   :  { %v869_v17 = vrot.slane %v867_v8, 4  ;;  %v4580_v20 = vld [vmem:[#allocation3 + $0x120] ss:$36 sps:$4 sm:$0xff]   ;;  %v860_v23 = vrot.slane %v859_v10, 4  ;;  %1087 = vst [vmem:[#allocation3 + $0x200] sm:$0xf] %v1052_v15  ;;  %3258 = vmatprep.mubr.bf16.mxu0 %v4586_v14 }
 0x15f   :  { %1088 = vst [vmem:[#allocation3 + $0x224] sm:$0xf] %v1056_v16  ;;  %v618_v24 = vld [vmem:[#allocation2 + $0x88] sm:$0xf]  ;;  %v664_v25 = vld [vmem:[#allocation2 + $0x84] sm:$0x1]  ;;  %3146 = vmatmul.mubr.bf16.gmra.mxu1 %v4580_v20 }
 0x160   :  { %v881_v26 = vshrl.u32 %v5223_v21, 16  ;;  %v1604_v27 = vld [vmem:[#allocation2 + $0x18] sm:$0xf]  ;;  %v4583_v28 = vld [vmem:[#allocation3 + $0x16c] ss:$36 sps:$4 sm:$0xff]   ;;  %v2116_v29 = vld [vmem:[#allocation3 + $0x1dc] sm:$0xff]  ;;  %v865_v41 = vsel %vm4919_vm5, %v860_v23, %v864_v1 }
 0x161   :  { %922 = vst [vmem:[#allocation3 + $0x1b4] sm:$0xf] %v851_v22  ;;  %634 = vst [vmem:[#allocation3 + $0x21c] sm:$0xf] %v618_v24  ;;  %v872_v37 = vrot.slane %v870_v19, 5  ;;  %v876_v54 = vshll.u32 %v664_v25, 16  ;;  %v3968_v58 = vcombine.low %v2111_v13, %v2116_v29  ;;  %3153 = vmatprep.mubr.bf16.mxu1 %v4583_v28 }
 0x162   :  { %v666_v44 = vld [vmem:[#allocation2 + $0x8c] sm:$0x1]  ;;  %v883_v30 = vrot.slane %v881_v26, 4  ;;  %v884_v31 = vshll.u32 %v5223_v21, 16  ;;  %923 = vst [vmem:[#allocation3 + $0x1d8] sm:$0xf] %v865_v41 }
 0x163   :  { %v873_v32 = vor.u32 %v872_v37, %v869_v17  ;;  %v890_v33 = vshll.u32 %v666_v44, 16  ;;  %v1570_v34 = vld [vmem:[#allocation2 + $0x10] sm:$0xf]  ;;  %v1571_v35 = vld [vmem:[#allocation2 + $0x18] sm:$0xf]  ;;  %v1635_v36 = vshrl.u32 %v5235_v9, 16  ;;  %3259 = vmatmul.mubr.bf16.gmra.mxu0 %v3968_v58 }
 0x164   :  { %v1121_v38 = vld [vmem:[#allocation2 + $0x8] sm:$0xf]  ;;  %v878_v61 = vrot.slane %v876_v54, 5  ;;  %v886_v40 = vrot.slane %v884_v31, 5  ;;  %1586 = vst [vmem:[#allocation3 + $0x18] sm:$0xf] %v1570_v34 }
 0x165   :  { %1587 = vst [vmem:[#allocation3 + $0x3c] sm:$0xf] %v1571_v35  ;;  %v1603_v42 = vld [vmem:[#allocation2 + $0x14] sm:$0x1]  ;;  %v874_v43 = vrot.slane %v873_v32, 4  ;;  %v892_v46 = vrot.slane %v890_v33, 5 }
 0x166   :  { %v1605_v47 = vld [vmem:[#allocation2 + $0x1c] sm:$0x1]  ;;  %v1637_v48 = vrot.slane %v1635_v36, 4  ;;  %v1638_v49 = vshll.u32 %v5235_v9, 16  ;;  %v887_v50 = vor.u32 %v886_v40, %v883_v30  ;;  %v1644_v51 = vshll.u32 %v1603_v42, 16  ;;  %v2121_v55 = vld [vmem:[#allocation3 + $0x200] sm:$0xff] }
 0x167   :  { %v1649_v52 = vshrl.u32 %v1604_v27, 16  ;;  %v1652_v21 = vshll.u32 %v1604_v27, 16  ;;  %v1122_v45 = vld [vmem:[#allocation2 + $0xc] sm:$0x1]  ;;  %v1123_v59 = vld [vmem:[#allocation2 + $0x10] sm:$0xf]  ;;  %v879_v60 = vsel %vm4919_vm5, %v874_v43, %v878_v61 }
 0x168   :  { %v2126_v56 = vld [vmem:[#allocation3 + $0x224] sm:$0xff]  ;;  %v1640_v62 = vrot.slane %v1638_v49, 5  ;;  %v888_v0 = vrot.slane %v887_v50, 4  ;;  %924 = vst [vmem:[#allocation3 + $0x1fc] sm:$0xf] %v879_v60  ;;  %v1658_v2 = vshll.u32 %v1605_v47, 16 }
 0x169   :  { %v4597_v57 = vld [vmem:[#allocation3 + $0x204] ss:$36 sps:$4 sm:$0xff]   ;;  %v1651_v1 = vrot.slane %v1649_v52, 4  ;;  %v1124_v4 = vld [vmem:[#allocation2 + $0x14] sm:$0x1]  ;;  %v1646_v6 = vrot.slane %v1644_v51, 5  ;;  %v3977_v11 = vcombine.low %v2121_v55, %v2126_v56 }
 0x16a   :  { %v4591_v63 = vld [vmem:[#allocation3 + $0x168] ss:$36 sps:$4 sm:$0xff]   ;;  %3266 = vmatprep.mubr.bf16.mxu0 %v4597_v57  ;;  %v1641_v5 = vor.u32 %v1640_v62, %v1637_v48  ;;  %v1654_v7 = vrot.slane %v1652_v21, 5  ;;  %v1154_v8 = vshrl.u32 %v1121_v38, 16  ;;  %v4594_v39 = vld [vmem:[#allocation3 + $0x1b4] ss:$36 sps:$4 sm:$0xff]   ;;  %v893_v10 = vsel %vm4919_vm5, %v888_v0, %v892_v46 }
 0x16b   :  { %v1409_v9 = vld [vmem:[#allocation2 + $0x8] sm:$0xe]  ;;  %v1157_v12 = vshll.u32 %v1121_v38, 16  ;;  %v1410_v13 = vld [vmem:[#allocation2 + $0xc] sm:$0x1]  ;;  %v1163_v19 = vshll.u32 %v1122_v45, 16  ;;  %3154 = vmatmul.mubr.bf16.gmra.mxu1 %v4591_v63  ;;  %3267 = vmatmul.mubr.bf16.gmra.mxu0 %v3977_v11 }
 0x16c   :  { %v1606_v14 = vld [vmem:[#allocation2 + $0x20] sm:$0xf]  ;;  %925 = vst [vmem:[#allocation3 + $0x220] sm:$0xf] %v893_v10  ;;  %v1642_v15 = vrot.slane %v1641_v5, 4  ;;  %v1655_v16 = vor.u32 %v1654_v7, %v1651_v1  ;;  %v1156_v17 = vrot.slane %v1154_v8, 4  ;;  %3161 = vmatprep.mubr.bf16.mxu1 %v4594_v39 }
 0x16d   :  { %v1411_v20 = vld [vmem:[#allocation2 + $0x10] sm:$0xe]  ;;  %v5255_v22 = vld [vmem:[#allocation2 + $0x28] sm:$0xf]  ;;  %v1660_v23 = vrot.slane %v1658_v2, 5  ;;  %v1159_v24 = vrot.slane %v1157_v12, 5 }
 0x16e   :  { %v1168_v25 = vshrl.u32 %v1123_v59, 16  ;;  %v1171_v26 = vshll.u32 %v1123_v59, 16  ;;  %v1412_v27 = vld [vmem:[#allocation2 + $0x14] sm:$0x1]  ;;  %v1647_v28 = vsel %vm4919_vm5, %v1642_v15, %v1646_v6  ;;  %v1656_v29 = vrot.slane %v1655_v16, 4 }
 0x16f   :  { %v1177_v37 = vshll.u32 %v1124_v4, 16  ;;  %v3879_v41 = vrot.slane %v1409_v9, 9  ;;  %v1572_v44 = vld [vmem:[#allocation2 + $0x20] sm:$0xf]  ;;  %1874 = vst [vmem:[#allocation3 + $0x1c] sm:$0xf] %v1647_v28  ;;  %v1160_v54 = vor.u32 %v1159_v24, %v1156_v17 }
 0x170   :  { %v1165_v30 = vrot.slane %v1163_v19, 5  ;;  %v1170_v31 = vrot.slane %v1168_v25, 4  ;;  %v1173_v32 = vrot.slane %v1171_v26, 5  ;;  %v1573_v33 = vld [vmem:[#allocation2 + $0x28] sm:$0xf]  ;;  %v1661_v35 = vsel %vm4919_vm5, %v1656_v29, %v1660_v23 }
 0x171   :  { %1588 = vst [vmem:[#allocation3 + $0x60] sm:$0xf] %v1572_v44  ;;  %v1125_v34 = vld [vmem:[#allocation2 + $0x18] sm:$0xf]  ;;  %v1475_v36 = vrot.slane %v1410_v13, 5  ;;  %v3880_v38 = vrot.slane %v1411_v20, 9 }
 0x172   :  { %v1479_v58 = vrot.slane %v1412_v27, 5  ;;  %1589 = vst [vmem:[#allocation3 + $0x84] sm:$0xf] %v1573_v33  ;;  %v1607_v61 = vld [vmem:[#allocation2 + $0x24] sm:$0x1]  ;;  %v1161_v42 = vrot.slane %v1160_v54, 4  ;;  %v1174_v43 = vor.u32 %v1173_v32, %v1170_v31 }
 0x173   :  { %v1127_v40 = vld [vmem:[#allocation2 + $0x20] sm:$0xf]  ;;  %1875 = vst [vmem:[#allocation3 + $0x40] sm:$0xf] %v1661_v35  ;;  %v1663_v46 = vshrl.u32 %v1606_v14, 16  ;;  %v1666_v47 = vshll.u32 %v1606_v14, 16  ;;  %v1476_v49 = vsel %vm4871_vm2, %v3879_v41, %v1475_v36 }
 0x174   :  { %v4602_v48 = vld [vmem:[#allocation3 + $0x1b0] ss:$36 sps:$4 sm:$0xff]   ;;  %v1480_v50 = vsel %vm4871_vm2, %v3880_v38, %v1479_v58  ;;  %v1609_v51 = vld [vmem:[#allocation2 + $0x2c] sm:$0x1]  ;;  %v1672_v52 = vshll.u32 %v1607_v61, 16  ;;  %v1677_v21 = vshrl.u32 %v5255_v22, 16  ;;  %v1166_v45 = vsel %vm4919_vm5, %v1161_v42, %v1165_v30 }
 0x175   :  { %v1175_v59 = vrot.slane %v1174_v43, 4  ;;  %v1179_v55 = vrot.slane %v1177_v37, 5  ;;  %1553 = vst [vmem:[#allocation3 + $0x14] sm:$0xf] %v1476_v49  ;;  %1554 = vst [vmem:[#allocation3 + $0x38] sm:$0xf] %v1480_v50  ;;  %3162 = vmatmul.mubr.bf16.gmra.mxu1 %v4602_v48 }
 0x176   :  { %v1126_v56 = vld [vmem:[#allocation2 + $0x1c] sm:$0x1]  ;;  %1393 = vst [vmem:[#allocation3 + $0x10] sm:$0xf] %v1166_v45  ;;  %v1665_v60 = vrot.slane %v1663_v46, 4  ;;  %v1668_v62 = vrot.slane %v1666_v47, 5 }
 0x177   :  { %v4605_v57 = vld [vmem:[#allocation3 + $0x1fc] ss:$36 sps:$4 sm:$0xff]   ;;  %v1674_v63 = vrot.slane %v1672_v52, 5  ;;  %v1679_v0 = vrot.slane %v1677_v21, 4  ;;  %v1180_v1 = vsel %vm4919_vm5, %v1175_v59, %v1179_v55  ;;  %v1680_v2 = vshll.u32 %v5255_v22, 16 }
 0x178   :  { %v1686_v4 = vshll.u32 %v1609_v51, 16  ;;  %v1128_v5 = vld [vmem:[#allocation2 + $0x24] sm:$0x1]  ;;  %v1182_v6 = vshrl.u32 %v1125_v34, 16  ;;  %v1413_v7 = vld [vmem:[#allocation2 + $0x18] sm:$0xe]  ;;  %3169 = vmatprep.mubr.bf16.mxu1 %v4605_v57  ;;  %v1669_v8 = vor.u32 %v1668_v62, %v1665_v60 }
 0x179   :  { %1394 = vst [vmem:[#allocation3 + $0x34] sm:$0xf] %v1180_v1  ;;  %v1185_v9 = vshll.u32 %v1125_v34, 16  ;;  %v1191_v39 = vshll.u32 %v1126_v56, 16  ;;  %v1196_v10 = vshrl.u32 %v1127_v40, 16  ;;  %v1682_v14 = vrot.slane %v1680_v2, 5 }
 0x17a   :  { %v1414_v11 = vld [vmem:[#allocation2 + $0x1c] sm:$0x1]  ;;  %v1415_v12 = vld [vmem:[#allocation2 + $0x20] sm:$0xe]  ;;  %v1610_v13 = vld [vmem:[#allocation2 + $0x30] sm:$0xf] }
 0x17b   :  { %v1688_v15 = vrot.slane %v1686_v4, 5  ;;  %v1184_v16 = vrot.slane %v1182_v6, 4  ;;  %v1199_v17 = vshll.u32 %v1127_v40, 16  ;;  %v1416_v19 = vld [vmem:[#allocation2 + $0x24] sm:$0x1]  ;;  %v1670_v23 = vrot.slane %v1669_v8, 4 }
 0x17c   :  { %v4609_v20 = vld [vmem:[#allocation3 + $0x18] ss:$36 sps:$4 sm:$0xff]   ;;  %v1683_v24 = vor.u32 %v1682_v14, %v1679_v0  ;;  %v1187_v25 = vrot.slane %v1185_v9, 5  ;;  %v1193_v26 = vrot.slane %v1191_v39, 5  ;;  %v1198_v27 = vrot.slane %v1196_v10, 4 }
 0x17d   :  { %v4611_v22 = vld [vmem:[#allocation3 + $0x1c] ss:$36 sps:$4 sm:$0xff]   ;;  %v1574_v28 = vld [vmem:[#allocation2 + $0x30] sm:$0xf]  ;;  %v1612_v29 = vld [vmem:[#allocation2 + $0x38] sm:$0xf]  ;;  %v1675_v37 = vsel %vm4919_vm5, %v1670_v23, %v1674_v63 }
 0x17e   :  { %3404 = vmatprep.mubr.bf16.mxu0 %v4611_v22  ;;  %v1201_v41 = vrot.slane %v1199_v17, 5  ;;  %v1205_v44 = vshll.u32 %v1128_v5, 16  ;;  %v3881_v54 = vrot.slane %v1413_v7, 9  ;;  %v1575_v30 = vld [vmem:[#allocation2 + $0x38] sm:$0xf]  ;;  %v1684_v33 = vrot.slane %v1683_v24, 4 }
 0x17f   :  { %1590 = vst [vmem:[#allocation3 + $0xa8] sm:$0xf] %v1574_v28  ;;  %v1129_v31 = vld [vmem:[#allocation2 + $0x28] sm:$0xf]  ;;  %v4614_v32 = vld [vmem:[#allocation3 + $0x1f8] ss:$36 sps:$4 sm:$0xff]   ;;  %3405 = vmatmul.mubr.bf16.vlgmr.msra.gmra.mxu0 %v4609_v20  ;;  %v1188_v34 = vor.u32 %v1187_v25, %v1184_v16 }
 0x180   :  { %1876 = vst [vmem:[#allocation3 + $0x64] sm:$0xf] %v1675_v37  ;;  %v1483_v35 = vrot.slane %v1414_v11, 5  ;;  %v3882_v36 = vrot.slane %v1415_v12, 9  ;;  %1591 = vst [vmem:[#allocation3 + $0xcc] sm:$0xf] %v1575_v30  ;;  %v1202_v38 = vor.u32 %v1201_v41, %v1198_v27  ;;  %3170 = vmatmul.mubr.bf16.gmra.mxu1 %v4614_v32  ;;  %v1689_v46 = vsel %vm4919_vm5, %v1684_v33, %v1688_v15 }
 0x181   :  { %v1207_v58 = vrot.slane %v1205_v44, 5  ;;  %v1487_v61 = vrot.slane %v1416_v19, 5  ;;  %v1611_v40 = vld [vmem:[#allocation2 + $0x34] sm:$0x1]  ;;  %v1691_v42 = vshrl.u32 %v1610_v13, 16  ;;  %v1189_v47 = vrot.slane %v1188_v34, 4 }
 0x182   :  { %v4619_v43 = vld [vmem:[#allocation3 + $0x14] ss:$36 sps:$4 sm:$0xff]   ;;  %v1484_v48 = vsel %vm4871_vm2, %v3881_v54, %v1483_v35  ;;  %v1613_v49 = vld [vmem:[#allocation2 + $0x3c] sm:$0x1]  ;;  %v1131_v50 = vld [vmem:[#allocation2 + $0x30] sm:$0xf] }
 0x183   :  { %1877 = vst [vmem:[#allocation3 + $0x88] sm:$0xf] %v1689_v46  ;;  %v1203_v51 = vrot.slane %v1202_v38, 4  ;;  %v1488_v52 = vsel %vm4871_vm2, %v3882_v36, %v1487_v61  ;;  %1555 = vst [vmem:[#allocation3 + $0x5c] sm:$0xf] %v1484_v48  ;;  %v1693_v21 = vrot.slane %v1691_v42, 4  ;;  %3307 = vmatprep.mubr.bf16.mxu1 %v4619_v43  ;;  %v1194_v55 = vsel %vm4919_vm5, %v1189_v47, %v1193_v26 }
 0x184   :  { %v1694_v45 = vshll.u32 %v1610_v13, 16  ;;  %v1130_v59 = vld [vmem:[#allocation2 + $0x2c] sm:$0x1]  ;;  %1556 = vst [vmem:[#allocation3 + $0x80] sm:$0xf] %v1488_v52  ;;  %v1700_v56 = vshll.u32 %v1611_v40, 16 }
 0x185   :  { %v1705_v57 = vshrl.u32 %v1612_v29, 16  ;;  %v1708_v60 = vshll.u32 %v1612_v29, 16  ;;  %v1132_v62 = vld [vmem:[#allocation2 + $0x34] sm:$0x1]  ;;  %v1208_v63 = vsel %vm4919_vm5, %v1203_v51, %v1207_v58  ;;  %1395 = vst [vmem:[#allocation3 + $0x58] sm:$0xf] %v1194_v55 }
 0x186   :  { %v1696_v0 = vrot.slane %v1694_v45, 5  ;;  %v1714_v1 = vshll.u32 %v1613_v49, 16  ;;  %v1210_v2 = vshrl.u32 %v1129_v31, 16  ;;  %v1417_v4 = vld [vmem:[#allocation2 + $0x28] sm:$0xe]  ;;  %v1702_v6 = vrot.slane %v1700_v56, 5 }
 0x187   :  { %v4617_v5 = vld [vmem:[#allocation3 + $0x10] ss:$36 sps:$4 sm:$0xff]   ;;  %1396 = vst [vmem:[#allocation3 + $0x7c] sm:$0xf] %v1208_v63  ;;  %v1707_v7 = vrot.slane %v1705_v57, 4  ;;  %v1710_v8 = vrot.slane %v1708_v60, 5 }
 0x188   :  { %v1213_v9 = vshll.u32 %v1129_v31, 16  ;;  %v1418_v39 = vld [vmem:[#allocation2 + $0x2c] sm:$0x1]  ;;  %v1697_v10 = vor.u32 %v1696_v0, %v1693_v21  ;;  %v1716_v11 = vrot.slane %v1714_v1, 5  ;;  %v4627_v12 = vld [vmem:[%s5699_s3 + $0x230] sm:$0xff]   ;;  %v1212_v13 = vrot.slane %v1210_v2, 4  ;;  %3308 = vmatmul.mubr.bf16.vlgmr.msra.gmra.mxu1 %v4617_v5 }
 0x189   :  { %v1219_v14 = vshll.u32 %v1130_v59, 16  ;;  %v1419_v15 = vld [vmem:[#allocation2 + $0x30] sm:$0xe]  ;;  %v2063_v16 = vld [vmem:[#allocation3 + $0x60] sm:$0xff]  ;;  %v1711_v17 = vor.u32 %v1710_v8, %v1707_v7  ;;  %v1224_v20 = vshrl.u32 %v1131_v50, 16  ;;  %v1227_v22 = vshll.u32 %v1131_v50, 16  ;;  %4418 = vmatpush3.bf16.msra.mxu1 %v5232_v3 }
 0x18a   :  { %v1215_v19 = vrot.slane %v1213_v9, 5  ;;  %v1420_v23 = vld [vmem:[#allocation2 + $0x34] sm:$0x1]  ;;  %v1698_v24 = vrot.slane %v1697_v10, 4  ;;  %v1233_v26 = vshll.u32 %v1132_v62, 16  ;;  %v3883_v27 = vrot.slane %v1417_v4, 9  ;;  %4419 = vmatprep.subr.bf16.mxu1 %v4627_v12 }
 0x18b   :  { %v1221_v25 = vrot.slane %v1219_v14, 5  ;;  %v1576_v28 = vld [vmem:[#allocation2 + $0x40] sm:$0xf]  ;;  %v2068_v29 = vld [vmem:[#allocation3 + $0x84] sm:$0xff]  ;;  %v1712_v41 = vrot.slane %v1711_v17, 4  ;;  %v1226_v54 = vrot.slane %v1224_v20, 4 }
 0x18c   :  { %v4620_v37 = vld [vmem:[#allocation3 + $0x64] ss:$36 sps:$4 sm:$0xff]   ;;  %v1216_v44 = vor.u32 %v1215_v19, %v1212_v13  ;;  %v1229_v30 = vrot.slane %v1227_v22, 5  ;;  %1592 = vst [vmem:[#allocation3 + $0xf0] sm:$0xf] %v1576_v28  ;;  %v3927_v33 = vcombine.low %v2063_v16, %v2068_v29  ;;  %v1703_v34 = vsel %vm4919_vm5, %v1698_v24, %v1702_v6  ;;  %v5312_v17 = vld [vmem:[%s5699_s3 + $0x218] sm:$0xff]  }
 0x18d   :  { %v1616_v31 = vld [vmem:[#allocation2 + $0x48] sm:$0xf]  ;;  %v1614_v32 = vld [vmem:[#allocation2 + $0x40] sm:$0xf]  ;;  %v1491_v35 = vrot.slane %v1418_v39, 5  ;;  %3412 = vmatprep.mubr.bf16.mxu0 %v4620_v37  ;;  %v1717_v58 = vsel %vm4919_vm5, %v1712_v41, %v1716_v11  ;;  %v3884_v42 = vrot.slane %v1419_v15, 9  ;;  %4420 = vmatpush3.bf16.msra.mxu1 %v4627_v12 }
 0x18e   :  { %v1617_v36 = vld [vmem:[#allocation2 + $0x4c] sm:$0x1]  ;;  %v5289_v38 = vld [vmem:[#allocation2 + $0x38] sm:$0xf]  ;;  %1878 = vst [vmem:[#allocation3 + $0xac] sm:$0xf] %v1703_v34  ;;  %v1230_v40 = vor.u32 %v1229_v30, %v1226_v54  ;;  %3413 = vmatmul.mubr.bf16.gmra.mxu0 %v3927_v33 }
 0x18f   :  { %v1217_v61 = vrot.slane %v1216_v44, 4  ;;  %v1615_v43 = vld [vmem:[#allocation2 + $0x44] sm:$0x1]  ;;  %v4633_v3 = vld [vmem:[%s5699_s3 + $0x228] sm:$0xff]   ;;  %v4623_v46 = vld [vmem:[#allocation3 + $0x5c] ss:$36 sps:$4 sm:$0xff]   ;;  %v1492_v48 = vsel %vm4871_vm2, %v3883_v27, %v1491_v35 }
 0x190   :  { %1879 = vst [vmem:[#allocation3 + $0xd0] sm:$0xf] %v1717_v58  ;;  %v1235_v47 = vrot.slane %v1233_v26, 5  ;;  %v1495_v49 = vrot.slane %v1420_v23, 5  ;;  %v1135_v50 = vld [vmem:[#allocation2 + $0x40] sm:$0xf]  ;;  %3315 = vmatprep.mubr.bf16.mxu1 %v4623_v46  ;;  %4421 = vmatprep.subr.bf16.mxu1 %v4633_v3 }
 0x191   :  { %v1222_v51 = vsel %vm4919_vm5, %v1217_v61, %v1221_v25  ;;  %v1231_v52 = vrot.slane %v1230_v40, 4  ;;  %1557 = vst [vmem:[#allocation3 + $0xa4] sm:$0xf] %v1492_v48  ;;  %v1719_v21 = vshrl.u32 %v1614_v32, 16  ;;  %v1722_v45 = vshll.u32 %v1614_v32, 16  ;;  %v4639_v4 = vld [vmem:[%s5699_s3 + $0x220] sm:$0xff]   ;;  %4422 = vmatpush3.bf16.msra.mxu1 %v4633_v3 }
 0x192   :  { %1397 = vst [vmem:[#allocation3 + $0xa0] sm:$0xf] %v1222_v51  ;;  %v1496_v59 = vsel %vm4871_vm2, %v3884_v42, %v1495_v49  ;;  %v1728_v55 = vshll.u32 %v1615_v43, 16  ;;  %v1733_v56 = vshrl.u32 %v1616_v31, 16  ;;  %v1736_v57 = vshll.u32 %v1616_v31, 16  ;;  %4423 = vmatprep.subr.bf16.mxu1 %v4639_v4 }
 0x193   :  { %v1134_v60 = vld [vmem:[#allocation2 + $0x3c] sm:$0x1]  ;;  %v1236_v63 = vsel %vm4919_vm5, %v1231_v52, %v1235_v47  ;;  %1558 = vst [vmem:[#allocation3 + $0xc8] sm:$0xf] %v1496_v59  ;;  %v1721_v0 = vrot.slane %v1719_v21, 4  ;;  %v1724_v1 = vrot.slane %v1722_v45, 5 }
 0x194   :  { %v4628_v62 = vld [vmem:[#allocation3 + $0x58] ss:$36 sps:$4 sm:$0xff]   ;;  %v1742_v2 = vshll.u32 %v1617_v36, 16  ;;  %1398 = vst [vmem:[#allocation3 + $0xc4] sm:$0xf] %v1236_v63  ;;  %v1730_v5 = vrot.slane %v1728_v55, 5 }
 0x195   :  { %v1735_v6 = vrot.slane %v1733_v56, 4  ;;  %v1738_v7 = vrot.slane %v1736_v57, 5  ;;  %v1136_v8 = vld [vmem:[#allocation2 + $0x44] sm:$0x1]  ;;  %v1238_v9 = vshrl.u32 %v5289_v38, 16  ;;  %3316 = vmatmul.mubr.bf16.gmra.mxu1 %v4628_v62  ;;  %v1725_v10 = vor.u32 %v1724_v1, %v1721_v0  ;;  %v2073_v19 = vld [vmem:[#allocation3 + $0xa8] sm:$0xff] }
 0x196   :  { %v1421_v39 = vld [vmem:[#allocation2 + $0x38] sm:$0xe]  ;;  %v1744_v11 = vrot.slane %v1742_v2, 5  ;;  %v1241_v12 = vshll.u32 %v5289_v38, 16  ;;  %v1247_v13 = vshll.u32 %v1134_v60, 16  ;;  %v1252_v23 = vshrl.u32 %v1135_v50, 16  ;;  %4424 = vmatpush3.bf16.msra.mxu1 %v4639_v4 }
 0x197   :  { %v1422_v14 = vld [vmem:[#allocation2 + $0x3c] sm:$0x1]  ;;  %v1423_v15 = vld [vmem:[#allocation2 + $0x40] sm:$0xe]  ;;  %v1739_v20 = vor.u32 %v1738_v7, %v1735_v6  ;;  %v1240_v22 = vrot.slane %v1238_v9, 4  ;;  %v1255_v24 = vshll.u32 %v1135_v50, 16  ;;  %4425 = vmatprep.subr.bf16.mxu1 %v5312_v17 }
 0x198   :  { %v1578_v16 = vld [vmem:[#allocation2 + $0x60] sm:$0xf]  ;;  %v1579_v25 = vld [vmem:[#allocation2 + $0x68] sm:$0xf]  ;;  %v2078_v26 = vld [vmem:[#allocation3 + $0xcc] sm:$0xff]  ;;  %v1726_v28 = vrot.slane %v1725_v10, 4 }
 0x199   :  { %1594 = vst [vmem:[#allocation3 + $0x138] sm:$0xf] %v1578_v16  ;;  %v4625_v27 = vld [vmem:[#allocation3 + $0xac] ss:$36 sps:$4 sm:$0xff]   ;;  %v1243_v29 = vrot.slane %v1241_v12, 5  ;;  %v1249_v37 = vrot.slane %v1247_v13, 5  ;;  %v3936_v41 = vcombine.low %v2073_v19, %v2078_v26 }
 0x19a   :  { %1595 = vst [vmem:[#allocation3 + $0x15c] sm:$0xf] %v1579_v25  ;;  %v1740_v44 = vrot.slane %v1739_v20, 4  ;;  %v1254_v54 = vrot.slane %v1252_v23, 4  ;;  %v1257_v30 = vrot.slane %v1255_v24, 5  ;;  %3420 = vmatprep.mubr.bf16.mxu0 %v4625_v27  ;;  %v1731_v32 = vsel %vm4919_vm5, %v1726_v28, %v1730_v5  ;;  %v4651_v45 = vld [vmem:[%s5699_s3 + $0x210] sm:$0xff]   ;;  %4426 = vmatpush3.bf16.msra.mxu1 %v5312_v17 }
 0x19b   :  { %v1620_v31 = vld [vmem:[#allocation2 + $0x68] sm:$0xf]  ;;  %v1244_v33 = vor.u32 %v1243_v29, %v1240_v22  ;;  %v1261_v34 = vshll.u32 %v1136_v8, 16  ;;  %v1424_v35 = vld [vmem:[#allocation2 + $0x44] sm:$0x1]  ;;  %v3885_v36 = vrot.slane %v1421_v39, 9  ;;  %3421 = vmatmul.mubr.bf16.gmra.mxu0 %v3936_v41  ;;  %4427 = vmatprep.subr.bf16.mxu1 %v4651_v45 }
 0x19c   :  { %v1618_v38 = vld [vmem:[#allocation2 + $0x60] sm:$0xf]  ;;  %v1745_v58 = vsel %vm4919_vm5, %v1740_v44, %v1744_v11  ;;  %1880 = vst [vmem:[#allocation3 + $0xf4] sm:$0xf] %v1731_v32  ;;  %v1258_v61 = vor.u32 %v1257_v30, %v1254_v54  ;;  %v1499_v40 = vrot.slane %v1422_v14, 5  ;;  %v3886_v42 = vrot.slane %v1423_v15, 9 }
 0x19d   :  { %v1619_v43 = vld [vmem:[#allocation2 + $0x64] sm:$0x1]  ;;  %v1137_v3 = vld [vmem:[#allocation2 + $0x58] sm:$0xf]  ;;  %1881 = vst [vmem:[#allocation3 + $0x118] sm:$0xf] %v1745_v58 }
 0x19e   :  { %v4629_v46 = vld [vmem:[#allocation3 + $0xa4] ss:$36 sps:$4 sm:$0xff]   ;;  %v1245_v47 = vrot.slane %v1244_v33, 4  ;;  %v1621_v48 = vld [vmem:[#allocation2 + $0x6c] sm:$0x1]  ;;  %v1259_v50 = vrot.slane %v1258_v61, 4  ;;  %v1500_v52 = vsel %vm4871_vm2, %v3885_v36, %v1499_v40  ;;  %4428 = vmatpush3.bf16.msra.mxu1 %v4651_v45 }
 0x19f   :  { %v4634_v49 = vld [vmem:[#allocation3 + $0xa0] ss:$36 sps:$4 sm:$0xff]   ;;  %v1263_v51 = vrot.slane %v1261_v34, 5  ;;  %v1503_v21 = vrot.slane %v1424_v35, 5  ;;  %3323 = vmatprep.mubr.bf16.mxu1 %v4629_v46  ;;  %1559 = vst [vmem:[#allocation3 + $0xec] sm:$0xf] %v1500_v52 }
 0x1a0   :  { %v1139_v59 = vld [vmem:[#allocation2 + $0x60] sm:$0xf]  ;;  %v1250_v55 = vsel %vm4919_vm5, %v1245_v47, %v1249_v37  ;;  %v1747_v56 = vshrl.u32 %v1618_v38, 16  ;;  %v1750_v57 = vshll.u32 %v1618_v38, 16  ;;  %v1756_v60 = vshll.u32 %v1619_v43, 16  ;;  %3324 = vmatmul.mubr.bf16.gmra.mxu1 %v4634_v49  ;;  %v5333_v4 = vld [vmem:[%s5699_s3 + $0x208] sm:$0xff]  }
 0x1a1   :  { %v1264_v62 = vsel %vm4919_vm5, %v1259_v50, %v1263_v51  ;;  %1399 = vst [vmem:[#allocation3 + $0xe8] sm:$0xf] %v1250_v55  ;;  %v1504_v63 = vsel %vm4871_vm2, %v3886_v42, %v1503_v21  ;;  %v1761_v0 = vshrl.u32 %v1620_v31, 16  ;;  %v1764_v1 = vshll.u32 %v1620_v31, 16  ;;  %v1138_v2 = vld [vmem:[#allocation2 + $0x5c] sm:$0x1]  ;;  %4429 = vmatprep.subr.bf16.mxu1 %v5333_v4 }
 0x1a2   :  { %1400 = vst [vmem:[#allocation3 + $0x10c] sm:$0xf] %v1264_v62  ;;  %1560 = vst [vmem:[#allocation3 + $0x110] sm:$0xf] %v1504_v63  ;;  %v1749_v5 = vrot.slane %v1747_v56, 4  ;;  %v1752_v6 = vrot.slane %v1750_v57, 5  ;;  %4430 = vmatpush3.bf16.msra.mxu1 %v5333_v4 }
 0x1a3   :  { %v1758_v7 = vrot.slane %v1756_v60, 5  ;;  %v1770_v8 = vshll.u32 %v1621_v48, 16  ;;  %v1140_v9 = vld [vmem:[#allocation2 + $0x64] sm:$0x1]  ;;  %v1580_v39 = vld [vmem:[#allocation2 + $0x70] sm:$0xf] }
 0x1a4   :  { %v1763_v10 = vrot.slane %v1761_v0, 4  ;;  %v1766_v11 = vrot.slane %v1764_v1, 5  ;;  %v1266_v12 = vshrl.u32 %v1137_v3, 16  ;;  %v1269_v13 = vshll.u32 %v1137_v3, 16  ;;  %v1425_v14 = vld [vmem:[#allocation2 + $0x58] sm:$0xe] }
 0x1a5   :  { %v1426_v15 = vld [vmem:[#allocation2 + $0x5c] sm:$0x1]  ;;  %v1581_v16 = vld [vmem:[#allocation2 + $0x78] sm:$0xf]  ;;  %1596 = vst [vmem:[#allocation3 + $0x180] sm:$0xf] %v1580_v39  ;;  %v1753_v20 = vor.u32 %v1752_v6, %v1749_v5 }
 0x1a6   :  { %v2083_v19 = vld [vmem:[#allocation3 + $0xf0] sm:$0xff]  ;;  %v1772_v22 = vrot.slane %v1770_v8, 5  ;;  %v1275_v23 = vshll.u32 %v1138_v2, 16  ;;  %v1280_v24 = vshrl.u32 %v1139_v59, 16  ;;  %v1427_v25 = vld [vmem:[#allocation2 + $0x60] sm:$0xe]  ;;  %v1767_v28 = vor.u32 %v1766_v11, %v1763_v10 }
 0x1a7   :  { %1597 = vst [vmem:[#allocation3 + $0x1a4] sm:$0xf] %v1581_v16  ;;  %v2088_v26 = vld [vmem:[#allocation3 + $0x114] sm:$0xff]  ;;  %v1268_v17 = vrot.slane %v1266_v12, 4  ;;  %v1271_v29 = vrot.slane %v1269_v13, 5  ;;  %v1283_v37 = vshll.u32 %v1139_v59, 16 }
 0x1a8   :  { %v4631_v27 = vld [vmem:[#allocation3 + $0xf4] ss:$36 sps:$4 sm:$0xff]   ;;  %v1622_v41 = vld [vmem:[#allocation2 + $0x70] sm:$0xf]  ;;  %v3945_v44 = vcombine.low %v2083_v19, %v2088_v26  ;;  %v1754_v54 = vrot.slane %v1753_v20, 4  ;;  %v1277_v30 = vrot.slane %v1275_v23, 5 }
 0x1a9   :  { %v1282_v31 = vrot.slane %v1280_v24, 4  ;;  %v1624_v32 = vld [vmem:[#allocation2 + $0x78] sm:$0xf]  ;;  %3428 = vmatprep.mubr.bf16.mxu0 %v4631_v27  ;;  %v1768_v33 = vrot.slane %v1767_v28, 4  ;;  %v1272_v34 = vor.u32 %v1271_v29, %v1268_v17  ;;  %v1285_v35 = vrot.slane %v1283_v37, 5  ;;  %v4661_v58 = vld [vmem:[%s5699_s3 + $0x200] sm:$0xff]  }
 0x1aa   :  { %v1289_v36 = vshll.u32 %v1140_v9, 16  ;;  %v1428_v38 = vld [vmem:[#allocation2 + $0x64] sm:$0x1]  ;;  %3429 = vmatmul.mubr.bf16.gmra.mxu0 %v3945_v44  ;;  %v1759_v61 = vsel %vm4919_vm5, %v1754_v54, %v1758_v7  ;;  %v3887_v40 = vrot.slane %v1425_v14, 9  ;;  %v1507_v42 = vrot.slane %v1426_v15, 5  ;;  %4431 = vmatprep.subr.bf16.mxu1 %v4661_v58 }
 0x1ab   :  { %v3888_v43 = vrot.slane %v1427_v25, 9  ;;  %v1623_v3 = vld [vmem:[#allocation2 + $0x74] sm:$0x1]  ;;  %v1141_v46 = vld [vmem:[#allocation2 + $0x68] sm:$0xf]  ;;  %v1773_v48 = vsel %vm4919_vm5, %v1768_v33, %v1772_v22  ;;  %v1273_v49 = vrot.slane %v1272_v34, 4  ;;  %v1286_v50 = vor.u32 %v1285_v35, %v1282_v31  ;;  %4432 = vmatpush3.bf16.msra.mxu1 %v4661_v58 }
 0x1ac   :  { %v4635_v47 = vld [vmem:[#allocation3 + $0xec] ss:$36 sps:$4 sm:$0xff]   ;;  %1882 = vst [vmem:[#allocation3 + $0x13c] sm:$0xf] %v1759_v61  ;;  %v1625_v51 = vld [vmem:[#allocation2 + $0x7c] sm:$0x1]  ;;  %v1508_v45 = vsel %vm4871_vm2, %v3887_v40, %v1507_v42 }
 0x1ad   :  { %1883 = vst [vmem:[#allocation3 + $0x160] sm:$0xf] %v1773_v48  ;;  %v4640_v52 = vld [vmem:[#allocation3 + $0xe8] ss:$36 sps:$4 sm:$0xff]   ;;  %v1291_v21 = vrot.slane %v1289_v36, 5  ;;  %v1511_v59 = vrot.slane %v1428_v38, 5  ;;  %3331 = vmatprep.mubr.bf16.mxu1 %v4635_v47  ;;  %v1278_v57 = vsel %vm4919_vm5, %v1273_v49, %v1277_v30 }
 0x1ae   :  { %v1775_v55 = vshrl.u32 %v1622_v41, 16  ;;  %v1143_v56 = vld [vmem:[#allocation2 + $0x70] sm:$0xf]  ;;  %v1287_v60 = vrot.slane %v1286_v50, 4  ;;  %1561 = vst [vmem:[#allocation3 + $0x134] sm:$0xf] %v1508_v45  ;;  %3332 = vmatmul.mubr.bf16.gmra.mxu1 %v4640_v52 }
 0x1af   :  { %v1778_v62 = vshll.u32 %v1622_v41, 16  ;;  %v1784_v63 = vshll.u32 %v1623_v3, 16  ;;  %1401 = vst [vmem:[#allocation3 + $0x130] sm:$0xf] %v1278_v57  ;;  %v1512_v0 = vsel %vm4871_vm2, %v3888_v43, %v1511_v59  ;;  %v1789_v2 = vshrl.u32 %v1624_v32, 16 }
 0x1b0   :  { %v1777_v1 = vrot.slane %v1775_v55, 4  ;;  %v1792_v5 = vshll.u32 %v1624_v32, 16  ;;  %v1142_v6 = vld [vmem:[#allocation2 + $0x6c] sm:$0x1]  ;;  %v1292_v4 = vsel %vm4919_vm5, %v1287_v60, %v1291_v21  ;;  %1562 = vst [vmem:[#allocation3 + $0x158] sm:$0xf] %v1512_v0 }
 0x1b1   :  { %v1780_v7 = vrot.slane %v1778_v62, 5  ;;  %v1786_v8 = vrot.slane %v1784_v63, 5  ;;  %v1798_v9 = vshll.u32 %v1625_v51, 16  ;;  %1402 = vst [vmem:[#allocation3 + $0x154] sm:$0xf] %v1292_v4  ;;  %v1791_v39 = vrot.slane %v1789_v2, 4 }
 0x1b2   :  { %v1794_v10 = vrot.slane %v1792_v5, 5  ;;  %v1144_v11 = vld [vmem:[#allocation2 + $0x74] sm:$0x1]  ;;  %v1294_v12 = vshrl.u32 %v1141_v46, 16  ;;  %v1297_v13 = vshll.u32 %v1141_v46, 16  ;;  %v1303_v22 = vshll.u32 %v1142_v6, 16 }
 0x1b3   :  { %v1429_v14 = vld [vmem:[#allocation2 + $0x68] sm:$0xe]  ;;  %v1430_v15 = vld [vmem:[#allocation2 + $0x6c] sm:$0x1]  ;;  %v1582_v16 = vld [vmem:[#allocation2 + $0x80] sm:$0xf]  ;;  %v1781_v19 = vor.u32 %v1780_v7, %v1777_v1 }
 0x1b4   :  { %v1800_v20 = vrot.slane %v1798_v9, 5  ;;  %v1308_v23 = vshrl.u32 %v1143_v56, 16  ;;  %v1583_v24 = vld [vmem:[#allocation2 + $0x88] sm:$0xf]  ;;  %1598 = vst [vmem:[#allocation3 + $0x1c8] sm:$0xf] %v1582_v16  ;;  %v1795_v26 = vor.u32 %v1794_v10, %v1791_v39 }
 0x1b5   :  { %v2093_v25 = vld [vmem:[#allocation3 + $0x138] sm:$0xff]  ;;  %v1296_v27 = vrot.slane %v1294_v12, 4  ;;  %v1299_v28 = vrot.slane %v1297_v13, 5  ;;  %v1311_v17 = vshll.u32 %v1143_v56, 16  ;;  %v1431_v29 = vld [vmem:[#allocation2 + $0x70] sm:$0xe] }
 0x1b6   :  { %1599 = vst [vmem:[#allocation3 + $0x1ec] sm:$0xf] %v1583_v24  ;;  %v2098_v37 = vld [vmem:[#allocation3 + $0x15c] sm:$0xff]  ;;  %v1782_v44 = vrot.slane %v1781_v19, 4  ;;  %v1305_v54 = vrot.slane %v1303_v22, 5  ;;  %v1310_v30 = vrot.slane %v1308_v23, 4 }
 0x1b7   :  { %v4637_v41 = vld [vmem:[#allocation3 + $0x13c] ss:$36 sps:$4 sm:$0xff]   ;;  %v3954_v32 = vcombine.low %v2093_v25, %v2098_v37  ;;  %v1796_v33 = vrot.slane %v1795_v26, 4  ;;  %v1300_v34 = vor.u32 %v1299_v28, %v1296_v27  ;;  %v1313_v35 = vrot.slane %v1311_v17, 5  ;;  %v1432_v58 = vld [vmem:[#allocation2 + $0x74] sm:$0x1] }
 0x1b8   :  { %v1626_v31 = vld [vmem:[#allocation2 + $0x80] sm:$0xf]  ;;  %3436 = vmatprep.mubr.bf16.mxu0 %v4637_v41  ;;  %v1787_v36 = vsel %vm4919_vm5, %v1782_v44, %v1786_v8  ;;  %v1317_v38 = vshll.u32 %v1144_v11, 16  ;;  %v3889_v61 = vrot.slane %v1429_v14, 9  ;;  %v1515_v40 = vrot.slane %v1430_v15, 5 }
 0x1b9   :  { %v1628_v42 = vld [vmem:[#allocation2 + $0x88] sm:$0xf]  ;;  %3437 = vmatmul.mubr.bf16.gmra.mxu0 %v3954_v32  ;;  %v1801_v43 = vsel %vm4919_vm5, %v1796_v33, %v1800_v20  ;;  %1884 = vst [vmem:[#allocation3 + $0x184] sm:$0xf] %v1787_v36  ;;  %v1301_v3 = vrot.slane %v1300_v34, 4  ;;  %v1314_v46 = vor.u32 %v1313_v35, %v1310_v30  ;;  %v3890_v47 = vrot.slane %v1431_v29, 9 }
 0x1ba   :  { %v1627_v48 = vld [vmem:[#allocation2 + $0x84] sm:$0x1]  ;;  %v1145_v49 = vld [vmem:[#allocation2 + $0x78] sm:$0xf]  ;;  %1885 = vst [vmem:[#allocation3 + $0x1a8] sm:$0xf] %v1801_v43  ;;  %v1516_v52 = vsel %vm4871_vm2, %v3889_v61, %v1515_v40 }
 0x1bb   :  { %v4641_v50 = vld [vmem:[#allocation3 + $0x134] ss:$36 sps:$4 sm:$0xff]   ;;  %v1319_v51 = vrot.slane %v1317_v38, 5  ;;  %v1629_v21 = vld [vmem:[#allocation2 + $0x8c] sm:$0x1]  ;;  %v1306_v55 = vsel %vm4919_vm5, %v1301_v3, %v1305_v54  ;;  %v1315_v56 = vrot.slane %v1314_v46, 4 }
 0x1bc   :  { %v1147_v45 = vld [vmem:[#allocation2 + $0x80] sm:$0xf]  ;;  %v4646_v59 = vld [vmem:[#allocation3 + $0x130] ss:$36 sps:$4 sm:$0xff]   ;;  %v1519_v57 = vrot.slane %v1432_v58, 5  ;;  %v1803_v60 = vshrl.u32 %v1626_v31, 16  ;;  %3339 = vmatprep.mubr.bf16.mxu1 %v4641_v50 }
 0x1bd   :  { %1563 = vst [vmem:[#allocation3 + $0x17c] sm:$0xf] %v1516_v52  ;;  %1403 = vst [vmem:[#allocation3 + $0x178] sm:$0xf] %v1306_v55  ;;  %v1806_v62 = vshll.u32 %v1626_v31, 16  ;;  %v1812_v63 = vshll.u32 %v1627_v48, 16  ;;  %3340 = vmatmul.mubr.bf16.gmra.mxu1 %v4646_v59  ;;  %v1320_v5 = vsel %vm4919_vm5, %v1315_v56, %v1319_v51 }
 0x1be   :  { %v1817_v0 = vshrl.u32 %v1628_v42, 16  ;;  %v1820_v1 = vshll.u32 %v1628_v42, 16  ;;  %v1146_v2 = vld [vmem:[#allocation2 + $0x7c] sm:$0x1]  ;;  %v1520_v6 = vsel %vm4871_vm2, %v3890_v47, %v1519_v57  ;;  %v1805_v4 = vrot.slane %v1803_v60, 4 }
 0x1bf   :  { %v1826_v7 = vshll.u32 %v1629_v21, 16  ;;  %v1584_v8 = vld [vmem:[#allocation2 + $0x90] sm:$0xf]  ;;  %v1585_v9 = vld [vmem:[#allocation2 + $0x98] sm:$0xf]  ;;  %v1808_v39 = vrot.slane %v1806_v62, 5 }
 0x1c0   :  { %1404 = vst [vmem:[#allocation3 + $0x19c] sm:$0xf] %v1320_v5  ;;  %1564 = vst [vmem:[#allocation3 + $0x1a0] sm:$0xf] %v1520_v6  ;;  %v1814_v10 = vrot.slane %v1812_v63, 5  ;;  %v1819_v11 = vrot.slane %v1817_v0, 4 }
 0x1c1   :  { %v1822_v12 = vrot.slane %v1820_v1, 5  ;;  %v1148_v13 = vld [vmem:[#allocation2 + $0x84] sm:$0x1]  ;;  %v1433_v14 = vld [vmem:[#allocation2 + $0x78] sm:$0xe]  ;;  %v1828_v15 = vrot.slane %v1826_v7, 5  ;;  %v1809_v24 = vor.u32 %v1808_v39, %v1805_v4 }
 0x1c2   :  { %1600 = vst [vmem:[#allocation3 + $0x210] sm:$0xf] %v1584_v8  ;;  %1601 = vst [vmem:[#allocation3 + $0x234] sm:$0xf] %v1585_v9  ;;  %v1322_v16 = vshrl.u32 %v1145_v49, 16  ;;  %v1325_v19 = vshll.u32 %v1145_v49, 16 }
 0x1c3   :  { %v1331_v20 = vshll.u32 %v1146_v2, 16  ;;  %v1434_v22 = vld [vmem:[#allocation2 + $0x7c] sm:$0x1]  ;;  %v2103_v23 = vld [vmem:[#allocation3 + $0x180] sm:$0xff]  ;;  %v1823_v25 = vor.u32 %v1822_v12, %v1819_v11  ;;  %v1336_v26 = vshrl.u32 %v1147_v45, 16  ;;  %v1339_v27 = vshll.u32 %v1147_v45, 16 }
 0x1c4   :  { %v1435_v28 = vld [vmem:[#allocation2 + $0x80] sm:$0xe]  ;;  %v2108_v17 = vld [vmem:[#allocation3 + $0x1a4] sm:$0xff]  ;;  %v1324_v37 = vrot.slane %v1322_v16, 4  ;;  %v1327_v41 = vrot.slane %v1325_v19, 5  ;;  %v1810_v31 = vrot.slane %v1809_v24, 4 }
 0x1c5   :  { %v4643_v29 = vld [vmem:[#allocation3 + $0x184] ss:$36 sps:$4 sm:$0xff]   ;;  %v1333_v44 = vrot.slane %v1331_v20, 5  ;;  %v1630_v54 = vld [vmem:[#allocation2 + $0x90] sm:$0xf]  ;;  %v3963_v30 = vcombine.low %v2103_v23, %v2108_v17  ;;  %v1824_v32 = vrot.slane %v1823_v25, 4 }
 0x1c6   :  { %v1338_v33 = vrot.slane %v1336_v26, 4  ;;  %3444 = vmatprep.mubr.bf16.mxu0 %v4643_v29  ;;  %v1328_v34 = vor.u32 %v1327_v41, %v1324_v37  ;;  %v1341_v35 = vrot.slane %v1339_v27, 5  ;;  %v1345_v36 = vshll.u32 %v1148_v13, 16  ;;  %v1436_v38 = vld [vmem:[#allocation2 + $0x84] sm:$0x1] }
 0x1c7   :  { %v3891_v58 = vrot.slane %v1433_v14, 9  ;;  %3445 = vmatmul.mubr.bf16.gmra.mxu0 %v3963_v30  ;;  %v1815_v61 = vsel %vm4919_vm5, %v1810_v31, %v1814_v10  ;;  %v1829_v40 = vsel %vm4919_vm5, %v1824_v32, %v1828_v15  ;;  %v1523_v42 = vrot.slane %v1434_v22, 5  ;;  %v1631_v3 = vld [vmem:[#allocation2 + $0x94] sm:$0x1]  ;;  %v1632_v46 = vld [vmem:[#allocation2 + $0x98] sm:$0xf] }
 0x1c8   :  { %v3892_v43 = vrot.slane %v1435_v28, 9  ;;  %v1149_v47 = vld [vmem:[#allocation2 + $0x88] sm:$0xf]  ;;  %v4647_v48 = vld [vmem:[#allocation3 + $0x17c] ss:$36 sps:$4 sm:$0xff]   ;;  %v1329_v49 = vrot.slane %v1328_v34, 4  ;;  %v1342_v50 = vor.u32 %v1341_v35, %v1338_v33 }
 0x1c9   :  { %1886 = vst [vmem:[#allocation3 + $0x1cc] sm:$0xf] %v1815_v61  ;;  %1887 = vst [vmem:[#allocation3 + $0x1f0] sm:$0xf] %v1829_v40  ;;  %v1633_v51 = vld [vmem:[#allocation2 + $0x9c] sm:$0x1]  ;;  %v1524_v45 = vsel %vm4871_vm2, %v3891_v58, %v1523_v42  ;;  %3347 = vmatprep.mubr.bf16.mxu1 %v4647_v48 }
 0x1ca   :  { %v4652_v52 = vld [vmem:[#allocation3 + $0x178] ss:$36 sps:$4 sm:$0xff]   ;;  %v1347_v21 = vrot.slane %v1345_v36, 5  ;;  %v1527_v59 = vrot.slane %v1436_v38, 5  ;;  %v1831_v55 = vshrl.u32 %v1630_v54, 16  ;;  %v1334_v57 = vsel %vm4919_vm5, %v1329_v49, %v1333_v44 }
 0x1cb   :  { %v1151_v56 = vld [vmem:[#allocation2 + $0x90] sm:$0xf]  ;;  %v1343_v60 = vrot.slane %v1342_v50, 4  ;;  %1565 = vst [vmem:[#allocation3 + $0x1c4] sm:$0xf] %v1524_v45  ;;  %v1834_v62 = vshll.u32 %v1630_v54, 16  ;;  %3348 = vmatmul.mubr.bf16.gmra.mxu1 %v4652_v52 }
 0x1cc   :  { %v1840_v63 = vshll.u32 %v1631_v3, 16  ;;  %1405 = vst [vmem:[#allocation3 + $0x1c0] sm:$0xf] %v1334_v57  ;;  %v1528_v0 = vsel %vm4871_vm2, %v3892_v43, %v1527_v59  ;;  %v1833_v1 = vrot.slane %v1831_v55, 4  ;;  %v1845_v2 = vshrl.u32 %v1632_v46, 16 }
 0x1cd   :  { %v1848_v5 = vshll.u32 %v1632_v46, 16  ;;  %v1150_v6 = vld [vmem:[#allocation2 + $0x8c] sm:$0x1]  ;;  %v1348_v4 = vsel %vm4919_vm5, %v1343_v60, %v1347_v21  ;;  %1566 = vst [vmem:[#allocation3 + $0x1e8] sm:$0xf] %v1528_v0  ;;  %v1836_v7 = vrot.slane %v1834_v62, 5 }
 0x1ce   :  { %v1842_v8 = vrot.slane %v1840_v63, 5  ;;  %v1854_v9 = vshll.u32 %v1633_v51, 16  ;;  %v1152_v39 = vld [vmem:[#allocation2 + $0x94] sm:$0x1]  ;;  %1406 = vst [vmem:[#allocation3 + $0x1e4] sm:$0xf] %v1348_v4 }
 0x1cf   :  { %v1847_v10 = vrot.slane %v1845_v2, 4  ;;  %v1850_v11 = vrot.slane %v1848_v5, 5  ;;  %v1350_v12 = vshrl.u32 %v1149_v47, 16  ;;  %v1353_v13 = vshll.u32 %v1149_v47, 16  ;;  %v1437_v14 = vld [vmem:[#allocation2 + $0x88] sm:$0xe] }
 0x1d0   :  { %v1438_v15 = vld [vmem:[#allocation2 + $0x8c] sm:$0x1]  ;;  %v1837_v16 = vor.u32 %v1836_v7, %v1833_v1  ;;  %v1856_v19 = vrot.slane %v1854_v9, 5  ;;  %v1359_v20 = vshll.u32 %v1150_v6, 16  ;;  %v1364_v22 = vshrl.u32 %v1151_v56, 16 }
 0x1d1   :  { %v1439_v23 = vld [vmem:[#allocation2 + $0x90] sm:$0xe]  ;;  %v2113_v24 = vld [vmem:[#allocation3 + $0x1c8] sm:$0xff]  ;;  %v1851_v27 = vor.u32 %v1850_v11, %v1847_v10  ;;  %v1352_v28 = vrot.slane %v1350_v12, 4  ;;  %v1355_v17 = vrot.slane %v1353_v13, 5  ;;  %v1367_v34 = vshll.u32 %v1151_v56, 16 }
 0x1d2   :  { %v2118_v25 = vld [vmem:[#allocation3 + $0x1ec] sm:$0xff]  ;;  %v1440_v29 = vld [vmem:[#allocation2 + $0x94] sm:$0x1]  ;;  %v1838_v41 = vrot.slane %v1837_v16, 4  ;;  %v1361_v44 = vrot.slane %v1359_v20, 5  ;;  %v1366_v54 = vrot.slane %v1364_v22, 4 }
 0x1d3   :  { %v4649_v26 = vld [vmem:[#allocation3 + $0x1cc] ss:$36 sps:$4 sm:$0xff]   ;;  %v3972_v37 = vcombine.low %v2113_v24, %v2118_v25  ;;  %v1891_v31 = vld [vmem:[#allocation2 + $0x14] sm:$0x1]  ;;  %v1852_v32 = vrot.slane %v1851_v27, 4  ;;  %v1356_v33 = vor.u32 %v1355_v17, %v1352_v28  ;;  %v1373_v35 = vshll.u32 %v1152_v39, 16 }
 0x1d4   :  { %v1890_v30 = vld [vmem:[#allocation2 + $0x10] sm:$0xe]  ;;  %3452 = vmatprep.mubr.bf16.mxu0 %v4649_v26  ;;  %v1892_v36 = vld [vmem:[#allocation2 + $0x18] sm:$0xe]  ;;  %v1843_v38 = vsel %vm4919_vm5, %v1838_v41, %v1842_v8  ;;  %v3893_v58 = vrot.slane %v1437_v14, 9  ;;  %v1531_v61 = vrot.slane %v1438_v15, 5 }
 0x1d5   :  { %3453 = vmatmul.mubr.bf16.gmra.mxu0 %v3972_v37  ;;  %v3894_v40 = vrot.slane %v1439_v23, 9  ;;  %v1893_v42 = vld [vmem:[#allocation2 + $0x1c] sm:$0x1]  ;;  %v1857_v43 = vsel %vm4919_vm5, %v1852_v32, %v1856_v19  ;;  %1888 = vst [vmem:[#allocation3 + $0x214] sm:$0xf] %v1843_v38  ;;  %v1357_v3 = vrot.slane %v1356_v33, 4 }
 0x1d6   :  { %v1369_v46 = vrot.slane %v1367_v34, 5  ;;  %v1375_v47 = vrot.slane %v1373_v35, 5  ;;  %v1898_v48 = vld [vmem:[#allocation2 + $0x30] sm:$0xe]  ;;  %v4653_v49 = vld [vmem:[#allocation3 + $0x1c4] ss:$36 sps:$4 sm:$0xff]   ;;  %v1532_v51 = vsel %vm4871_vm2, %v3893_v58, %v1531_v61 }
 0x1d7   :  { %1889 = vst [vmem:[#allocation3 + $0x238] sm:$0xf] %v1857_v43  ;;  %v4658_v50 = vld [vmem:[#allocation3 + $0x1c0] ss:$36 sps:$4 sm:$0xff]   ;;  %v1535_v52 = vrot.slane %v1440_v29, 5  ;;  %v1362_v21 = vsel %vm4919_vm5, %v1357_v3, %v1361_v44  ;;  %v3895_v59 = vrot.slane %v1890_v30, 9  ;;  %3355 = vmatprep.mubr.bf16.mxu1 %v4653_v49 }
 0x1d8   :  { %v1370_v45 = vor.u32 %v1369_v46, %v1366_v54  ;;  %1567 = vst [vmem:[#allocation3 + $0x20c] sm:$0xf] %v1532_v51  ;;  %v1956_v55 = vrot.slane %v1891_v31, 5  ;;  %v1899_v56 = vld [vmem:[#allocation2 + $0x34] sm:$0x1]  ;;  %v3896_v62 = vrot.slane %v1892_v36, 9  ;;  %3356 = vmatmul.mubr.bf16.gmra.mxu1 %v4658_v50 }
 0x1d9   :  { %v1900_v57 = vld [vmem:[#allocation2 + $0x38] sm:$0xe]  ;;  %1407 = vst [vmem:[#allocation3 + $0x208] sm:$0xf] %v1362_v21  ;;  %v1536_v60 = vsel %vm4871_vm2, %v3894_v40, %v1535_v52  ;;  %v1960_v63 = vrot.slane %v1893_v42, 5  ;;  %v3899_v1 = vrot.slane %v1898_v48, 9 }
 0x1da   :  { %v1901_v0 = vld [vmem:[#allocation2 + $0x3c] sm:$0x1]  ;;  %v1371_v2 = vrot.slane %v1370_v45, 4  ;;  %1568 = vst [vmem:[#allocation3 + $0x230] sm:$0xf] %v1536_v60  ;;  %v1957_v5 = vsel %vm4871_vm2, %v3895_v59, %v1956_v55  ;;  %v1972_v6 = vrot.slane %v1899_v56, 5 }
 0x1db   :  { %v3900_v4 = vrot.slane %v1900_v57, 9  ;;  %v1902_v7 = vld [vmem:[#allocation2 + $0x40] sm:$0xe]  ;;  %v1961_v8 = vsel %vm4871_vm2, %v3896_v62, %v1960_v63  ;;  %2034 = vst [vmem:[#allocation3 + $0x20] sm:$0xf] %v1957_v5  ;;  %v1976_v9 = vrot.slane %v1901_v0, 5 }
 0x1dc   :  { %v1903_v39 = vld [vmem:[#allocation2 + $0x44] sm:$0x1]  ;;  %v1904_v10 = vld [vmem:[#allocation2 + $0x48] sm:$0xe]  ;;  %v3901_v11 = vrot.slane %v1902_v7, 9  ;;  %v1376_v12 = vsel %vm4919_vm5, %v1371_v2, %v1375_v47  ;;  %v1973_v13 = vsel %vm4871_vm2, %v3899_v1, %v1972_v6  ;;  %v2123_v20 = vld [vmem:[#allocation3 + $0x210] sm:$0xff] }
 0x1dd   :  { %2035 = vst [vmem:[#allocation3 + $0x44] sm:$0xf] %v1961_v8  ;;  %v1905_v14 = vld [vmem:[#allocation2 + $0x4c] sm:$0x1]  ;;  %v1980_v15 = vrot.slane %v1903_v39, 5  ;;  %v3902_v16 = vrot.slane %v1904_v10, 9  ;;  %v1977_v22 = vsel %vm4871_vm2, %v3900_v4, %v1976_v9 }
 0x1de   :  { %v1906_v19 = vld [vmem:[#allocation2 + $0x60] sm:$0xe]  ;;  %1408 = vst [vmem:[#allocation3 + $0x22c] sm:$0xf] %v1376_v12  ;;  %2038 = vst [vmem:[#allocation3 + $0xb0] sm:$0xf] %v1973_v13 }
 0x1df   :  { %v1984_v23 = vrot.slane %v1905_v14, 5  ;;  %v1907_v24 = vld [vmem:[#allocation2 + $0x64] sm:$0x1]  ;;  %v1908_v25 = vld [vmem:[#allocation2 + $0x68] sm:$0xe]  ;;  %v2128_v26 = vld [vmem:[#allocation3 + $0x234] sm:$0xff]  ;;  %v1981_v27 = vsel %vm4871_vm2, %v3901_v11, %v1980_v15 }
 0x1e0   :  { %v4655_v18 = vld [vmem:[#allocation3 + $0x214] ss:$36 sps:$4 sm:$0xff]   ;;  %2039 = vst [vmem:[#allocation3 + $0xd4] sm:$0xf] %v1977_v22  ;;  %v1909_v28 = vld [vmem:[#allocation2 + $0x6c] sm:$0x1]  ;;  %v3981_v29 = vcombine.low %v2123_v20, %v2128_v26 }
 0x1e1   :  { %v3903_v17 = vrot.slane %v1906_v19, 9  ;;  %v1985_v37 = vsel %vm4871_vm2, %v3902_v16, %v1984_v23  ;;  %2040 = vst [vmem:[#allocation3 + $0xf8] sm:$0xf] %v1981_v27  ;;  %v1988_v41 = vrot.slane %v1907_v24, 5  ;;  %v3904_v44 = vrot.slane %v1908_v25, 9  ;;  %3460 = vmatprep.mubr.bf16.mxu0 %v4655_v18  ;;  %v4671_v11 = vld [vmem:[%s5701_s5 + $0x38] sm:$0xff]  }
 0x1e2   :  { %v1910_v54 = vld [vmem:[#allocation2 + $0x70] sm:$0xe]  ;;  %v1911_v30 = vld [vmem:[#allocation2 + $0x74] sm:$0x1]  ;;  %2041 = vst [vmem:[#allocation3 + $0x11c] sm:$0xf] %v1985_v37  ;;  %3461 = vmatmul.mubr.bf16.gmra.mxu0 %v3981_v29  ;;  %4449 = vmatprep.subr.bf16.mxu0 %v4671_v11  ;;  %v4177_v13 = vpop.f32.mrf.mxu0 }
 0x1e3   :  { %v1992_v31 = vrot.slane %v1909_v28, 5  ;;  %v1912_v32 = vld [vmem:[#allocation2 + $0x78] sm:$0xe]  ;;  %v1913_v33 = vld [vmem:[#allocation2 + $0x7c] sm:$0x1]  ;;  %v1989_v34 = vsel %vm4871_vm2, %v3903_v17, %v1988_v41  ;;  %v3905_v35 = vrot.slane %v1910_v54, 9  ;;  %4481 = vmatprep.subr.bf16.mxu1 %v4671_v11  ;;  %4450 = vmatpush3.bf16.msra.mxu0 %v4671_v11 }
 0x1e4   :  { %v1996_v36 = vrot.slane %v1911_v30, 5  ;;  %v3906_v38 = vrot.slane %v1912_v32, 9  ;;  %v1914_v58 = vld [vmem:[#allocation2 + $0x80] sm:$0xe]  ;;  %2042 = vst [vmem:[#allocation3 + $0x140] sm:$0xf] %v1989_v34  ;;  %v4178_v14 = vpop.f32.mrf.mxu0 }
 0x1e5   :  { %v1993_v61 = vsel %vm4871_vm2, %v3904_v44, %v1992_v31  ;;  %v2000_v40 = vrot.slane %v1913_v33, 5  ;;  %v1915_v42 = vld [vmem:[#allocation2 + $0x84] sm:$0x1]  ;;  %v3907_v43 = vrot.slane %v1914_v58, 9  ;;  %v1916_v46 = vld [vmem:[#allocation2 + $0x88] sm:$0xe]  ;;  %v4179_v15 = vadd.f32 %v4178_v14, %v4177_v13 }
 0x1e6   :  { %2043 = vst [vmem:[#allocation3 + $0x164] sm:$0xf] %v1993_v61  ;;  %v1997_v3 = vsel %vm4871_vm2, %v3905_v35, %v1996_v36  ;;  %v4659_v47 = vld [vmem:[#allocation3 + $0x20c] ss:$36 sps:$4 sm:$0xff]   ;;  %v4663_v48 = vld [vmem:[#allocation3 + $0x20] ss:$36 sps:$4 sm:$0xff]   ;;  %v4180_v16 = vpop.f32.mrf.mxu0 }
 0x1e7   :  { %v2001_v49 = vsel %vm4871_vm2, %v3906_v38, %v2000_v40  ;;  %2044 = vst [vmem:[#allocation3 + $0x188] sm:$0xf] %v1997_v3  ;;  %v2004_v50 = vrot.slane %v1915_v42, 5  ;;  %v4662_v51 = vld [vmem:[#allocation3 + $0x208] ss:$36 sps:$4 sm:$0xff]   ;;  %3363 = vmatprep.mubr.bf16.mxu1 %v4659_v47  ;;  %v3908_v45 = vrot.slane %v1916_v46, 9 }
 0x1e8   :  { %2045 = vst [vmem:[#allocation3 + $0x1ac] sm:$0xf] %v2001_v49  ;;  %v1917_v52 = vld [vmem:[#allocation2 + $0x8c] sm:$0x1]  ;;  %3364 = vmatmul.mubr.bf16.gmra.mxu1 %v4662_v51  ;;  %v1918_v55 = vld [vmem:[#allocation2 + $0x90] sm:$0xe]  ;;  %v4181_v19 = vpop.f32.mrf.mxu0 }
 0x1e9   :  { %v2005_v21 = vsel %vm4871_vm2, %v3907_v43, %v2004_v50  ;;  %v2008_v59 = vrot.slane %v1917_v52, 5  ;;  %4433 = vmatprep.mubr.bf16.mxu1 %v4663_v48  ;;  %v1919_v56 = vld [vmem:[#allocation2 + $0x94] sm:$0x1]  ;;  %v1920_v57 = vld [vmem:[#allocation2 + $0x98] sm:$0xe]  ;;  %v3909_v63 = vrot.slane %v1918_v55, 9  ;;  %v4182_v20 = vadd.f32 %v4181_v19, %v4180_v16 }
 0x1ea   :  { %2046 = vst [vmem:[#allocation3 + $0x1d0] sm:$0xf] %v2005_v21  ;;  %v1921_v62 = vld [vmem:[#allocation2 + $0x9c] sm:$0x1]  ;;  %v2012_v0 = vrot.slane %v1919_v56, 5  ;;  %v3910_v1 = vrot.slane %v1920_v57, 9  ;;  %v4183_v22 = vpop.f32.mrf.mxu0 }
 0x1eb   :  { %v2009_v60 = vsel %vm4871_vm2, %v3908_v45, %v2008_v59  ;;  %v2016_v2 = vrot.slane %v1921_v62, 5  ;;  %v4664_v4 = vld [vmem:[#allocation3 + $0x68] ss:$36 sps:$4 sm:$0xff]   ;;  %v4665_v7 = vld [vmem:[#allocation3 + $0xb0] ss:$36 sps:$4 sm:$0xff]   ;;  %v4674_v61 = vld [vmem:[%s5701_s5 + $0x20] sm:$0xff]  }
 0x1ec   :  { %2047 = vst [vmem:[#allocation3 + $0x1f4] sm:$0xf] %v2009_v60  ;;  %v2013_v5 = vsel %vm4871_vm2, %v3909_v63, %v2012_v0  ;;  %v4666_v8 = vld [vmem:[#allocation3 + $0xf8] ss:$36 sps:$4 sm:$0xff]   ;;  %v4672_v12 = vld [vmem:[%s5701_s5 + $0x30] sm:$0xff]   ;;  %v4184_v23 = vpop.f32.mrf.mxu0  ;;  %v4673_v24 = vld [vmem:[%s5701_s5 + $0x28] sm:$0xff]  }
 0x1ed   :  { %v2017_v6 = vsel %vm4871_vm2, %v3910_v1, %v2016_v2  ;;  %2048 = vst [vmem:[#allocation3 + $0x218] sm:$0xf] %v2013_v5  ;;  %v4667_v9 = vld [vmem:[#allocation3 + $0x140] ss:$36 sps:$4 sm:$0xff]   ;;  %4451 = vmatprep.subr.bf16.mxu0 %v4672_v12  ;;  %v4185_v25 = vadd.f32 %v4184_v23, %v4183_v22  ;;  %v4675_v57 = vld [vmem:[%s5701_s5 + $0x18] sm:$0xff]  }
 0x1ee   :  { %2049 = vst [vmem:[#allocation3 + $0x23c] sm:$0xf] %v2017_v6  ;;  %4452 = vmatpush3.bf16.msra.mxu0 %v4672_v12  ;;  %v4186_v26 = vpop.f32.mrf.mxu0  ;;  %v5429_v28 = vld [vmem:[%s5700_s4] ss:$0 sm:$0xff] }
 0x1ef   :  { %v4668_v39 = vld [vmem:[#allocation3 + $0x188] ss:$36 sps:$4 sm:$0xff]   ;;  %4453 = vmatprep.subr.bf16.mxu0 %v4673_v24 }
 0x1f0   :  { %4434 = vmatmul.mubr.bf16.vlgmr.msra.gmra.mxu1 %v4664_v4  ;;  %v4187_v27 = vpop.f32.mrf.mxu0 }
 0x1f1   :  { %4437 = vmatprep.mubr.bf16.mxu1 %v4665_v7  ;;  %4489 = vmatpush3.bf16.msra.mxu1 %v4671_v11  ;;  %v4188_v29 = vadd.f32 %v4187_v27, %v4186_v26 }
 0x1f2   :  { %4482 = vmatprep.subr.bf16.mxu1 %v4672_v12  ;;  %4454 = vmatpush3.bf16.msra.mxu0 %v4673_v24 }
 0x1f3   :  { %v4669_v10 = vld [vmem:[#allocation3 + $0x1d0] ss:$36 sps:$4 sm:$0xff]   ;;  %4455 = vmatprep.subr.bf16.mxu0 %v4674_v61 }
 0x1f4   :  { %v4113_v18 = vpop.f32.mrf.mxu1 }
 0x1f5   :  { %v4670_v53 = vld [vmem:[#allocation3 + $0x218] ss:$36 sps:$4 sm:$0xff]   ;;  %4490 = vmatpush3.bf16.msra.mxu1 %v4672_v12  ;;  %v4676_v12 = vld [vmem:[%s5701_s5 + $0x10] sm:$0xff]  }
 0x1f6   :  { %4483 = vmatprep.subr.bf16.mxu1 %v4673_v24  ;;  %v4114_v17 = vpop.f32.mrf.mxu1  ;;  %4456 = vmatpush3.bf16.msra.mxu0 %v4674_v61 }
 0x1f7   :  { %v4115_v37 = vadd.f32 %v4114_v17, %v4113_v18  ;;  %4457 = vmatprep.subr.bf16.mxu0 %v4675_v57  ;;  %v4677_v17 = vld [vmem:[%s5701_s5 + $0x8] sm:$0xff]  }
 0x1f8   :  { %4438 = vmatmul.mubr.bf16.gmra.mxu1 %v4666_v8  ;;  %v4116_v44 = vpop.f32.mrf.mxu1 }
 0x1f9   :  { %4441 = vmatprep.mubr.bf16.mxu1 %v4667_v9  ;;  %4491 = vmatpush3.bf16.msra.mxu1 %v4673_v24  ;;  %v3116_v54 = vadd.f32 %v4115_v37, %v5429_v28 }
 0x1fa   :  { %v4189_v41 = vpop.f32.mrf.mxu0  ;;  %v4117_v31 = vpop.f32.mrf.mxu1  ;;  %4484 = vmatprep.subr.bf16.mxu1 %v4674_v61  ;;  %4458 = vmatpush3.bf16.msra.mxu0 %v4675_v57 }
 0x1fb   :  { %v4118_v33 = vadd.f32 %v4117_v31, %v4116_v44  ;;  %v5432_v35 = vadd.f32 %v4179_v15, %v3116_v54  ;;  %4459 = vmatprep.subr.bf16.mxu0 %v4676_v12  ;;  %v4678_v44 = vld [vmem:[%s5701_s5] sm:$0xff]  }
 0x1fc   :  { %v4190_v30 = vpop.f32.mrf.mxu0 }
 0x1fd   :  { %v4191_v32 = vadd.f32 %v4190_v30, %v4189_v41  ;;  %v3119_v38 = vadd.f32 %v4118_v33, %v5429_v28  ;;  %4492 = vmatpush3.bf16.msra.mxu1 %v4674_v61 }
 0x1fe   :  { %v4192_v34 = vpop.f32.mrf.mxu0  ;;  %v4119_v36 = vpop.f32.mrf.mxu1  ;;  %4485 = vmatprep.subr.bf16.mxu1 %v4675_v57  ;;  %4460 = vmatpush3.bf16.msra.mxu0 %v4676_v12 }
 0x1ff   :  { %v5438_v46 = vadd.f32 %v4182_v20, %v3119_v38  ;;  %4461 = vmatprep.subr.bf16.mxu0 %v4677_v17 }
 0x200   :  { %4442 = vmatmul.mubr.bf16.gmra.mxu1 %v4668_v39  ;;  %v4193_v58 = vpop.f32.mrf.mxu0  ;;  %v4120_v40 = vpop.f32.mrf.mxu1 }
 0x201   :  { %4445 = vmatprep.mubr.bf16.mxu1 %v4669_v10  ;;  %v4194_v42 = vadd.f32 %v4193_v58, %v4192_v34  ;;  %v4121_v43 = vadd.f32 %v4120_v40, %v4119_v36  ;;  %4493 = vmatpush3.bf16.msra.mxu1 %v4675_v57 }
 0x202   :  { %v4122_v47 = vpop.f32.mrf.mxu1  ;;  %4486 = vmatprep.subr.bf16.mxu1 %v4676_v12  ;;  %4462 = vmatpush3.bf16.msra.mxu0 %v4677_v17 }
 0x203   :  { %v3124_v48 = vadd.f32 %v4121_v43, %v5429_v28  ;;  %4463 = vmatprep.subr.bf16.mxu0 %v4678_v44 }
 0x204   :  { %v4195_v3 = vpop.f32.mrf.mxu0  ;;  %v4123_v50 = vpop.f32.mrf.mxu1 }
 0x205   :  { %v4124_v52 = vadd.f32 %v4123_v50, %v4122_v47  ;;  %v5441_v45 = vadd.f32 %v4185_v25, %v3124_v48  ;;  %4494 = vmatpush3.bf16.msra.mxu1 %v4676_v12 }
 0x206   :  { %v4196_v49 = vpop.f32.mrf.mxu0  ;;  %4487 = vmatprep.subr.bf16.mxu1 %v4677_v17  ;;  %4464 = vmatpush3.bf16.msra.mxu0 %v4678_v44 }
 0x207   :  { %v4197_v51 = vadd.f32 %v4196_v49, %v4195_v3  ;;  %v3127_v55 = vadd.f32 %v4124_v52, %v5429_v28 }
 0x208   :  { %4446 = vmatmul.mubr.bf16.gmra.mxu1 %v4670_v53  ;;  %v4198_v21 = vpop.f32.mrf.mxu0  ;;  %v4125_v59 = vpop.f32.mrf.mxu1 }
 0x209   :  { %v5447_v1 = vadd.f32 %v4188_v29, %v3127_v55  ;;  %4495 = vmatpush3.bf16.msra.mxu1 %v4677_v17 }
 0x20a   :  { %v4199_v56 = vpop.f32.mrf.mxu0  ;;  %v4126_v60 = vpop.f32.mrf.mxu1  ;;  %4488 = vmatprep.subr.bf16.mxu1 %v4678_v44 }
 0x20b   :  { %v4200_v62 = vadd.f32 %v4199_v56, %v4198_v21  ;;  %v4127_v63 = vadd.f32 %v4126_v60, %v4125_v59 }
 0x20c   :  { %v4128_v2 = vpop.f32.mrf.mxu1 }
 0x20d   :  { %v3132_v5 = vadd.f32 %v4127_v63, %v5429_v28  ;;  %4496 = vmatpush3.bf16.msra.mxu1 %v4678_v44 }
 0x20e   :  { %v4201_v0 = vpop.f32.mrf.mxu0  ;;  %v4129_v4 = vpop.f32.mrf.mxu1 }
 0x20f   :  { %v4130_v8 = vadd.f32 %v4129_v4, %v4128_v2  ;;  %v5450_v39 = vadd.f32 %v4191_v32, %v3132_v5 }
 0x210   :  { %v4202_v6 = vpop.f32.mrf.mxu0 }
 0x211   :  { %v4203_v7 = vadd.f32 %v4202_v6, %v4201_v0  ;;  %v3135_v11 = vadd.f32 %v4130_v8, %v5429_v28 }
 0x212   :  { %v4204_v9 = vpop.f32.mrf.mxu0 }
 0x213   :  { %v5456_v19 = vadd.f32 %v4194_v42, %v3135_v11 }
 0x214   :  { %v4205_v53 = vpop.f32.mrf.mxu0 }
 0x215   :  { %v4206_v14 = vadd.f32 %v4205_v53, %v4204_v9 }
 0x216   :  { %v4131_v10 = vpop.f32.mrf.mxu1 }
 0x217   :  { %v4207_v16 = vpop.f32.mrf.mxu0 }
 0x218   :  { %v4132_v13 = vpop.f32.mrf.mxu1 }
 0x219   :  { %v4133_v15 = vadd.f32 %v4132_v13, %v4131_v10  ;;  %v4208_v23 = vpop.f32.mrf.mxu0 }
 0x21a   :  { %v4134_v20 = vpop.f32.mrf.mxu1  ;;  %v4209_v25 = vadd.f32 %v4208_v23, %v4207_v16 }
 0x21b   :  { %v3140_v22 = vadd.f32 %v4133_v15, %v5429_v28  ;;  %v4210_v18 = vpop.f32.mrf.mxu0 }
 0x21c   :  { %v4135_v24 = vpop.f32.mrf.mxu1 }
 0x21d   :  { %v4136_v26 = vadd.f32 %v4135_v24, %v4134_v20  ;;  %v5459_v27 = vadd.f32 %v4197_v51, %v3140_v22  ;;  %v4211_v41 = vpop.f32.mrf.mxu0 }
 0x21e   :  { %v4212_v30 = vadd.f32 %v4211_v41, %v4210_v18 }
 0x21f   :  { %v4137_v29 = vpop.f32.mrf.mxu1  ;;  %v3143_v37 = vadd.f32 %v4136_v26, %v5429_v28 }
 0x221   :  { %v4138_v54 = vpop.f32.mrf.mxu1  ;;  %v5468_v33 = vadd.f32 %v4200_v62, %v3143_v37 }
 0x222   :  { %v4139_v31 = vadd.f32 %v4138_v54, %v4137_v29 }
 0x223   :  { %v4213_v32 = vpop.f32.mrf.mxu0  ;;  %v4140_v34 = vpop.f32.mrf.mxu1 }
 0x224   :  { %v3148_v36 = vadd.f32 %v4139_v31, %v5429_v28 }
 0x225   :  { %v4214_v38 = vpop.f32.mrf.mxu0  ;;  %v4141_v58 = vpop.f32.mrf.mxu1 }
 0x226   :  { %v4215_v61 = vadd.f32 %v4214_v38, %v4213_v32  ;;  %v4142_v40 = vadd.f32 %v4141_v58, %v4140_v34  ;;  %v5471_v43 = vadd.f32 %v4203_v7, %v3148_v36 }
 0x227   :  { %v4216_v42 = vpop.f32.mrf.mxu0 }
 0x228   :  { %v3151_v47 = vadd.f32 %v4142_v40, %v5429_v28 }
 0x229   :  { %v4217_v48 = vpop.f32.mrf.mxu0 }
 0x22a   :  { %v4218_v50 = vadd.f32 %v4217_v48, %v4216_v42  ;;  %v5474_v21 = vadd.f32 %v4206_v14, %v3151_v47 }
 0x22b   :  { %v4143_v3 = vpop.f32.mrf.mxu1  ;;  %v4219_v52 = vpop.f32.mrf.mxu0 }
 0x22c   :  { %5712 = vst [vmem:[#allocation7_spill] sm:$0xff] %v5474_v21 }
 0x22d   :  { %v4144_v49 = vpop.f32.mrf.mxu1  ;;  %v4220_v56 = vpop.f32.mrf.mxu0 }
 0x22e   :  { %v4145_v51 = vadd.f32 %v4144_v49, %v4143_v3  ;;  %v4221_v60 = vadd.f32 %v4220_v56, %v4219_v52 }
 0x22f   :  { %v4146_v59 = vpop.f32.mrf.mxu1  ;;  %v5477_v63 = vpop.f32.mrf.mxu0 }
 0x230   :  { %v3156_v55 = vadd.f32 %v4145_v51, %v5429_v28  ;;  %5713 = vst [vmem:[#allocation8_spill] sm:$0xff] %v5477_v63 }
 0x231   :  { %v4147_v57 = vpop.f32.mrf.mxu1  ;;  %v5482_v4 = vpop.f32.mrf.mxu0 }
 0x232   :  { %v4148_v62 = vadd.f32 %v4147_v57, %v4146_v59  ;;  %v5479_v0 = vadd.f32 %v4209_v25, %v3156_v55  ;;  %5714 = vst [vmem:[#allocation9_spill] sm:$0xff] %v5482_v4 }
 0x234   :  { %v3159_v5 = vadd.f32 %v4148_v62, %v5429_v28 }
 0x235   :  { %v4149_v2 = vpop.f32.mrf.mxu1 }
 0x236   :  { %v5484_v8 = vadd.f32 %v4212_v30, %v3159_v5 }
 0x237   :  { %v4150_v6 = vpop.f32.mrf.mxu1 }
 0x238   :  { %v4151_v7 = vadd.f32 %v4150_v6, %v4149_v2  ;;  %5715 = vst [vmem:[#allocation10_spill] sm:$0xff] %v5484_v8 }
 0x239   :  { %v4152_v9 = vpop.f32.mrf.mxu1 }
 0x23a   :  { %v3164_v10 = vadd.f32 %v4151_v7, %v5429_v28 }
 0x23b   :  { %v4153_v11 = vpop.f32.mrf.mxu1 }
 0x23c   :  { %v4154_v12 = vadd.f32 %v4153_v11, %v4152_v9  ;;  %v5489_v13 = vadd.f32 %v4215_v61, %v3164_v10 }
 0x23e   :  { %5716 = vst [vmem:[#allocation11_spill] sm:$0xff] %v5489_v13  ;;  %v3167_v16 = vadd.f32 %v4154_v12, %v5429_v28 }
 0x23f   :  { %v5487_v53 = vpop.f32.mrf.mxu0 }
 0x240   :  { %v4155_v14 = vpop.f32.mrf.mxu1  ;;  %v5496_v24 = vadd.f32 %v4218_v50, %v3167_v16 }
 0x241   :  { %v5491_v15 = vpop.f32.mrf.mxu0 }
 0x242   :  { %v4156_v20 = vpop.f32.mrf.mxu1  ;;  %5717 = vst [vmem:[#allocation12_spill] sm:$0xff] %v5496_v24 }
 0x243   :  { %v4157_v22 = vadd.f32 %v4156_v20, %v4155_v14  ;;  %v5494_v23 = vpop.f32.mrf.mxu0 }
 0x244   :  { %v4158_v25 = vpop.f32.mrf.mxu1 }
 0x245   :  { %v3172_v26 = vadd.f32 %v4157_v22, %v5429_v28  ;;  %v5501_v29 = vpop.f32.mrf.mxu0 }
 0x246   :  { %v4159_v18 = vpop.f32.mrf.mxu1 }
 0x247   :  { %v5499_v17 = vadd.f32 %v4159_v18, %v4158_v25  ;;  %v5503_v37 = vadd.f32 %v4221_v60, %v3172_v26 }
 0x248   :  { %v4241_v41 = vpop.f32.mrf.mxu1 }
 0x249   :  { %5718 = vst [vmem:[#allocation13_spill] sm:$0xff] %v5503_v37 }
 0x24a   :  { %v4242_v44 = vpop.f32.mrf.mxu1 }
 0x24b   :  { %v4243_v54 = vadd.f32 %v4242_v44, %v4241_v41 }
 0x24c   :  { %v4244_v31 = vpop.f32.mrf.mxu1 }
 0x24d   :  { %v5506_v32 = vadd.f32 %v4243_v54, %v5432_v35 }
 0x24e   :  { %v4311_v30 = vpop.f32.mrf.mxu0  ;;  %v4245_v36 = vpop.f32.mrf.mxu1 }
 0x24f   :  { %v4246_v8 = vadd.f32 %v4245_v36, %v4244_v31 }
 0x250   :  { %v4312_v34 = vpop.f32.mrf.mxu0 }
 0x252   :  { %v4314_v38 = vpop.f32.mrf.mxu0 }
 0x254   :  { %v4315_v61 = vpop.f32.mrf.mxu0 }
 0x255   :  { %v4247_v58 = vpop.f32.mrf.mxu1 }
 0x257   :  { %v4248_v40 = vpop.f32.mrf.mxu1 }
 0x259   :  { %v4250_v42 = vpop.f32.mrf.mxu1 }
 0x25b   :  { %v5508_v3 = vpop.f32.mrf.mxu0  ;;  %v4251_v47 = vpop.f32.mrf.mxu1 }
 0x25d   :  { %v5510_v48 = vpop.f32.mrf.mxu0 }
 0x25f   :  { %v5512_v51 = vpop.f32.mrf.mxu0 }
 0x260   :  { %v4253_v49 = vpop.f32.mrf.mxu1 }
 0x261   :  { %v5514_v35 = vpop.f32.mrf.mxu0 }
 0x262   :  { %v4254_v50 = vpop.f32.mrf.mxu1 }
 0x263   :  { %v4255_v36 = vadd.f32 %v4254_v50, %v4253_v49 }
 0x264   :  { %v4256_v52 = vpop.f32.mrf.mxu1 }
 0x266   :  { %v4257_v59 = vpop.f32.mrf.mxu1 }
 0x26a   :  { %v4323_v56 = vpop.f32.mrf.mxu0 }
 0x26c   :  { %v4324_v62 = vpop.f32.mrf.mxu0 }
 0x26e   :  { %v4259_v55 = vpop.f32.mrf.mxu1  ;;  %v5516_v5 = vpop.f32.mrf.mxu0 }
 0x270   :  { %v4260_v57 = vpop.f32.mrf.mxu1  ;;  %v4327_v7 = vpop.f32.mrf.mxu0 }
 0x272   :  { %v4262_v60 = vpop.f32.mrf.mxu1 }
 0x274   :  { %v4263_v2 = vpop.f32.mrf.mxu1 }
 0x279   :  { %v5524_v11 = vpop.f32.mrf.mxu0 }
 0x27a   :  { %5719 = vst [vmem:[#allocation14_spill] sm:$0xff] %v5524_v11 }
 0x27b   :  { %v5528_v14 = vpop.f32.mrf.mxu0 }
 0x27c   :  { %5720 = vst [vmem:[#allocation15_spill] sm:$0xff] %v5528_v14 }
 0x27d   :  { %v5518_v6 = vpop.f32.mrf.mxu1  ;;  %v5530_v20 = vpop.f32.mrf.mxu0 }
 0x27e   :  { %5721 = vst [vmem:[#allocation16_spill] sm:$0xff] %v5530_v20 }
 0x27f   :  { %v5520_v9 = vpop.f32.mrf.mxu1  ;;  %v5534_v26 = vpop.f32.mrf.mxu0 }
 0x280   :  { %5722 = vst [vmem:[#allocation17_spill] sm:$0xff] %v5534_v26  ;;  %v4249_v26 = vadd.f32 %v4248_v40, %v4247_v58  ;;  %v4307_v58 = vadd.f32 %v5491_v15, %v5487_v53 }
 0x281   :  { %v5522_v10 = vpop.f32.mrf.mxu1 }
 0x283   :  { %v5526_v12 = vpop.f32.mrf.mxu1 }
 0x287   :  { %v5538_v41 = vpop.f32.mrf.mxu0 }
 0x289   :  { %v5542_v54 = vpop.f32.mrf.mxu0 }
 0x28b   :  { %v4271_v16 = vpop.f32.mrf.mxu1  ;;  %v5548_v37 = vpop.f32.mrf.mxu0 }
 0x28c   :  { %5726 = vst [vmem:[#allocation21_spill] sm:$0xff] %v5548_v37 }
 0x28d   :  { %v4272_v22 = vpop.f32.mrf.mxu1  ;;  %v5552_v4 = vpop.f32.mrf.mxu0 }
 0x28e   :  { %5728 = vst [vmem:[#allocation23_spill] sm:$0xff] %v5552_v4 }
 0x28f   :  { %v5532_v25 = vpop.f32.mrf.mxu1 }
 0x291   :  { %v5536_v18 = vpop.f32.mrf.mxu1 }
 0x295   :  { %v5556_v21 = vpop.f32.mrf.mxu0 }
 0x296   :  { %5729 = vst [vmem:[#allocation24_spill] sm:$0xff] %v5556_v21  ;;  %v3313_v21 = vadd.f32 %v4246_v8, %v5438_v46 }
 0x298   :  { %v5540_v44 = vpop.f32.mrf.mxu1 }
 0x299   :  { %5723 = vst [vmem:[#allocation18_spill] sm:$0xff] %v5540_v44  ;;  %v4252_v44 = vadd.f32 %v4251_v47, %v4250_v42  ;;  %v4261_v42 = vadd.f32 %v4260_v57, %v4259_v55  ;;  %v4325_v55 = vadd.f32 %v4324_v62, %v4323_v56 }
 0x29a   :  { %v5544_v24 = vpop.f32.mrf.mxu1 }
 0x29b   :  { %5724 = vst [vmem:[#allocation19_spill] sm:$0xff] %v5544_v24  ;;  %v3318_v24 = vadd.f32 %v4249_v26, %v5441_v45  ;;  %v3321_v4 = vadd.f32 %v4252_v44, %v5447_v1  ;;  %v4310_v45 = vadd.f32 %v5501_v29, %v5494_v23  ;;  %v3407_v1 = vadd.f32 %v4307_v58, %v5506_v32 }
 0x29c   :  { %v5546_v13 = vpop.f32.mrf.mxu1  ;;  %v4258_v44 = vadd.f32 %v4257_v59, %v4256_v52  ;;  %v3334_v15 = vadd.f32 %v4261_v42, %v5459_v27  ;;  %v4328_v27 = vadd.f32 %v4327_v7, %v5516_v5  ;;  %v4273_v52 = vadd.f32 %v4272_v22, %v4271_v16 }
 0x29d   :  { %5725 = vst [vmem:[#allocation20_spill] sm:$0xff] %v5546_v13  ;;  %v5563_v13 = vpop.f32.mrf.mxu0  ;;  %v4270_v7 = vadd.f32 %v5526_v12, %v5522_v10 }
 0x29e   :  { %v5550_v20 = vpop.f32.mrf.mxu1  ;;  %5731 = vst [vmem:[#allocation26_spill] sm:$0xff] %v5563_v13  ;;  %v4264_v13 = vadd.f32 %v4263_v2, %v4262_v60  ;;  %v3329_v32 = vadd.f32 %v4258_v44, %v5456_v19  ;;  %v3431_v56 = vadd.f32 %v4325_v55, %v3334_v15  ;;  %v4276_v19 = vadd.f32 %v5536_v18, %v5532_v25  ;;  %v5741_v55 = vld [vmem:[#allocation16_spill] sm:$0xff] }
 0x29f   :  { %5727 = vst [vmem:[#allocation22_spill] sm:$0xff] %v5550_v20  ;;  %v4313_v20 = vadd.f32 %v4312_v34, %v4311_v30  ;;  %v5571_v47 = vpop.f32.mrf.mxu0  ;;  %v3350_v16 = vadd.f32 %v4273_v52, %v5479_v0  ;;  %v4337_v25 = vadd.f32 %v5542_v54, %v5538_v41 }
 0x2a0   :  { %v3337_v29 = vadd.f32 %v4264_v13, %v5468_v33  ;;  %v4322_v33 = vadd.f32 %v5514_v35, %v5512_v51  ;;  %v4267_v13 = vadd.f32 %v5520_v9, %v5518_v6  ;;  %v3175_v6 = vadd.f32 %v5499_v17, %v5429_v28 }
 0x2a1   :  { %v3415_v31 = vadd.f32 %v4313_v20, %v3318_v24  ;;  %v5577_v46 = vpop.f32.mrf.mxu0  ;;  %v3326_v24 = vadd.f32 %v4255_v36, %v5450_v39  ;;  %v3447_v17 = vadd.f32 %v4337_v25, %v3350_v16  ;;  %v5751_v25 = vld [vmem:[#allocation12_spill] sm:$0xff] }
 0x2a2   :  { %v3434_v5 = vadd.f32 %v4328_v27, %v3337_v29  ;;  %v3426_v35 = vadd.f32 %v4322_v33, %v3329_v32  ;;  %v3342_v9 = vadd.f32 %v4267_v13, %v5471_v43 }
 0x2a3   :  { %v4347_v60 = vpop.f32.mrf.mxu0 }
 0x2a5   :  { %v4348_v22 = vpop.f32.mrf.mxu0 }
 0x2a6   :  { %v4349_v16 = vadd.f32 %v4348_v22, %v4347_v60  ;;  %v4346_v60 = vadd.f32 %v5577_v46, %v5571_v47  ;;  %v5627_v47 = vld [vmem:[%s5702_s6] ss:$0 sm:$0xff] }
 0x2a7   :  { %v4350_v44 = vpop.f32.mrf.mxu0 }
 0x2a8   :  { %v5554_v63 = vpop.f32.mrf.mxu1 }
 0x2a9   :  { %v4351_v13 = vpop.f32.mrf.mxu0 }
 0x2aa   :  { %v5558_v14 = vpop.f32.mrf.mxu1 }
 0x2ab   :  { %5730 = vst [vmem:[#allocation25_spill] sm:$0xff] %v5558_v14  ;;  %v4316_v14 = vadd.f32 %v4315_v61, %v4314_v38  ;;  %v3410_v61 = vadd.f32 %v4310_v45, %v3313_v21  ;;  %v5734_v45 = vld [vmem:[#allocation15_spill] sm:$0xff] }
 0x2ac   :  { %v5560_v11 = vpop.f32.mrf.mxu1 }
 0x2ad   :  { %v3418_v34 = vadd.f32 %v4316_v14, %v3321_v4  ;;  %v4319_v4 = vadd.f32 %v5510_v48, %v5508_v3 }
 0x2ae   :  { %v5565_v37 = vpop.f32.mrf.mxu1 }
 0x2af   :  { %v3423_v62 = vadd.f32 %v4319_v4, %v3326_v24  ;;  %v4288_v27 = vadd.f32 %v5565_v37, %v5560_v11 }
 0x2b0   :  { %v4435_v40 = vpop.f32.mrf.mxu1 }
 0x2b1   :  { %v3512_v30 = vadd.f32 %v4435_v40, %v3415_v31  ;;  %v5732_v40 = vld [vmem:[#allocation10_spill] sm:$0xff] }
 0x2b2   :  { %v3503_v26 = vpop.f32.mrf.mxu1  ;;  %v3353_v10 = vadd.f32 %v4276_v19, %v5732_v40  ;;  %v5733_v31 = vld [vmem:[#allocation14_spill] sm:$0xff]  ;;  %v5738_v41 = vld [vmem:[#allocation25_spill] sm:$0xff]  ;;  %v4352_v40 = vadd.f32 %v4351_v13, %v4350_v44 }
 0x2b3   :  { %v3504_v8 = vadd.f32 %v3503_v26, %v3407_v1  ;;  %v3568_v49 = vmax.f32 %v3512_v30, 0.0  ;;  %v4331_v36 = vadd.f32 %v5734_v45, %v5733_v31  ;;  %v5735_v26 = vld [vmem:[#allocation7_spill] sm:$0xff]  ;;  %v5736_v1 = vld [vmem:[#allocation21_spill] sm:$0xff]  ;;  %v4285_v54 = vadd.f32 %v5738_v41, %v5554_v63 }
 0x2b4   :  { %v4436_v53 = vpop.f32.mrf.mxu1  ;;  %v3345_v30 = vadd.f32 %v4270_v7, %v5735_v26 }
 0x2b5   :  { %v3515_v38 = vadd.f32 %v4436_v53, %v3418_v34  ;;  %v3566_v21 = vmax.f32 %v3504_v8, 0.0  ;;  %v5737_v34 = vld [vmem:[#allocation23_spill] sm:$0xff]  ;;  %v3439_v4 = vadd.f32 %v4331_v36, %v3342_v9  ;;  %v5750_v9 = vld [vmem:[#allocation26_spill] sm:$0xff] }
 0x2b6   :  { %v3506_v23 = vpop.f32.mrf.mxu1  ;;  %v4340_v28 = vadd.f32 %v5737_v34, %v5736_v1 }
 0x2b7   :  { %v3569_v50 = vmax.f32 %v3515_v38, 0.0  ;;  %v3507_v57 = vadd.f32 %v3506_v23, %v3410_v61  ;;  %v5739_v38 = vld [vmem:[#allocation8_spill] sm:$0xff]  ;;  %v5740_v61 = vld [vmem:[#allocation9_spill] sm:$0xff] }
 0x2b8   :  { %v4439_v59 = vpop.f32.mrf.mxu1  ;;  %v4224_v24 = vadd.f32 %v5740_v61, %v5739_v38  ;;  %v5742_v23 = vld [vmem:[#allocation17_spill] sm:$0xff]  ;;  %v3450_v63 = vadd.f32 %v4340_v28, %v3353_v10 }
 0x2b9   :  { %v3583_v2 = vpack.c.bf16 %v3569_v50, %v3568_v49  ;;  %v3567_v39 = vmax.f32 %v3507_v57, 0.0  ;;  %v3528_v48 = vadd.f32 %v4439_v59, %v3431_v56  ;;  %v4334_v29 = vadd.f32 %v5742_v23, %v5741_v55  ;;  %v5743_v49 = vld [vmem:[#allocation18_spill] sm:$0xff]  ;;  %v5744_v50 = vld [vmem:[#allocation19_spill] sm:$0xff]  ;;  %v3760_v61 = vld [vmem:[%s5696_s0 + $0x10] sm:$0xff] }
 0x2ba   :  { %v3519_v14 = vpop.f32.mrf.mxu1  ;;  %v4279_v57 = vadd.f32 %v5744_v50, %v5743_v49  ;;  %v3272_v56 = vadd.f32 %v4224_v24, %v3175_v6  ;;  %v3758_v23 = vld [vmem:[%s5696_s0] sm:$0xff] }
 0x2bb   :  { %v3582_v3 = vpack.c.bf16 %v3567_v39, %v3566_v21  ;;  %v3520_v58 = vadd.f32 %v3519_v14, %v3423_v62  ;;  %v3572_v12 = vmax.f32 %v3528_v48, 0.0  ;;  %v5745_v21 = vld [vmem:[#allocation20_spill] sm:$0xff]  ;;  %v5747_v62 = vld [vmem:[#allocation13_spill] sm:$0xff]  ;;  %v3442_v48 = vadd.f32 %v4334_v29, %v3345_v30 }
 0x2bc   :  { %v4440_v20 = vpop.f32.mrf.mxu1  ;;  %v3366_v14 = vadd.f32 %v4285_v54, %v5747_v62  ;;  %v3369_v37 = vadd.f32 %v4288_v27, %v3272_v56  ;;  %v3764_v56 = vld [vmem:[%s5696_s0 + $0x30] sm:$0xff] }
 0x2bd   :  { %v3531_v51 = vadd.f32 %v4440_v20, %v3434_v5  ;;  %4465 = vmatprep.mubr.bf16.mxu0 %v3582_v3  ;;  %v3570_v53 = vmax.f32 %v3520_v58, 0.0  ;;  %v5748_v5 = vld [vmem:[#allocation11_spill] sm:$0xff] }
 0x2be   :  { %v3522_v18 = vpop.f32.mrf.mxu1  ;;  %4466 = vmatmul.mubr.bf16.vlgmr.msra.gmra.mxu0 %v3583_v2  ;;  %v5746_v2 = vld [vmem:[#allocation22_spill] sm:$0xff]  ;;  %v3358_v7 = vadd.f32 %v4279_v57, %v5748_v5  ;;  %v3463_v31 = vadd.f32 %v4349_v16, %v3366_v14  ;;  %v3466_v30 = vadd.f32 %v4352_v40, %v3369_v37 }
 0x2bf   :  { %v3573_v0 = vmax.f32 %v3531_v51, 0.0  ;;  %v3523_v42 = vadd.f32 %v3522_v18, %v3426_v35  ;;  %v4282_v39 = vadd.f32 %v5746_v2, %v5745_v21  ;;  %v5749_v35 = vld [vmem:[#allocation24_spill] sm:$0xff]  ;;  %v3761_v57 = vld [vmem:[%s5696_s0 + $0x18] sm:$0xff] }
 0x2c0   :  { %v4443_v43 = vpop.f32.mrf.mxu1  ;;  %v4343_v6 = vadd.f32 %v5750_v9, %v5749_v35  ;;  %v3765_v16 = vld [vmem:[%s5696_s0 + $0x38] sm:$0xff] }
 0x2c1   :  { %v3585_v15 = vpack.c.bf16 %v3573_v0, %v3572_v12  ;;  %v3571_v8 = vmax.f32 %v3523_v42, 0.0  ;;  %v3544_v59 = vadd.f32 %v4443_v43, %v3447_v17  ;;  %v3361_v18 = vadd.f32 %v4282_v39, %v5751_v25 }
 0x2c2   :  { %v3535_v32 = vpop.f32.mrf.mxu1  ;;  %v3455_v26 = vadd.f32 %v4343_v6, %v3358_v7 }
 0x2c3   :  { %v3584_v52 = vpack.c.bf16 %v3571_v8, %v3570_v53  ;;  %v3536_v19 = vadd.f32 %v3535_v32, %v3439_v4  ;;  %v3576_v11 = vmax.f32 %v3544_v59, 0.0  ;;  %v3458_v17 = vadd.f32 %v4346_v60, %v3361_v18  ;;  %v3759_v59 = vld [vmem:[%s5696_s0 + $0x8] sm:$0xff]  ;;  %v3768_v18 = vld [vmem:[%s5696_s0 + $0x50] sm:$0xff] }
 0x2c4   :  { %v4444_v33 = vpop.f32.mrf.mxu1 }
 0x2c5   :  { %v3547_v3 = vadd.f32 %v4444_v33, %v3450_v63  ;;  %4469 = vmatprep.mubr.bf16.mxu0 %v3584_v52  ;;  %v3574_v12 = vmax.f32 %v3536_v19, 0.0  ;;  %v3762_v19 = vld [vmem:[%s5696_s0 + $0x20] sm:$0xff] }
 0x2c6   :  { %v3538_v20 = vpop.f32.mrf.mxu1  ;;  %4470 = vmatmul.mubr.bf16.gmra.mxu0 %v3585_v15 }
 0x2c7   :  { %v3577_v58 = vmax.f32 %v3547_v3, 0.0  ;;  %v3539_v51 = vadd.f32 %v3538_v20, %v3442_v48 }
 0x2c8   :  { %v4447_v10 = vpop.f32.mrf.mxu1 }
 0x2c9   :  { %v3587_v0 = vpack.c.bf16 %v3577_v58, %v3576_v11  ;;  %v3575_v42 = vmax.f32 %v3539_v51, 0.0  ;;  %v3560_v36 = vadd.f32 %v4447_v10, %v3463_v31  ;;  %v3763_v51 = vld [vmem:[%s5696_s0 + $0x28] sm:$0xff] }
 0x2ca   :  { %v3551_v22 = vpop.f32.mrf.mxu1 }
 0x2cb   :  { %v3586_v45 = vpack.c.bf16 %v3575_v42, %v3574_v12  ;;  %v3552_v34 = vadd.f32 %v3551_v22, %v3455_v26  ;;  %v3580_v44 = vmax.f32 %v3560_v36, 0.0  ;;  %v3766_v42 = vld [vmem:[%s5696_s0 + $0x40] sm:$0xff]  ;;  %v3769_v36 = vld [vmem:[%s5696_s0 + $0x58] sm:$0xff] }
 0x2cc   :  { %v4448_v1 = vpop.f32.mrf.mxu1 }
 0x2cd   :  { %v3563_v28 = vadd.f32 %v4448_v1, %v3466_v30  ;;  %4473 = vmatprep.mubr.bf16.mxu1 %v3586_v45  ;;  %v3578_v53 = vmax.f32 %v3552_v34, 0.0 }
 0x2ce   :  { %v3554_v43 = vpop.f32.mrf.mxu1  ;;  %4474 = vmatmul.mubr.bf16.vlgmr.msra.gmra.mxu1 %v3587_v0 }
 0x2cf   :  { %v3581_v41 = vmax.f32 %v3563_v28, 0.0  ;;  %v3555_v54 = vadd.f32 %v3554_v43, %v3458_v17  ;;  %v3767_v28 = vld [vmem:[%s5696_s0 + $0x48] sm:$0xff] }
 0x2d1   :  { %v3589_v15 = vpack.c.bf16 %v3581_v41, %v3580_v44  ;;  %v3579_v8 = vmax.f32 %v3555_v54, 0.0  ;;  %v3772_v54 = vld [vmem:[%s5696_s0 + $0x70] sm:$0xff] }
 0x2d3   :  { %v3588_v38 = vpack.c.bf16 %v3579_v8, %v3578_v53 }
 0x2d5   :  { %4477 = vmatprep.mubr.bf16.mxu1 %v3588_v38 }
 0x2d6   :  { %4478 = vmatmul.mubr.bf16.gmra.mxu1 %v3589_v15 }
 0x37e   :  { %v4467_v46 = vpop.f32.mrf.mxu0 }
 0x37f   :  { %v3704_v24 = vadd.f32 %v4467_v46, %v5627_v47  ;;  %v3770_v46 = vld [vmem:[%s5696_s0 + $0x60] sm:$0xff] }
 0x380   :  { %v3695_v55 = vpop.f32.mrf.mxu0 }
 0x381   :  { %v3776_v29 = vadd.f32 %v3760_v61, %v3704_v24  ;;  %v3696_v49 = vadd.f32 %v5627_v47, %v3695_v55 }
 0x382   :  { %v4468_v50 = vpop.f32.mrf.mxu0 }
 0x383   :  { %v3792_v4 = vmax.f32 %v3776_v29, 0.0  ;;  %v3774_v32 = vadd.f32 %v3758_v23, %v3696_v49  ;;  %v3707_v27 = vadd.f32 %v4468_v50, %v5627_v47  ;;  %v3773_v29 = vld [vmem:[%s5696_s0 + $0x78] sm:$0xff] }
 0x384   :  { %v3698_v52 = vpop.f32.mrf.mxu0 }
 0x385   :  { %3808 = vst [vmem:[#allocation4 + $0x10] sm:$0xff] %v3792_v4  ;;  %v3790_v63 = vmax.f32 %v3774_v32, 0.0  ;;  %v3777_v21 = vadd.f32 %v3761_v57, %v3707_v27  ;;  %v3699_v2 = vadd.f32 %v5627_v47, %v3698_v52  ;;  %v3771_v32 = vld [vmem:[%s5696_s0 + $0x68] sm:$0xff] }
 0x386   :  { %v4471_v39 = vpop.f32.mrf.mxu0 }
 0x387   :  { %3806 = vst [vmem:[#allocation4] sm:$0xff] %v3790_v63  ;;  %v3793_v33 = vmax.f32 %v3777_v21, 0.0  ;;  %v3775_v13 = vadd.f32 %v3759_v59, %v3699_v2  ;;  %v3720_v62 = vadd.f32 %v4471_v39, %v5627_v47 }
 0x388   :  { %v3711_v14 = vpop.f32.mrf.mxu0 }
 0x389   :  { %3809 = vst [vmem:[#allocation4 + $0x18] sm:$0xff] %v3793_v33  ;;  %v3791_v3 = vmax.f32 %v3775_v13, 0.0  ;;  %v3780_v48 = vadd.f32 %v3764_v56, %v3720_v62  ;;  %v3712_v5 = vadd.f32 %v5627_v47, %v3711_v14 }
 0x38a   :  { %v4472_v7 = vpop.f32.mrf.mxu0 }
 0x38b   :  { %3807 = vst [vmem:[#allocation4 + $0x8] sm:$0xff] %v3791_v3  ;;  %v3796_v20 = vmax.f32 %v3780_v48, 0.0  ;;  %v3778_v37 = vadd.f32 %v3762_v19, %v3712_v5  ;;  %v3723_v11 = vadd.f32 %v4472_v7, %v5627_v47 }
 0x38c   :  { %v3714_v58 = vpop.f32.mrf.mxu0 }
 0x38d   :  { %3812 = vst [vmem:[#allocation4 + $0x30] sm:$0xff] %v3796_v20  ;;  %v3794_v35 = vmax.f32 %v3778_v37, 0.0  ;;  %v3781_v9 = vadd.f32 %v3765_v16, %v3723_v11  ;;  %v3715_v6 = vadd.f32 %v5627_v47, %v3714_v58 }
 0x38e   :  { %v4475_v25 = vpop.f32.mrf.mxu1 }
 0x38f   :  { %3810 = vst [vmem:[#allocation4 + $0x20] sm:$0xff] %v3794_v35  ;;  %v3797_v40 = vmax.f32 %v3781_v9, 0.0  ;;  %v3779_v10 = vadd.f32 %v3763_v51, %v3715_v6  ;;  %v3736_v12 = vadd.f32 %v4475_v25, %v5627_v47 }
 0x390   :  { %v3727_v0 = vpop.f32.mrf.mxu1 }
 0x391   :  { %3813 = vst [vmem:[#allocation4 + $0x38] sm:$0xff] %v3797_v40  ;;  %v3795_v31 = vmax.f32 %v3779_v10, 0.0  ;;  %v3784_v60 = vadd.f32 %v3768_v18, %v3736_v12  ;;  %v3728_v22 = vadd.f32 %v5627_v47, %v3727_v0 }
 0x392   :  { %v4476_v45 = vpop.f32.mrf.mxu1 }
 0x393   :  { %3811 = vst [vmem:[#allocation4 + $0x28] sm:$0xff] %v3795_v31  ;;  %v3800_v26 = vmax.f32 %v3784_v60, 0.0  ;;  %v3782_v30 = vadd.f32 %v3766_v42, %v3728_v22  ;;  %v3739_v1 = vadd.f32 %v4476_v45, %v5627_v47 }
 0x394   :  { %v3730_v34 = vpop.f32.mrf.mxu1 }
 0x395   :  { %3816 = vst [vmem:[#allocation4 + $0x50] sm:$0xff] %v3800_v26  ;;  %v3798_v17 = vmax.f32 %v3782_v30, 0.0  ;;  %v3785_v43 = vadd.f32 %v3769_v36, %v3739_v1  ;;  %v3731_v44 = vadd.f32 %v5627_v47, %v3730_v34 }
 0x396   :  { %v4479_v41 = vpop.f32.mrf.mxu1 }
 0x397   :  { %3814 = vst [vmem:[#allocation4 + $0x40] sm:$0xff] %v3798_v17  ;;  %v3801_v53 = vmax.f32 %v3785_v43, 0.0  ;;  %v3783_v15 = vadd.f32 %v3767_v28, %v3731_v44  ;;  %v3752_v8 = vadd.f32 %v4479_v41, %v5627_v47 }
 0x398   :  { %v3743_v38 = vpop.f32.mrf.mxu1 }
 0x399   :  { %3817 = vst [vmem:[#allocation4 + $0x58] sm:$0xff] %v3801_v53  ;;  %v3799_v61 = vmax.f32 %v3783_v15, 0.0  ;;  %v3788_v24 = vadd.f32 %v3772_v54, %v3752_v8  ;;  %v3744_v55 = vadd.f32 %v5627_v47, %v3743_v38 }
 0x39a   :  { %v4480_v23 = vpop.f32.mrf.mxu1 }
 0x39b   :  { %3815 = vst [vmem:[#allocation4 + $0x48] sm:$0xff] %v3799_v61  ;;  %v3804_v49 = vmax.f32 %v3788_v24, 0.0  ;;  %v3786_v50 = vadd.f32 %v3770_v46, %v3744_v55  ;;  %v3755_v57 = vadd.f32 %v4480_v23, %v5627_v47 }
 0x39c   :  { %v3746_v4 = vpop.f32.mrf.mxu1 }
 0x39d   :  { %3820 = vst [vmem:[#allocation4 + $0x70] sm:$0xff] %v3804_v49  ;;  %v3802_v27 = vmax.f32 %v3786_v50, 0.0  ;;  %v3789_v52 = vadd.f32 %v3773_v29, %v3755_v57  ;;  %v3747_v59 = vadd.f32 %v5627_v47, %v3746_v4 }
 0x39f   :  { %3818 = vst [vmem:[#allocation4 + $0x60] sm:$0xff] %v3802_v27  ;;  %v3805_v63 = vmax.f32 %v3789_v52, 0.0  ;;  %v3787_v21 = vadd.f32 %v3771_v32, %v3747_v59 }
 0x3a1   :  { %3821 = vst [vmem:[#allocation4 + $0x78] sm:$0xff] %v3805_v63  ;;  %v3803_v2 = vmax.f32 %v3787_v21, 0.0 }
 0x3a3   :  { %3819 = vst [vmem:[#allocation4 + $0x68] sm:$0xff] %v3803_v2 }
 0x3a4   :  { %4690 = shalt.err (!%p4687_p4)
}
 0x3a5   :  { %s4703_s0 = smov 128   ;;  %s4704_s6 = smov 8  }
 0x3a6   :  { %3833 = dma.vmem_to_hbm [thread:$0]  %s3828_s20, 2048, %s5703_s7, [#allocation5], %s4703_s0, %s4703_s0, %s4704_s6  }
 0x3a7   :  { %4699 = dma.done.wait [#allocation5], 2048  }
 0x3a8   :  { %4700 = vsyncadd [#allocation5], 4294965248 }
 0x3a9   :  { %3837 = vsyncpa [#allocation5], 1 }

</bundles_post_ra>
